<compile_context>
chip_gen: v7x
topology: tpu7x:2x2x1
jax: 0.10.0
libtpu: 0.0.40
codegen_flags: <defaults>
</compile_context>

<pallas_src>
import functools

import jax
import jax.numpy as jnp
from jax import lax
from jax.experimental import pallas as pl
from jax.experimental.pallas import tpu as pltpu


def _spatial_attention_kernel(x_ref, w_ref, o_ref, pad_a_ref, pad_m_ref,
                              *, H, W, K):
    """Fused mean/max -> KxK conv -> sigmoid -> rescale for one batch block.

    x_ref     : (bb, C, H*W)   lane-dense input block (VMEM)
    w_ref     : (2*K*K,)       conv weights, channel-major (SMEM scalars)
    o_ref     : (bb, C, H*W)   lane-dense output block (VMEM)
    pad_a_ref : (1, H*W+2*pad) f32 scratch: flat avg map with zero halo
    pad_m_ref : (1, H*W+2*pad) f32 scratch: flat max map with zero halo
    """
    bb = x_ref.shape[0]
    HW = H * W
    P = K // 2
    pad = P * (W + 1)            # max |di*W + dj| over di, dj in [-P, P]

    # ---- hoisted: all conv weights read from SMEM once --------------------
    w = [w_ref[i] for i in range(2 * K * K)]

    # ---- hoisted: column-validity masks (one per dj), computed once -------
    # col(p) = p mod W via an exact float trick (avoids vector int div/mod).
    pos_i = lax.broadcasted_iota(jnp.int32, (1, HW), 1)
    pos_f = pos_i.astype(jnp.float32)
    row_f = jnp.floor((pos_f + 0.5) * (1.0 / float(W)))
    col_i = pos_i - W * row_f.astype(jnp.int32)
    col_masks = [
        jnp.logical_and(col_i >= -dj, col_i <= (W - 1) - dj)
        for dj in range(-P, P + 1)
    ]

    # ---- zero the halo once; only the interior is rewritten per sample ----
    pad_a_ref[...] = jnp.zeros(pad_a_ref.shape, jnp.float32)
    pad_m_ref[...] = jnp.zeros(pad_m_ref.shape, jnp.float32)

    @pl.loop(0, bb)
    def _per_sample(b):
        xb = x_ref[b]                                 # (C, HW), native dtype
        xf = xb.astype(jnp.float32)
        avg = jnp.mean(xf, axis=0, keepdims=True)     # (1, HW) f32
        mx = jnp.max(xf, axis=0, keepdims=True)       # (1, HW) f32

        # Flat maps into the zero-haloed scratch (single wide stores).
        pad_a_ref[:, pad:pad + HW] = avg
        pad_m_ref[:, pad:pad + HW] = mx

        # KxK "same" conv on the 2-channel map: 2*K*K lane-dense loads at
        # static offsets + FMAs.  Zero halo handles vertical out-of-range
        # taps; col_masks handle horizontal wrap of the flat layout.
        row_accs = []
        for di in range(-P, P + 1):
            racc = None
            for dj in range(-P, P + 1):
                start = pad + di * W + dj
                seg_a = pad_a_ref[:, start:start + HW]      # (1, HW)
                seg_m = pad_m_ref[:, start:start + HW]      # (1, HW)
                wa = w[(di + P) * K + (dj + P)]             # avg-channel tap
                wm = w[K * K + (di + P) * K + (dj + P)]     # max-channel tap
                tap = jnp.where(col_masks[dj + P],
                                seg_a * wa + seg_m * wm, 0.0)
                racc = tap if racc is None else racc + tap
            row_accs.append(racc)
        # Tree-sum the per-row accumulators (keeps serial add chains short).
        while len(row_accs) > 1:
            nxt = [row_accs[i] + row_accs[i + 1]
                   for i in range(0, len(row_accs) - 1, 2)]
            if len(row_accs) % 2:
                nxt.append(row_accs[-1])
            row_accs = nxt

        attn = jax.nn.sigmoid(row_accs[0])            # (1, HW) f32

        # Rescale: (C, HW) * (1, HW) sublane-broadcast, one dense store.
        scale = attn.astype(xb.dtype)
        o_ref[b] = (xb * scale).astype(o_ref.dtype)


def spatial_attention(x, weight, kernel_size=7, batch_block=None,
                      block_bytes_cap=4 * 1024 * 1024):
    """x: (B, C, H, W); weight: (1, 2, K, K) torch-OIHW conv weight (no bias)."""
    B, C, H, W = x.shape
    K = kernel_size
    P = K // 2
    HW = H * W

    # Lane-dense layout for the big tensor (free reshape at the XLA level).
    x_flat = x.reshape(B, C, HW)
    # Flattened weights, index = in_ch * K*K + ki * K + kj (SMEM scalars).
    w_flat = weight.reshape(2 * K * K).astype(jnp.float32)

    if batch_block is None:
        per_sample = C * HW * x.dtype.itemsize
        bb = max(1, min(B, block_bytes_cap // per_sample))
        # Keep >= 2 grid steps when possible so the "parallel" batch axis can
        # shard across the two TensorCores on v7x.
        if B > 1 and bb >= B:
            bb = (B + 1) // 2
    else:
        bb = batch_block
    bb = int(min(max(1, bb), B))
    num_blocks = pl.cdiv(B, bb)          # tail block may be partial

    block_bytes = bb * C * HW * x.dtype.itemsize
    # 2x double-buffered input + 2x output blocks + scratch/temporaries.
    vmem_limit = int(min(64 * 1024 * 1024,
                         max(32 * 1024 * 1024, 4 * block_bytes + (8 << 20))))

    pad_len = HW + 2 * P * (W + 1)

    kernel = functools.partial(_spatial_attention_kernel, H=H, W=W, K=K)

    cost = pl.CostEstimate(
        flops=int(3 * B * C * HW + 4 * K * K * B * HW),
        transcendentals=int(B * HW),
        bytes_accessed=int(2 * B * C * HW * x.dtype.itemsize),
    )

    out_flat = pl.pallas_call(
        kernel,
        out_shape=jax.ShapeDtypeStruct((B, C, HW), x.dtype),
        grid=(num_blocks,),
        in_specs=[
            pl.BlockSpec((bb, C, HW), lambda b: (b, 0, 0)),
            pl.BlockSpec(memory_space=pltpu.MemorySpace.SMEM),
        ],
        out_specs=pl.BlockSpec((bb, C, HW), lambda b: (b, 0, 0)),
        scratch_shapes=[
            pltpu.VMEM((1, pad_len), jnp.float32),
            pltpu.VMEM((1, pad_len), jnp.float32),
        ],
        compiler_params=pltpu.CompilerParams(
            dimension_semantics=("parallel",),
            vmem_limit_bytes=vmem_limit),
        cost_estimate=cost,
    )(x_flat, w_flat)

    return out_flat.reshape(B, C, H, W)


def _reference(x, weight):
    avg = jnp.mean(x, axis=1, keepdims=True)
    mx = jnp.max(x, axis=1, keepdims=True)
    amap = jnp.concatenate([avg, mx], axis=1)          # (B, 2, H, W)
    conv = lax.conv_general_dilated(
        amap, weight, window_strides=(1, 1), padding="SAME",
        dimension_numbers=("NCHW", "OIHW", "NCHW"))
    return x * jax.nn.sigmoid(conv)


if __name__ == "__main__":
    key = jax.random.PRNGKey(0)
    kx, kw = jax.random.split(key)

    B, C, H, W = 2, 4, 16, 16
    K = 7

    x = jax.random.normal(kx, (B, C, H, W), dtype=jnp.float32)

    # Deterministic kaiming-uniform-like init for Conv2d(2, 1, 7, bias=False).
    fan_in = 2 * K * K
    bound = 1.0 / (fan_in ** 0.5)
    weight = jax.random.uniform(
        kw, (1, 2, K, K), dtype=jnp.float32, minval=-bound, maxval=bound)

    out = spatial_attention(x, weight, kernel_size=K)
    out = jax.block_until_ready(out)

    ref = _reference(x, weight)
    assert out.shape == (B, C, H, W)
    err = float(jnp.max(jnp.abs(out - ref)))
    assert err < 1e-4, f"max abs error {err}"

    print("KERNEL_OK")
</pallas_src>

<mosaic_0001>
module attributes {stable_mosaic.version = 11 : i64} {
  func.func @_spatial_attention_kernel(%arg0: i32, %arg1: memref<1x4x256xf32, #tpu.memory_space<vmem>>, %arg2: memref<98xf32, #tpu.memory_space<smem>>, %arg3: memref<1x4x256xf32, #tpu.memory_space<vmem>>, %arg4: memref<1x358xf32, #tpu.memory_space<vmem>>, %arg5: memref<1x358xf32, #tpu.memory_space<vmem>>) attributes {dimension_semantics = [#tpu.dimension_semantics<parallel>], iteration_bounds = array<i64: 2>, scalar_prefetch = 0 : i64, scratch_operands = 2 : i64, tpu.core_type = #tpu.core_type<tc>, window_params = [{transform_indices = @transform_0, window_bounds = array<i64: 1, 4, 256>}, {transform_indices = @transform_1, window_bounds = array<i64: 98>}, {transform_indices = @transform_2, window_bounds = array<i64: 1, 4, 256>}]} {
    %c0 = arith.constant 0 : index
    %0 = memref.load %arg2[%c0] : memref<98xf32, #tpu.memory_space<smem>>
    %c1 = arith.constant 1 : index
    %1 = memref.load %arg2[%c1] : memref<98xf32, #tpu.memory_space<smem>>
    %c2 = arith.constant 2 : index
    %2 = memref.load %arg2[%c2] : memref<98xf32, #tpu.memory_space<smem>>
    %c3 = arith.constant 3 : index
    %3 = memref.load %arg2[%c3] : memref<98xf32, #tpu.memory_space<smem>>
    %c4 = arith.constant 4 : index
    %4 = memref.load %arg2[%c4] : memref<98xf32, #tpu.memory_space<smem>>
    %c5 = arith.constant 5 : index
    %5 = memref.load %arg2[%c5] : memref<98xf32, #tpu.memory_space<smem>>
    %c6 = arith.constant 6 : index
    %6 = memref.load %arg2[%c6] : memref<98xf32, #tpu.memory_space<smem>>
    %c7 = arith.constant 7 : index
    %7 = memref.load %arg2[%c7] : memref<98xf32, #tpu.memory_space<smem>>
    %c8 = arith.constant 8 : index
    %8 = memref.load %arg2[%c8] : memref<98xf32, #tpu.memory_space<smem>>
    %c9 = arith.constant 9 : index
    %9 = memref.load %arg2[%c9] : memref<98xf32, #tpu.memory_space<smem>>
    %c10 = arith.constant 10 : index
    %10 = memref.load %arg2[%c10] : memref<98xf32, #tpu.memory_space<smem>>
    %c11 = arith.constant 11 : index
    %11 = memref.load %arg2[%c11] : memref<98xf32, #tpu.memory_space<smem>>
    %c12 = arith.constant 12 : index
    %12 = memref.load %arg2[%c12] : memref<98xf32, #tpu.memory_space<smem>>
    %c13 = arith.constant 13 : index
    %13 = memref.load %arg2[%c13] : memref<98xf32, #tpu.memory_space<smem>>
    %c14 = arith.constant 14 : index
    %14 = memref.load %arg2[%c14] : memref<98xf32, #tpu.memory_space<smem>>
    %c15 = arith.constant 15 : index
    %15 = memref.load %arg2[%c15] : memref<98xf32, #tpu.memory_space<smem>>
    %c16 = arith.constant 16 : index
    %16 = memref.load %arg2[%c16] : memref<98xf32, #tpu.memory_space<smem>>
    %c17 = arith.constant 17 : index
    %17 = memref.load %arg2[%c17] : memref<98xf32, #tpu.memory_space<smem>>
    %c18 = arith.constant 18 : index
    %18 = memref.load %arg2[%c18] : memref<98xf32, #tpu.memory_space<smem>>
    %c19 = arith.constant 19 : index
    %19 = memref.load %arg2[%c19] : memref<98xf32, #tpu.memory_space<smem>>
    %c20 = arith.constant 20 : index
    %20 = memref.load %arg2[%c20] : memref<98xf32, #tpu.memory_space<smem>>
    %c21 = arith.constant 21 : index
    %21 = memref.load %arg2[%c21] : memref<98xf32, #tpu.memory_space<smem>>
    %c22 = arith.constant 22 : index
    %22 = memref.load %arg2[%c22] : memref<98xf32, #tpu.memory_space<smem>>
    %c23 = arith.constant 23 : index
    %23 = memref.load %arg2[%c23] : memref<98xf32, #tpu.memory_space<smem>>
    %c24 = arith.constant 24 : index
    %24 = memref.load %arg2[%c24] : memref<98xf32, #tpu.memory_space<smem>>
    %c25 = arith.constant 25 : index
    %25 = memref.load %arg2[%c25] : memref<98xf32, #tpu.memory_space<smem>>
    %c26 = arith.constant 26 : index
    %26 = memref.load %arg2[%c26] : memref<98xf32, #tpu.memory_space<smem>>
    %c27 = arith.constant 27 : index
    %27 = memref.load %arg2[%c27] : memref<98xf32, #tpu.memory_space<smem>>
    %c28 = arith.constant 28 : index
    %28 = memref.load %arg2[%c28] : memref<98xf32, #tpu.memory_space<smem>>
    %c29 = arith.constant 29 : index
    %29 = memref.load %arg2[%c29] : memref<98xf32, #tpu.memory_space<smem>>
    %c30 = arith.constant 30 : index
    %30 = memref.load %arg2[%c30] : memref<98xf32, #tpu.memory_space<smem>>
    %c31 = arith.constant 31 : index
    %31 = memref.load %arg2[%c31] : memref<98xf32, #tpu.memory_space<smem>>
    %c32 = arith.constant 32 : index
    %32 = memref.load %arg2[%c32] : memref<98xf32, #tpu.memory_space<smem>>
    %c33 = arith.constant 33 : index
    %33 = memref.load %arg2[%c33] : memref<98xf32, #tpu.memory_space<smem>>
    %c34 = arith.constant 34 : index
    %34 = memref.load %arg2[%c34] : memref<98xf32, #tpu.memory_space<smem>>
    %c35 = arith.constant 35 : index
    %35 = memref.load %arg2[%c35] : memref<98xf32, #tpu.memory_space<smem>>
    %c36 = arith.constant 36 : index
    %36 = memref.load %arg2[%c36] : memref<98xf32, #tpu.memory_space<smem>>
    %c37 = arith.constant 37 : index
    %37 = memref.load %arg2[%c37] : memref<98xf32, #tpu.memory_space<smem>>
    %c38 = arith.constant 38 : index
    %38 = memref.load %arg2[%c38] : memref<98xf32, #tpu.memory_space<smem>>
    %c39 = arith.constant 39 : index
    %39 = memref.load %arg2[%c39] : memref<98xf32, #tpu.memory_space<smem>>
    %c40 = arith.constant 40 : index
    %40 = memref.load %arg2[%c40] : memref<98xf32, #tpu.memory_space<smem>>
    %c41 = arith.constant 41 : index
    %41 = memref.load %arg2[%c41] : memref<98xf32, #tpu.memory_space<smem>>
    %c42 = arith.constant 42 : index
    %42 = memref.load %arg2[%c42] : memref<98xf32, #tpu.memory_space<smem>>
    %c43 = arith.constant 43 : index
    %43 = memref.load %arg2[%c43] : memref<98xf32, #tpu.memory_space<smem>>
    %c44 = arith.constant 44 : index
    %44 = memref.load %arg2[%c44] : memref<98xf32, #tpu.memory_space<smem>>
    %c45 = arith.constant 45 : index
    %45 = memref.load %arg2[%c45] : memref<98xf32, #tpu.memory_space<smem>>
    %c46 = arith.constant 46 : index
    %46 = memref.load %arg2[%c46] : memref<98xf32, #tpu.memory_space<smem>>
    %c47 = arith.constant 47 : index
    %47 = memref.load %arg2[%c47] : memref<98xf32, #tpu.memory_space<smem>>
    %c48 = arith.constant 48 : index
    %48 = memref.load %arg2[%c48] : memref<98xf32, #tpu.memory_space<smem>>
    %c49 = arith.constant 49 : index
    %49 = memref.load %arg2[%c49] : memref<98xf32, #tpu.memory_space<smem>>
    %c50 = arith.constant 50 : index
    %50 = memref.load %arg2[%c50] : memref<98xf32, #tpu.memory_space<smem>>
    %c51 = arith.constant 51 : index
    %51 = memref.load %arg2[%c51] : memref<98xf32, #tpu.memory_space<smem>>
    %c52 = arith.constant 52 : index
    %52 = memref.load %arg2[%c52] : memref<98xf32, #tpu.memory_space<smem>>
    %c53 = arith.constant 53 : index
    %53 = memref.load %arg2[%c53] : memref<98xf32, #tpu.memory_space<smem>>
    %c54 = arith.constant 54 : index
    %54 = memref.load %arg2[%c54] : memref<98xf32, #tpu.memory_space<smem>>
    %c55 = arith.constant 55 : index
    %55 = memref.load %arg2[%c55] : memref<98xf32, #tpu.memory_space<smem>>
    %c56 = arith.constant 56 : index
    %56 = memref.load %arg2[%c56] : memref<98xf32, #tpu.memory_space<smem>>
    %c57 = arith.constant 57 : index
    %57 = memref.load %arg2[%c57] : memref<98xf32, #tpu.memory_space<smem>>
    %c58 = arith.constant 58 : index
    %58 = memref.load %arg2[%c58] : memref<98xf32, #tpu.memory_space<smem>>
    %c59 = arith.constant 59 : index
    %59 = memref.load %arg2[%c59] : memref<98xf32, #tpu.memory_space<smem>>
    %c60 = arith.constant 60 : index
    %60 = memref.load %arg2[%c60] : memref<98xf32, #tpu.memory_space<smem>>
    %c61 = arith.constant 61 : index
    %61 = memref.load %arg2[%c61] : memref<98xf32, #tpu.memory_space<smem>>
    %c62 = arith.constant 62 : index
    %62 = memref.load %arg2[%c62] : memref<98xf32, #tpu.memory_space<smem>>
    %c63 = arith.constant 63 : index
    %63 = memref.load %arg2[%c63] : memref<98xf32, #tpu.memory_space<smem>>
    %c64 = arith.constant 64 : index
    %64 = memref.load %arg2[%c64] : memref<98xf32, #tpu.memory_space<smem>>
    %c65 = arith.constant 65 : index
    %65 = memref.load %arg2[%c65] : memref<98xf32, #tpu.memory_space<smem>>
    %c66 = arith.constant 66 : index
    %66 = memref.load %arg2[%c66] : memref<98xf32, #tpu.memory_space<smem>>
    %c67 = arith.constant 67 : index
    %67 = memref.load %arg2[%c67] : memref<98xf32, #tpu.memory_space<smem>>
    %c68 = arith.constant 68 : index
    %68 = memref.load %arg2[%c68] : memref<98xf32, #tpu.memory_space<smem>>
    %c69 = arith.constant 69 : index
    %69 = memref.load %arg2[%c69] : memref<98xf32, #tpu.memory_space<smem>>
    %c70 = arith.constant 70 : index
    %70 = memref.load %arg2[%c70] : memref<98xf32, #tpu.memory_space<smem>>
    %c71 = arith.constant 71 : index
    %71 = memref.load %arg2[%c71] : memref<98xf32, #tpu.memory_space<smem>>
    %c72 = arith.constant 72 : index
    %72 = memref.load %arg2[%c72] : memref<98xf32, #tpu.memory_space<smem>>
    %c73 = arith.constant 73 : index
    %73 = memref.load %arg2[%c73] : memref<98xf32, #tpu.memory_space<smem>>
    %c74 = arith.constant 74 : index
    %74 = memref.load %arg2[%c74] : memref<98xf32, #tpu.memory_space<smem>>
    %c75 = arith.constant 75 : index
    %75 = memref.load %arg2[%c75] : memref<98xf32, #tpu.memory_space<smem>>
    %c76 = arith.constant 76 : index
    %76 = memref.load %arg2[%c76] : memref<98xf32, #tpu.memory_space<smem>>
    %c77 = arith.constant 77 : index
    %77 = memref.load %arg2[%c77] : memref<98xf32, #tpu.memory_space<smem>>
    %c78 = arith.constant 78 : index
    %78 = memref.load %arg2[%c78] : memref<98xf32, #tpu.memory_space<smem>>
    %c79 = arith.constant 79 : index
    %79 = memref.load %arg2[%c79] : memref<98xf32, #tpu.memory_space<smem>>
    %c80 = arith.constant 80 : index
    %80 = memref.load %arg2[%c80] : memref<98xf32, #tpu.memory_space<smem>>
    %c81 = arith.constant 81 : index
    %81 = memref.load %arg2[%c81] : memref<98xf32, #tpu.memory_space<smem>>
    %c82 = arith.constant 82 : index
    %82 = memref.load %arg2[%c82] : memref<98xf32, #tpu.memory_space<smem>>
    %c83 = arith.constant 83 : index
    %83 = memref.load %arg2[%c83] : memref<98xf32, #tpu.memory_space<smem>>
    %c84 = arith.constant 84 : index
    %84 = memref.load %arg2[%c84] : memref<98xf32, #tpu.memory_space<smem>>
    %c85 = arith.constant 85 : index
    %85 = memref.load %arg2[%c85] : memref<98xf32, #tpu.memory_space<smem>>
    %c86 = arith.constant 86 : index
    %86 = memref.load %arg2[%c86] : memref<98xf32, #tpu.memory_space<smem>>
    %c87 = arith.constant 87 : index
    %87 = memref.load %arg2[%c87] : memref<98xf32, #tpu.memory_space<smem>>
    %c88 = arith.constant 88 : index
    %88 = memref.load %arg2[%c88] : memref<98xf32, #tpu.memory_space<smem>>
    %c89 = arith.constant 89 : index
    %89 = memref.load %arg2[%c89] : memref<98xf32, #tpu.memory_space<smem>>
    %c90 = arith.constant 90 : index
    %90 = memref.load %arg2[%c90] : memref<98xf32, #tpu.memory_space<smem>>
    %c91 = arith.constant 91 : index
    %91 = memref.load %arg2[%c91] : memref<98xf32, #tpu.memory_space<smem>>
    %c92 = arith.constant 92 : index
    %92 = memref.load %arg2[%c92] : memref<98xf32, #tpu.memory_space<smem>>
    %c93 = arith.constant 93 : index
    %93 = memref.load %arg2[%c93] : memref<98xf32, #tpu.memory_space<smem>>
    %c94 = arith.constant 94 : index
    %94 = memref.load %arg2[%c94] : memref<98xf32, #tpu.memory_space<smem>>
    %c95 = arith.constant 95 : index
    %95 = memref.load %arg2[%c95] : memref<98xf32, #tpu.memory_space<smem>>
    %c96 = arith.constant 96 : index
    %96 = memref.load %arg2[%c96] : memref<98xf32, #tpu.memory_space<smem>>
    %c97 = arith.constant 97 : index
    %97 = memref.load %arg2[%c97] : memref<98xf32, #tpu.memory_space<smem>>
    %98 = tpu.iota {dimensions = array<i32: 1>} : vector<1x256xi32>
    %99 = arith.sitofp %98 : vector<1x256xi32> to vector<1x256xf32>
    %cst = arith.constant 5.000000e-01 : f32
    %100 = vector.broadcast %cst : f32 to vector<1x256xf32>
    %101 = arith.addf %99, %100 : vector<1x256xf32>
    %cst_0 = arith.constant 6.250000e-02 : f32
    %102 = vector.broadcast %cst_0 : f32 to vector<1x256xf32>
    %103 = arith.mulf %101, %102 : vector<1x256xf32>
    %104 = math.floor %103 : vector<1x256xf32>
    %105 = arith.fptosi %104 : vector<1x256xf32> to vector<1x256xi32>
    %c16_i32 = arith.constant 16 : i32
    %106 = vector.broadcast %c16_i32 : i32 to vector<1x256xi32>
    %107 = arith.muli %106, %105 : vector<1x256xi32>
    %108 = arith.subi %98, %107 : vector<1x256xi32>
    %c3_i32 = arith.constant 3 : i32
    %109 = vector.broadcast %c3_i32 : i32 to vector<1x256xi32>
    %110 = arith.cmpi sge, %108, %109 : vector<1x256xi32>
    %c18_i32 = arith.constant 18 : i32
    %111 = vector.broadcast %c18_i32 : i32 to vector<1x256xi32>
    %112 = arith.cmpi sle, %108, %111 : vector<1x256xi32>
    %113 = arith.andi %110, %112 : vector<1x256xi1>
    %c2_i32 = arith.constant 2 : i32
    %114 = vector.broadcast %c2_i32 : i32 to vector<1x256xi32>
    %115 = arith.cmpi sge, %108, %114 : vector<1x256xi32>
    %c17_i32 = arith.constant 17 : i32
    %116 = vector.broadcast %c17_i32 : i32 to vector<1x256xi32>
    %117 = arith.cmpi sle, %108, %116 : vector<1x256xi32>
    %118 = arith.andi %115, %117 : vector<1x256xi1>
    %c1_i32 = arith.constant 1 : i32
    %119 = vector.broadcast %c1_i32 : i32 to vector<1x256xi32>
    %120 = arith.cmpi sge, %108, %119 : vector<1x256xi32>
    %c16_i32_1 = arith.constant 16 : i32
    %121 = vector.broadcast %c16_i32_1 : i32 to vector<1x256xi32>
    %122 = arith.cmpi sle, %108, %121 : vector<1x256xi32>
    %123 = arith.andi %120, %122 : vector<1x256xi1>
    %c0_i32 = arith.constant 0 : i32
    %124 = vector.broadcast %c0_i32 : i32 to vector<1x256xi32>
    %125 = arith.cmpi sge, %108, %124 : vector<1x256xi32>
    %c15_i32 = arith.constant 15 : i32
    %126 = vector.broadcast %c15_i32 : i32 to vector<1x256xi32>
    %127 = arith.cmpi sle, %108, %126 : vector<1x256xi32>
    %128 = arith.andi %125, %127 : vector<1x256xi1>
    %c-1_i32 = arith.constant -1 : i32
    %129 = vector.broadcast %c-1_i32 : i32 to vector<1x256xi32>
    %130 = arith.cmpi sge, %108, %129 : vector<1x256xi32>
    %c14_i32 = arith.constant 14 : i32
    %131 = vector.broadcast %c14_i32 : i32 to vector<1x256xi32>
    %132 = arith.cmpi sle, %108, %131 : vector<1x256xi32>
    %133 = arith.andi %130, %132 : vector<1x256xi1>
    %c-2_i32 = arith.constant -2 : i32
    %134 = vector.broadcast %c-2_i32 : i32 to vector<1x256xi32>
    %135 = arith.cmpi sge, %108, %134 : vector<1x256xi32>
    %c13_i32 = arith.constant 13 : i32
    %136 = vector.broadcast %c13_i32 : i32 to vector<1x256xi32>
    %137 = arith.cmpi sle, %108, %136 : vector<1x256xi32>
    %138 = arith.andi %135, %137 : vector<1x256xi1>
    %c-3_i32 = arith.constant -3 : i32
    %139 = vector.broadcast %c-3_i32 : i32 to vector<1x256xi32>
    %140 = arith.cmpi sge, %108, %139 : vector<1x256xi32>
    %c12_i32 = arith.constant 12 : i32
    %141 = vector.broadcast %c12_i32 : i32 to vector<1x256xi32>
    %142 = arith.cmpi sle, %108, %141 : vector<1x256xi32>
    %143 = arith.andi %140, %142 : vector<1x256xi1>
    %cst_2 = arith.constant 0.000000e+00 : f32
    %144 = vector.broadcast %cst_2 : f32 to vector<1x358xf32>
    %c0_3 = arith.constant 0 : index
    %c0_4 = arith.constant 0 : index
    %145 = vector.load %arg4[%c0_3, %c0_4] : memref<1x358xf32, #tpu.memory_space<vmem>>, vector<1x358xf32>
    tpu.vector_store %arg4[%c0_3, %c0_4], %144 {strides = array<i32>} : memref<1x358xf32, #tpu.memory_space<vmem>>, vector<1x358xf32>,
    %cst_5 = arith.constant 0.000000e+00 : f32
    %146 = vector.broadcast %cst_5 : f32 to vector<1x358xf32>
    %c0_6 = arith.constant 0 : index
    %c0_7 = arith.constant 0 : index
    %147 = vector.load %arg5[%c0_6, %c0_7] : memref<1x358xf32, #tpu.memory_space<vmem>>, vector<1x358xf32>
    tpu.vector_store %arg5[%c0_6, %c0_7], %146 {strides = array<i32>} : memref<1x358xf32, #tpu.memory_space<vmem>>, vector<1x358xf32>,
    %c0_i32_8 = arith.constant 0 : i32
    %c1_i32_9 = arith.constant 1 : i32
    %148 = arith.muli %c0_i32_8, %c1_i32_9 : i32
    %c0_i32_10 = arith.constant 0 : i32
    %149 = arith.addi %c0_i32_10, %148 : i32
    %150 = arith.index_cast %149 : i32 to index
    %c0_11 = arith.constant 0 : index
    %c0_12 = arith.constant 0 : index
    %151 = vector.load %arg1[%150, %c0_11, %c0_12] : memref<1x4x256xf32, #tpu.memory_space<vmem>>, vector<1x4x256xf32>
    %152 = vector.shape_cast %151 : vector<1x4x256xf32> to vector<4x256xf32>
    %cst_13 = arith.constant dense<0.000000e+00> : vector<256xf32>
    %153 = vector.multi_reduction <add>, %152, %cst_13 [0] : vector<4x256xf32> to vector<256xf32>
    %154 = vector.shape_cast %153 : vector<256xf32> to vector<1x256xf32>
    %cst_14 = arith.constant 4.000000e+00 : f32
    %155 = vector.broadcast %cst_14 : f32 to vector<1x256xf32>
    %156 = arith.divf %154, %155 : vector<1x256xf32>
    %cst_15 = arith.constant dense<0xFF800000> : vector<256xf32>
    %157 = vector.multi_reduction <maximumf>, %152, %cst_15 [0] : vector<4x256xf32> to vector<256xf32>
    %158 = vector.shape_cast %157 : vector<256xf32> to vector<1x256xf32>
    %c0_16 = arith.constant 0 : index
    %c51_17 = arith.constant 51 : index
    %159 = vector.load %arg4[%c0_16, %c51_17] : memref<1x358xf32, #tpu.memory_space<vmem>>, vector<1x256xf32>
    tpu.vector_store %arg4[%c0_16, %c51_17], %156 {strides = array<i32>} : memref<1x358xf32, #tpu.memory_space<vmem>>, vector<1x256xf32>,
    %c0_18 = arith.constant 0 : index
    %c51_19 = arith.constant 51 : index
    %160 = vector.load %arg5[%c0_18, %c51_19] : memref<1x358xf32, #tpu.memory_space<vmem>>, vector<1x256xf32>
    tpu.vector_store %arg5[%c0_18, %c51_19], %158 {strides = array<i32>} : memref<1x358xf32, #tpu.memory_space<vmem>>, vector<1x256xf32>,
    %c0_20 = arith.constant 0 : index
    %c0_21 = arith.constant 0 : index
    %161 = vector.load %arg4[%c0_20, %c0_21] : memref<1x358xf32, #tpu.memory_space<vmem>>, vector<1x256xf32>
    %c0_22 = arith.constant 0 : index
    %c0_23 = arith.constant 0 : index
    %162 = vector.load %arg5[%c0_22, %c0_23] : memref<1x358xf32, #tpu.memory_space<vmem>>, vector<1x256xf32>
    %163 = vector.broadcast %0 : f32 to vector<1x256xf32>
    %164 = arith.mulf %161, %163 : vector<1x256xf32>
    %165 = vector.broadcast %49 : f32 to vector<1x256xf32>
    %166 = arith.mulf %162, %165 : vector<1x256xf32>
    %167 = arith.addf %164, %166 : vector<1x256xf32>
    %cst_24 = arith.constant 0.000000e+00 : f32
    %168 = vector.broadcast %cst_24 : f32 to vector<1x256xf32>
    %169 = arith.select %113, %167, %168 : vector<1x256xi1>, vector<1x256xf32>
    %c0_25 = arith.constant 0 : index
    %c1_26 = arith.constant 1 : index
    %170 = vector.load %arg4[%c0_25, %c1_26] : memref<1x358xf32, #tpu.memory_space<vmem>>, vector<1x256xf32>
    %c0_27 = arith.constant 0 : index
    %c1_28 = arith.constant 1 : index
    %171 = vector.load %arg5[%c0_27, %c1_28] : memref<1x358xf32, #tpu.memory_space<vmem>>, vector<1x256xf32>
    %172 = vector.broadcast %1 : f32 to vector<1x256xf32>
    %173 = arith.mulf %170, %172 : vector<1x256xf32>
    %174 = vector.broadcast %50 : f32 to vector<1x256xf32>
    %175 = arith.mulf %171, %174 : vector<1x256xf32>
    %176 = arith.addf %173, %175 : vector<1x256xf32>
    %cst_29 = arith.constant 0.000000e+00 : f32
    %177 = vector.broadcast %cst_29 : f32 to vector<1x256xf32>
    %178 = arith.select %118, %176, %177 : vector<1x256xi1>, vector<1x256xf32>
    %179 = arith.addf %169, %178 : vector<1x256xf32>
    %c0_30 = arith.constant 0 : index
    %c2_31 = arith.constant 2 : index
    %180 = vector.load %arg4[%c0_30, %c2_31] : memref<1x358xf32, #tpu.memory_space<vmem>>, vector<1x256xf32>
    %c0_32 = arith.constant 0 : index
    %c2_33 = arith.constant 2 : index
    %181 = vector.load %arg5[%c0_32, %c2_33] : memref<1x358xf32, #tpu.memory_space<vmem>>, vector<1x256xf32>
    %182 = vector.broadcast %2 : f32 to vector<1x256xf32>
    %183 = arith.mulf %180, %182 : vector<1x256xf32>
    %184 = vector.broadcast %51 : f32 to vector<1x256xf32>
    %185 = arith.mulf %181, %184 : vector<1x256xf32>
    %186 = arith.addf %183, %185 : vector<1x256xf32>
    %cst_34 = arith.constant 0.000000e+00 : f32
    %187 = vector.broadcast %cst_34 : f32 to vector<1x256xf32>
    %188 = arith.select %123, %186, %187 : vector<1x256xi1>, vector<1x256xf32>
    %189 = arith.addf %179, %188 : vector<1x256xf32>
    %c0_35 = arith.constant 0 : index
    %c3_36 = arith.constant 3 : index
    %190 = vector.load %arg4[%c0_35, %c3_36] : memref<1x358xf32, #tpu.memory_space<vmem>>, vector<1x256xf32>
    %c0_37 = arith.constant 0 : index
    %c3_38 = arith.constant 3 : index
    %191 = vector.load %arg5[%c0_37, %c3_38] : memref<1x358xf32, #tpu.memory_space<vmem>>, vector<1x256xf32>
    %192 = vector.broadcast %3 : f32 to vector<1x256xf32>
    %193 = arith.mulf %190, %192 : vector<1x256xf32>
    %194 = vector.broadcast %52 : f32 to vector<1x256xf32>
    %195 = arith.mulf %191, %194 : vector<1x256xf32>
    %196 = arith.addf %193, %195 : vector<1x256xf32>
    %cst_39 = arith.constant 0.000000e+00 : f32
    %197 = vector.broadcast %cst_39 : f32 to vector<1x256xf32>
    %198 = arith.select %128, %196, %197 : vector<1x256xi1>, vector<1x256xf32>
    %199 = arith.addf %189, %198 : vector<1x256xf32>
    %c0_40 = arith.constant 0 : index
    %c4_41 = arith.constant 4 : index
    %200 = vector.load %arg4[%c0_40, %c4_41] : memref<1x358xf32, #tpu.memory_space<vmem>>, vector<1x256xf32>
    %c0_42 = arith.constant 0 : index
    %c4_43 = arith.constant 4 : index
    %201 = vector.load %arg5[%c0_42, %c4_43] : memref<1x358xf32, #tpu.memory_space<vmem>>, vector<1x256xf32>
    %202 = vector.broadcast %4 : f32 to vector<1x256xf32>
    %203 = arith.mulf %200, %202 : vector<1x256xf32>
    %204 = vector.broadcast %53 : f32 to vector<1x256xf32>
    %205 = arith.mulf %201, %204 : vector<1x256xf32>
    %206 = arith.addf %203, %205 : vector<1x256xf32>
    %cst_44 = arith.constant 0.000000e+00 : f32
    %207 = vector.broadcast %cst_44 : f32 to vector<1x256xf32>
    %208 = arith.select %133, %206, %207 : vector<1x256xi1>, vector<1x256xf32>
    %209 = arith.addf %199, %208 : vector<1x256xf32>
    %c0_45 = arith.constant 0 : index
    %c5_46 = arith.constant 5 : index
    %210 = vector.load %arg4[%c0_45, %c5_46] : memref<1x358xf32, #tpu.memory_space<vmem>>, vector<1x256xf32>
    %c0_47 = arith.constant 0 : index
    %c5_48 = arith.constant 5 : index
    %211 = vector.load %arg5[%c0_47, %c5_48] : memref<1x358xf32, #tpu.memory_space<vmem>>, vector<1x256xf32>
    %212 = vector.broadcast %5 : f32 to vector<1x256xf32>
    %213 = arith.mulf %210, %212 : vector<1x256xf32>
    %214 = vector.broadcast %54 : f32 to vector<1x256xf32>
    %215 = arith.mulf %211, %214 : vector<1x256xf32>
    %216 = arith.addf %213, %215 : vector<1x256xf32>
    %cst_49 = arith.constant 0.000000e+00 : f32
    %217 = vector.broadcast %cst_49 : f32 to vector<1x256xf32>
    %218 = arith.select %138, %216, %217 : vector<1x256xi1>, vector<1x256xf32>
    %219 = arith.addf %209, %218 : vector<1x256xf32>
    %c0_50 = arith.constant 0 : index
    %c6_51 = arith.constant 6 : index
    %220 = vector.load %arg4[%c0_50, %c6_51] : memref<1x358xf32, #tpu.memory_space<vmem>>, vector<1x256xf32>
    %c0_52 = arith.constant 0 : index
    %c6_53 = arith.constant 6 : index
    %221 = vector.load %arg5[%c0_52, %c6_53] : memref<1x358xf32, #tpu.memory_space<vmem>>, vector<1x256xf32>
    %222 = vector.broadcast %6 : f32 to vector<1x256xf32>
    %223 = arith.mulf %220, %222 : vector<1x256xf32>
    %224 = vector.broadcast %55 : f32 to vector<1x256xf32>
    %225 = arith.mulf %221, %224 : vector<1x256xf32>
    %226 = arith.addf %223, %225 : vector<1x256xf32>
    %cst_54 = arith.constant 0.000000e+00 : f32
    %227 = vector.broadcast %cst_54 : f32 to vector<1x256xf32>
    %228 = arith.select %143, %226, %227 : vector<1x256xi1>, vector<1x256xf32>
    %229 = arith.addf %219, %228 : vector<1x256xf32>
    %c0_55 = arith.constant 0 : index
    %c16_56 = arith.constant 16 : index
    %230 = vector.load %arg4[%c0_55, %c16_56] : memref<1x358xf32, #tpu.memory_space<vmem>>, vector<1x256xf32>
    %c0_57 = arith.constant 0 : index
    %c16_58 = arith.constant 16 : index
    %231 = vector.load %arg5[%c0_57, %c16_58] : memref<1x358xf32, #tpu.memory_space<vmem>>, vector<1x256xf32>
    %232 = vector.broadcast %7 : f32 to vector<1x256xf32>
    %233 = arith.mulf %230, %232 : vector<1x256xf32>
    %234 = vector.broadcast %56 : f32 to vector<1x256xf32>
    %235 = arith.mulf %231, %234 : vector<1x256xf32>
    %236 = arith.addf %233, %235 : vector<1x256xf32>
    %cst_59 = arith.constant 0.000000e+00 : f32
    %237 = vector.broadcast %cst_59 : f32 to vector<1x256xf32>
    %238 = arith.select %113, %236, %237 : vector<1x256xi1>, vector<1x256xf32>
    %c0_60 = arith.constant 0 : index
    %c17_61 = arith.constant 17 : index
    %239 = vector.load %arg4[%c0_60, %c17_61] : memref<1x358xf32, #tpu.memory_space<vmem>>, vector<1x256xf32>
    %c0_62 = arith.constant 0 : index
    %c17_63 = arith.constant 17 : index
    %240 = vector.load %arg5[%c0_62, %c17_63] : memref<1x358xf32, #tpu.memory_space<vmem>>, vector<1x256xf32>
    %241 = vector.broadcast %8 : f32 to vector<1x256xf32>
    %242 = arith.mulf %239, %241 : vector<1x256xf32>
    %243 = vector.broadcast %57 : f32 to vector<1x256xf32>
    %244 = arith.mulf %240, %243 : vector<1x256xf32>
    %245 = arith.addf %242, %244 : vector<1x256xf32>
    %cst_64 = arith.constant 0.000000e+00 : f32
    %246 = vector.broadcast %cst_64 : f32 to vector<1x256xf32>
    %247 = arith.select %118, %245, %246 : vector<1x256xi1>, vector<1x256xf32>
    %248 = arith.addf %238, %247 : vector<1x256xf32>
    %c0_65 = arith.constant 0 : index
    %c18_66 = arith.constant 18 : index
    %249 = vector.load %arg4[%c0_65, %c18_66] : memref<1x358xf32, #tpu.memory_space<vmem>>, vector<1x256xf32>
    %c0_67 = arith.constant 0 : index
    %c18_68 = arith.constant 18 : index
    %250 = vector.load %arg5[%c0_67, %c18_68] : memref<1x358xf32, #tpu.memory_space<vmem>>, vector<1x256xf32>
    %251 = vector.broadcast %9 : f32 to vector<1x256xf32>
    %252 = arith.mulf %249, %251 : vector<1x256xf32>
    %253 = vector.broadcast %58 : f32 to vector<1x256xf32>
    %254 = arith.mulf %250, %253 : vector<1x256xf32>
    %255 = arith.addf %252, %254 : vector<1x256xf32>
    %cst_69 = arith.constant 0.000000e+00 : f32
    %256 = vector.broadcast %cst_69 : f32 to vector<1x256xf32>
    %257 = arith.select %123, %255, %256 : vector<1x256xi1>, vector<1x256xf32>
    %258 = arith.addf %248, %257 : vector<1x256xf32>
    %c0_70 = arith.constant 0 : index
    %c19_71 = arith.constant 19 : index
    %259 = vector.load %arg4[%c0_70, %c19_71] : memref<1x358xf32, #tpu.memory_space<vmem>>, vector<1x256xf32>
    %c0_72 = arith.constant 0 : index
    %c19_73 = arith.constant 19 : index
    %260 = vector.load %arg5[%c0_72, %c19_73] : memref<1x358xf32, #tpu.memory_space<vmem>>, vector<1x256xf32>
    %261 = vector.broadcast %10 : f32 to vector<1x256xf32>
    %262 = arith.mulf %259, %261 : vector<1x256xf32>
    %263 = vector.broadcast %59 : f32 to vector<1x256xf32>
    %264 = arith.mulf %260, %263 : vector<1x256xf32>
    %265 = arith.addf %262, %264 : vector<1x256xf32>
    %cst_74 = arith.constant 0.000000e+00 : f32
    %266 = vector.broadcast %cst_74 : f32 to vector<1x256xf32>
    %267 = arith.select %128, %265, %266 : vector<1x256xi1>, vector<1x256xf32>
    %268 = arith.addf %258, %267 : vector<1x256xf32>
    %c0_75 = arith.constant 0 : index
    %c20_76 = arith.constant 20 : index
    %269 = vector.load %arg4[%c0_75, %c20_76] : memref<1x358xf32, #tpu.memory_space<vmem>>, vector<1x256xf32>
    %c0_77 = arith.constant 0 : index
    %c20_78 = arith.constant 20 : index
    %270 = vector.load %arg5[%c0_77, %c20_78] : memref<1x358xf32, #tpu.memory_space<vmem>>, vector<1x256xf32>
    %271 = vector.broadcast %11 : f32 to vector<1x256xf32>
    %272 = arith.mulf %269, %271 : vector<1x256xf32>
    %273 = vector.broadcast %60 : f32 to vector<1x256xf32>
    %274 = arith.mulf %270, %273 : vector<1x256xf32>
    %275 = arith.addf %272, %274 : vector<1x256xf32>
    %cst_79 = arith.constant 0.000000e+00 : f32
    %276 = vector.broadcast %cst_79 : f32 to vector<1x256xf32>
    %277 = arith.select %133, %275, %276 : vector<1x256xi1>, vector<1x256xf32>
    %278 = arith.addf %268, %277 : vector<1x256xf32>
    %c0_80 = arith.constant 0 : index
    %c21_81 = arith.constant 21 : index
    %279 = vector.load %arg4[%c0_80, %c21_81] : memref<1x358xf32, #tpu.memory_space<vmem>>, vector<1x256xf32>
    %c0_82 = arith.constant 0 : index
    %c21_83 = arith.constant 21 : index
    %280 = vector.load %arg5[%c0_82, %c21_83] : memref<1x358xf32, #tpu.memory_space<vmem>>, vector<1x256xf32>
    %281 = vector.broadcast %12 : f32 to vector<1x256xf32>
    %282 = arith.mulf %279, %281 : vector<1x256xf32>
    %283 = vector.broadcast %61 : f32 to vector<1x256xf32>
    %284 = arith.mulf %280, %283 : vector<1x256xf32>
    %285 = arith.addf %282, %284 : vector<1x256xf32>
    %cst_84 = arith.constant 0.000000e+00 : f32
    %286 = vector.broadcast %cst_84 : f32 to vector<1x256xf32>
    %287 = arith.select %138, %285, %286 : vector<1x256xi1>, vector<1x256xf32>
    %288 = arith.addf %278, %287 : vector<1x256xf32>
    %c0_85 = arith.constant 0 : index
    %c22_86 = arith.constant 22 : index
    %289 = vector.load %arg4[%c0_85, %c22_86] : memref<1x358xf32, #tpu.memory_space<vmem>>, vector<1x256xf32>
    %c0_87 = arith.constant 0 : index
    %c22_88 = arith.constant 22 : index
    %290 = vector.load %arg5[%c0_87, %c22_88] : memref<1x358xf32, #tpu.memory_space<vmem>>, vector<1x256xf32>
    %291 = vector.broadcast %13 : f32 to vector<1x256xf32>
    %292 = arith.mulf %289, %291 : vector<1x256xf32>
    %293 = vector.broadcast %62 : f32 to vector<1x256xf32>
    %294 = arith.mulf %290, %293 : vector<1x256xf32>
    %295 = arith.addf %292, %294 : vector<1x256xf32>
    %cst_89 = arith.constant 0.000000e+00 : f32
    %296 = vector.broadcast %cst_89 : f32 to vector<1x256xf32>
    %297 = arith.select %143, %295, %296 : vector<1x256xi1>, vector<1x256xf32>
    %298 = arith.addf %288, %297 : vector<1x256xf32>
    %c0_90 = arith.constant 0 : index
    %c32_91 = arith.constant 32 : index
    %299 = vector.load %arg4[%c0_90, %c32_91] : memref<1x358xf32, #tpu.memory_space<vmem>>, vector<1x256xf32>
    %c0_92 = arith.constant 0 : index
    %c32_93 = arith.constant 32 : index
    %300 = vector.load %arg5[%c0_92, %c32_93] : memref<1x358xf32, #tpu.memory_space<vmem>>, vector<1x256xf32>
    %301 = vector.broadcast %14 : f32 to vector<1x256xf32>
    %302 = arith.mulf %299, %301 : vector<1x256xf32>
    %303 = vector.broadcast %63 : f32 to vector<1x256xf32>
    %304 = arith.mulf %300, %303 : vector<1x256xf32>
    %305 = arith.addf %302, %304 : vector<1x256xf32>
    %cst_94 = arith.constant 0.000000e+00 : f32
    %306 = vector.broadcast %cst_94 : f32 to vector<1x256xf32>
    %307 = arith.select %113, %305, %306 : vector<1x256xi1>, vector<1x256xf32>
    %c0_95 = arith.constant 0 : index
    %c33_96 = arith.constant 33 : index
    %308 = vector.load %arg4[%c0_95, %c33_96] : memref<1x358xf32, #tpu.memory_space<vmem>>, vector<1x256xf32>
    %c0_97 = arith.constant 0 : index
    %c33_98 = arith.constant 33 : index
    %309 = vector.load %arg5[%c0_97, %c33_98] : memref<1x358xf32, #tpu.memory_space<vmem>>, vector<1x256xf32>
    %310 = vector.broadcast %15 : f32 to vector<1x256xf32>
    %311 = arith.mulf %308, %310 : vector<1x256xf32>
    %312 = vector.broadcast %64 : f32 to vector<1x256xf32>
    %313 = arith.mulf %309, %312 : vector<1x256xf32>
    %314 = arith.addf %311, %313 : vector<1x256xf32>
    %cst_99 = arith.constant 0.000000e+00 : f32
    %315 = vector.broadcast %cst_99 : f32 to vector<1x256xf32>
    %316 = arith.select %118, %314, %315 : vector<1x256xi1>, vector<1x256xf32>
    %317 = arith.addf %307, %316 : vector<1x256xf32>
    %c0_100 = arith.constant 0 : index
    %c34_101 = arith.constant 34 : index
    %318 = vector.load %arg4[%c0_100, %c34_101] : memref<1x358xf32, #tpu.memory_space<vmem>>, vector<1x256xf32>
    %c0_102 = arith.constant 0 : index
    %c34_103 = arith.constant 34 : index
    %319 = vector.load %arg5[%c0_102, %c34_103] : memref<1x358xf32, #tpu.memory_space<vmem>>, vector<1x256xf32>
    %320 = vector.broadcast %16 : f32 to vector<1x256xf32>
    %321 = arith.mulf %318, %320 : vector<1x256xf32>
    %322 = vector.broadcast %65 : f32 to vector<1x256xf32>
    %323 = arith.mulf %319, %322 : vector<1x256xf32>
    %324 = arith.addf %321, %323 : vector<1x256xf32>
    %cst_104 = arith.constant 0.000000e+00 : f32
    %325 = vector.broadcast %cst_104 : f32 to vector<1x256xf32>
    %326 = arith.select %123, %324, %325 : vector<1x256xi1>, vector<1x256xf32>
    %327 = arith.addf %317, %326 : vector<1x256xf32>
    %c0_105 = arith.constant 0 : index
    %c35_106 = arith.constant 35 : index
    %328 = vector.load %arg4[%c0_105, %c35_106] : memref<1x358xf32, #tpu.memory_space<vmem>>, vector<1x256xf32>
    %c0_107 = arith.constant 0 : index
    %c35_108 = arith.constant 35 : index
    %329 = vector.load %arg5[%c0_107, %c35_108] : memref<1x358xf32, #tpu.memory_space<vmem>>, vector<1x256xf32>
    %330 = vector.broadcast %17 : f32 to vector<1x256xf32>
    %331 = arith.mulf %328, %330 : vector<1x256xf32>
    %332 = vector.broadcast %66 : f32 to vector<1x256xf32>
    %333 = arith.mulf %329, %332 : vector<1x256xf32>
    %334 = arith.addf %331, %333 : vector<1x256xf32>
    %cst_109 = arith.constant 0.000000e+00 : f32
    %335 = vector.broadcast %cst_109 : f32 to vector<1x256xf32>
    %336 = arith.select %128, %334, %335 : vector<1x256xi1>, vector<1x256xf32>
    %337 = arith.addf %327, %336 : vector<1x256xf32>
    %c0_110 = arith.constant 0 : index
    %c36_111 = arith.constant 36 : index
    %338 = vector.load %arg4[%c0_110, %c36_111] : memref<1x358xf32, #tpu.memory_space<vmem>>, vector<1x256xf32>
    %c0_112 = arith.constant 0 : index
    %c36_113 = arith.constant 36 : index
    %339 = vector.load %arg5[%c0_112, %c36_113] : memref<1x358xf32, #tpu.memory_space<vmem>>, vector<1x256xf32>
    %340 = vector.broadcast %18 : f32 to vector<1x256xf32>
    %341 = arith.mulf %338, %340 : vector<1x256xf32>
    %342 = vector.broadcast %67 : f32 to vector<1x256xf32>
    %343 = arith.mulf %339, %342 : vector<1x256xf32>
    %344 = arith.addf %341, %343 : vector<1x256xf32>
    %cst_114 = arith.constant 0.000000e+00 : f32
    %345 = vector.broadcast %cst_114 : f32 to vector<1x256xf32>
    %346 = arith.select %133, %344, %345 : vector<1x256xi1>, vector<1x256xf32>
    %347 = arith.addf %337, %346 : vector<1x256xf32>
    %c0_115 = arith.constant 0 : index
    %c37_116 = arith.constant 37 : index
    %348 = vector.load %arg4[%c0_115, %c37_116] : memref<1x358xf32, #tpu.memory_space<vmem>>, vector<1x256xf32>
    %c0_117 = arith.constant 0 : index
    %c37_118 = arith.constant 37 : index
    %349 = vector.load %arg5[%c0_117, %c37_118] : memref<1x358xf32, #tpu.memory_space<vmem>>, vector<1x256xf32>
    %350 = vector.broadcast %19 : f32 to vector<1x256xf32>
    %351 = arith.mulf %348, %350 : vector<1x256xf32>
    %352 = vector.broadcast %68 : f32 to vector<1x256xf32>
    %353 = arith.mulf %349, %352 : vector<1x256xf32>
    %354 = arith.addf %351, %353 : vector<1x256xf32>
    %cst_119 = arith.constant 0.000000e+00 : f32
    %355 = vector.broadcast %cst_119 : f32 to vector<1x256xf32>
    %356 = arith.select %138, %354, %355 : vector<1x256xi1>, vector<1x256xf32>
    %357 = arith.addf %347, %356 : vector<1x256xf32>
    %c0_120 = arith.constant 0 : index
    %c38_121 = arith.constant 38 : index
    %358 = vector.load %arg4[%c0_120, %c38_121] : memref<1x358xf32, #tpu.memory_space<vmem>>, vector<1x256xf32>
    %c0_122 = arith.constant 0 : index
    %c38_123 = arith.constant 38 : index
    %359 = vector.load %arg5[%c0_122, %c38_123] : memref<1x358xf32, #tpu.memory_space<vmem>>, vector<1x256xf32>
    %360 = vector.broadcast %20 : f32 to vector<1x256xf32>
    %361 = arith.mulf %358, %360 : vector<1x256xf32>
    %362 = vector.broadcast %69 : f32 to vector<1x256xf32>
    %363 = arith.mulf %359, %362 : vector<1x256xf32>
    %364 = arith.addf %361, %363 : vector<1x256xf32>
    %cst_124 = arith.constant 0.000000e+00 : f32
    %365 = vector.broadcast %cst_124 : f32 to vector<1x256xf32>
    %366 = arith.select %143, %364, %365 : vector<1x256xi1>, vector<1x256xf32>
    %367 = arith.addf %357, %366 : vector<1x256xf32>
    %c0_125 = arith.constant 0 : index
    %c48_126 = arith.constant 48 : index
    %368 = vector.load %arg4[%c0_125, %c48_126] : memref<1x358xf32, #tpu.memory_space<vmem>>, vector<1x256xf32>
    %c0_127 = arith.constant 0 : index
    %c48_128 = arith.constant 48 : index
    %369 = vector.load %arg5[%c0_127, %c48_128] : memref<1x358xf32, #tpu.memory_space<vmem>>, vector<1x256xf32>
    %370 = vector.broadcast %21 : f32 to vector<1x256xf32>
    %371 = arith.mulf %368, %370 : vector<1x256xf32>
    %372 = vector.broadcast %70 : f32 to vector<1x256xf32>
    %373 = arith.mulf %369, %372 : vector<1x256xf32>
    %374 = arith.addf %371, %373 : vector<1x256xf32>
    %cst_129 = arith.constant 0.000000e+00 : f32
    %375 = vector.broadcast %cst_129 : f32 to vector<1x256xf32>
    %376 = arith.select %113, %374, %375 : vector<1x256xi1>, vector<1x256xf32>
    %c0_130 = arith.constant 0 : index
    %c49_131 = arith.constant 49 : index
    %377 = vector.load %arg4[%c0_130, %c49_131] : memref<1x358xf32, #tpu.memory_space<vmem>>, vector<1x256xf32>
    %c0_132 = arith.constant 0 : index
    %c49_133 = arith.constant 49 : index
    %378 = vector.load %arg5[%c0_132, %c49_133] : memref<1x358xf32, #tpu.memory_space<vmem>>, vector<1x256xf32>
    %379 = vector.broadcast %22 : f32 to vector<1x256xf32>
    %380 = arith.mulf %377, %379 : vector<1x256xf32>
    %381 = vector.broadcast %71 : f32 to vector<1x256xf32>
    %382 = arith.mulf %378, %381 : vector<1x256xf32>
    %383 = arith.addf %380, %382 : vector<1x256xf32>
    %cst_134 = arith.constant 0.000000e+00 : f32
    %384 = vector.broadcast %cst_134 : f32 to vector<1x256xf32>
    %385 = arith.select %118, %383, %384 : vector<1x256xi1>, vector<1x256xf32>
    %386 = arith.addf %376, %385 : vector<1x256xf32>
    %c0_135 = arith.constant 0 : index
    %c50_136 = arith.constant 50 : index
    %387 = vector.load %arg4[%c0_135, %c50_136] : memref<1x358xf32, #tpu.memory_space<vmem>>, vector<1x256xf32>
    %c0_137 = arith.constant 0 : index
    %c50_138 = arith.constant 50 : index
    %388 = vector.load %arg5[%c0_137, %c50_138] : memref<1x358xf32, #tpu.memory_space<vmem>>, vector<1x256xf32>
    %389 = vector.broadcast %23 : f32 to vector<1x256xf32>
    %390 = arith.mulf %387, %389 : vector<1x256xf32>
    %391 = vector.broadcast %72 : f32 to vector<1x256xf32>
    %392 = arith.mulf %388, %391 : vector<1x256xf32>
    %393 = arith.addf %390, %392 : vector<1x256xf32>
    %cst_139 = arith.constant 0.000000e+00 : f32
    %394 = vector.broadcast %cst_139 : f32 to vector<1x256xf32>
    %395 = arith.select %123, %393, %394 : vector<1x256xi1>, vector<1x256xf32>
    %396 = arith.addf %386, %395 : vector<1x256xf32>
    %c0_140 = arith.constant 0 : index
    %c51_141 = arith.constant 51 : index
    %397 = vector.load %arg4[%c0_140, %c51_141] : memref<1x358xf32, #tpu.memory_space<vmem>>, vector<1x256xf32>
    %c0_142 = arith.constant 0 : index
    %c51_143 = arith.constant 51 : index
    %398 = vector.load %arg5[%c0_142, %c51_143] : memref<1x358xf32, #tpu.memory_space<vmem>>, vector<1x256xf32>
    %399 = vector.broadcast %24 : f32 to vector<1x256xf32>
    %400 = arith.mulf %397, %399 : vector<1x256xf32>
    %401 = vector.broadcast %73 : f32 to vector<1x256xf32>
    %402 = arith.mulf %398, %401 : vector<1x256xf32>
    %403 = arith.addf %400, %402 : vector<1x256xf32>
    %cst_144 = arith.constant 0.000000e+00 : f32
    %404 = vector.broadcast %cst_144 : f32 to vector<1x256xf32>
    %405 = arith.select %128, %403, %404 : vector<1x256xi1>, vector<1x256xf32>
    %406 = arith.addf %396, %405 : vector<1x256xf32>
    %c0_145 = arith.constant 0 : index
    %c52_146 = arith.constant 52 : index
    %407 = vector.load %arg4[%c0_145, %c52_146] : memref<1x358xf32, #tpu.memory_space<vmem>>, vector<1x256xf32>
    %c0_147 = arith.constant 0 : index
    %c52_148 = arith.constant 52 : index
    %408 = vector.load %arg5[%c0_147, %c52_148] : memref<1x358xf32, #tpu.memory_space<vmem>>, vector<1x256xf32>
    %409 = vector.broadcast %25 : f32 to vector<1x256xf32>
    %410 = arith.mulf %407, %409 : vector<1x256xf32>
    %411 = vector.broadcast %74 : f32 to vector<1x256xf32>
    %412 = arith.mulf %408, %411 : vector<1x256xf32>
    %413 = arith.addf %410, %412 : vector<1x256xf32>
    %cst_149 = arith.constant 0.000000e+00 : f32
    %414 = vector.broadcast %cst_149 : f32 to vector<1x256xf32>
    %415 = arith.select %133, %413, %414 : vector<1x256xi1>, vector<1x256xf32>
    %416 = arith.addf %406, %415 : vector<1x256xf32>
    %c0_150 = arith.constant 0 : index
    %c53_151 = arith.constant 53 : index
    %417 = vector.load %arg4[%c0_150, %c53_151] : memref<1x358xf32, #tpu.memory_space<vmem>>, vector<1x256xf32>
    %c0_152 = arith.constant 0 : index
    %c53_153 = arith.constant 53 : index
    %418 = vector.load %arg5[%c0_152, %c53_153] : memref<1x358xf32, #tpu.memory_space<vmem>>, vector<1x256xf32>
    %419 = vector.broadcast %26 : f32 to vector<1x256xf32>
    %420 = arith.mulf %417, %419 : vector<1x256xf32>
    %421 = vector.broadcast %75 : f32 to vector<1x256xf32>
    %422 = arith.mulf %418, %421 : vector<1x256xf32>
    %423 = arith.addf %420, %422 : vector<1x256xf32>
    %cst_154 = arith.constant 0.000000e+00 : f32
    %424 = vector.broadcast %cst_154 : f32 to vector<1x256xf32>
    %425 = arith.select %138, %423, %424 : vector<1x256xi1>, vector<1x256xf32>
    %426 = arith.addf %416, %425 : vector<1x256xf32>
    %c0_155 = arith.constant 0 : index
    %c54_156 = arith.constant 54 : index
    %427 = vector.load %arg4[%c0_155, %c54_156] : memref<1x358xf32, #tpu.memory_space<vmem>>, vector<1x256xf32>
    %c0_157 = arith.constant 0 : index
    %c54_158 = arith.constant 54 : index
    %428 = vector.load %arg5[%c0_157, %c54_158] : memref<1x358xf32, #tpu.memory_space<vmem>>, vector<1x256xf32>
    %429 = vector.broadcast %27 : f32 to vector<1x256xf32>
    %430 = arith.mulf %427, %429 : vector<1x256xf32>
    %431 = vector.broadcast %76 : f32 to vector<1x256xf32>
    %432 = arith.mulf %428, %431 : vector<1x256xf32>
    %433 = arith.addf %430, %432 : vector<1x256xf32>
    %cst_159 = arith.constant 0.000000e+00 : f32
    %434 = vector.broadcast %cst_159 : f32 to vector<1x256xf32>
    %435 = arith.select %143, %433, %434 : vector<1x256xi1>, vector<1x256xf32>
    %436 = arith.addf %426, %435 : vector<1x256xf32>
    %c0_160 = arith.constant 0 : index
    %c64_161 = arith.constant 64 : index
    %437 = vector.load %arg4[%c0_160, %c64_161] : memref<1x358xf32, #tpu.memory_space<vmem>>, vector<1x256xf32>
    %c0_162 = arith.constant 0 : index
    %c64_163 = arith.constant 64 : index
    %438 = vector.load %arg5[%c0_162, %c64_163] : memref<1x358xf32, #tpu.memory_space<vmem>>, vector<1x256xf32>
    %439 = vector.broadcast %28 : f32 to vector<1x256xf32>
    %440 = arith.mulf %437, %439 : vector<1x256xf32>
    %441 = vector.broadcast %77 : f32 to vector<1x256xf32>
    %442 = arith.mulf %438, %441 : vector<1x256xf32>
    %443 = arith.addf %440, %442 : vector<1x256xf32>
    %cst_164 = arith.constant 0.000000e+00 : f32
    %444 = vector.broadcast %cst_164 : f32 to vector<1x256xf32>
    %445 = arith.select %113, %443, %444 : vector<1x256xi1>, vector<1x256xf32>
    %c0_165 = arith.constant 0 : index
    %c65_166 = arith.constant 65 : index
    %446 = vector.load %arg4[%c0_165, %c65_166] : memref<1x358xf32, #tpu.memory_space<vmem>>, vector<1x256xf32>
    %c0_167 = arith.constant 0 : index
    %c65_168 = arith.constant 65 : index
    %447 = vector.load %arg5[%c0_167, %c65_168] : memref<1x358xf32, #tpu.memory_space<vmem>>, vector<1x256xf32>
    %448 = vector.broadcast %29 : f32 to vector<1x256xf32>
    %449 = arith.mulf %446, %448 : vector<1x256xf32>
    %450 = vector.broadcast %78 : f32 to vector<1x256xf32>
    %451 = arith.mulf %447, %450 : vector<1x256xf32>
    %452 = arith.addf %449, %451 : vector<1x256xf32>
    %cst_169 = arith.constant 0.000000e+00 : f32
    %453 = vector.broadcast %cst_169 : f32 to vector<1x256xf32>
    %454 = arith.select %118, %452, %453 : vector<1x256xi1>, vector<1x256xf32>
    %455 = arith.addf %445, %454 : vector<1x256xf32>
    %c0_170 = arith.constant 0 : index
    %c66_171 = arith.constant 66 : index
    %456 = vector.load %arg4[%c0_170, %c66_171] : memref<1x358xf32, #tpu.memory_space<vmem>>, vector<1x256xf32>
    %c0_172 = arith.constant 0 : index
    %c66_173 = arith.constant 66 : index
    %457 = vector.load %arg5[%c0_172, %c66_173] : memref<1x358xf32, #tpu.memory_space<vmem>>, vector<1x256xf32>
    %458 = vector.broadcast %30 : f32 to vector<1x256xf32>
    %459 = arith.mulf %456, %458 : vector<1x256xf32>
    %460 = vector.broadcast %79 : f32 to vector<1x256xf32>
    %461 = arith.mulf %457, %460 : vector<1x256xf32>
    %462 = arith.addf %459, %461 : vector<1x256xf32>
    %cst_174 = arith.constant 0.000000e+00 : f32
    %463 = vector.broadcast %cst_174 : f32 to vector<1x256xf32>
    %464 = arith.select %123, %462, %463 : vector<1x256xi1>, vector<1x256xf32>
    %465 = arith.addf %455, %464 : vector<1x256xf32>
    %c0_175 = arith.constant 0 : index
    %c67_176 = arith.constant 67 : index
    %466 = vector.load %arg4[%c0_175, %c67_176] : memref<1x358xf32, #tpu.memory_space<vmem>>, vector<1x256xf32>
    %c0_177 = arith.constant 0 : index
    %c67_178 = arith.constant 67 : index
    %467 = vector.load %arg5[%c0_177, %c67_178] : memref<1x358xf32, #tpu.memory_space<vmem>>, vector<1x256xf32>
    %468 = vector.broadcast %31 : f32 to vector<1x256xf32>
    %469 = arith.mulf %466, %468 : vector<1x256xf32>
    %470 = vector.broadcast %80 : f32 to vector<1x256xf32>
    %471 = arith.mulf %467, %470 : vector<1x256xf32>
    %472 = arith.addf %469, %471 : vector<1x256xf32>
    %cst_179 = arith.constant 0.000000e+00 : f32
    %473 = vector.broadcast %cst_179 : f32 to vector<1x256xf32>
    %474 = arith.select %128, %472, %473 : vector<1x256xi1>, vector<1x256xf32>
    %475 = arith.addf %465, %474 : vector<1x256xf32>
    %c0_180 = arith.constant 0 : index
    %c68_181 = arith.constant 68 : index
    %476 = vector.load %arg4[%c0_180, %c68_181] : memref<1x358xf32, #tpu.memory_space<vmem>>, vector<1x256xf32>
    %c0_182 = arith.constant 0 : index
    %c68_183 = arith.constant 68 : index
    %477 = vector.load %arg5[%c0_182, %c68_183] : memref<1x358xf32, #tpu.memory_space<vmem>>, vector<1x256xf32>
    %478 = vector.broadcast %32 : f32 to vector<1x256xf32>
    %479 = arith.mulf %476, %478 : vector<1x256xf32>
    %480 = vector.broadcast %81 : f32 to vector<1x256xf32>
    %481 = arith.mulf %477, %480 : vector<1x256xf32>
    %482 = arith.addf %479, %481 : vector<1x256xf32>
    %cst_184 = arith.constant 0.000000e+00 : f32
    %483 = vector.broadcast %cst_184 : f32 to vector<1x256xf32>
    %484 = arith.select %133, %482, %483 : vector<1x256xi1>, vector<1x256xf32>
    %485 = arith.addf %475, %484 : vector<1x256xf32>
    %c0_185 = arith.constant 0 : index
    %c69_186 = arith.constant 69 : index
    %486 = vector.load %arg4[%c0_185, %c69_186] : memref<1x358xf32, #tpu.memory_space<vmem>>, vector<1x256xf32>
    %c0_187 = arith.constant 0 : index
    %c69_188 = arith.constant 69 : index
    %487 = vector.load %arg5[%c0_187, %c69_188] : memref<1x358xf32, #tpu.memory_space<vmem>>, vector<1x256xf32>
    %488 = vector.broadcast %33 : f32 to vector<1x256xf32>
    %489 = arith.mulf %486, %488 : vector<1x256xf32>
    %490 = vector.broadcast %82 : f32 to vector<1x256xf32>
    %491 = arith.mulf %487, %490 : vector<1x256xf32>
    %492 = arith.addf %489, %491 : vector<1x256xf32>
    %cst_189 = arith.constant 0.000000e+00 : f32
    %493 = vector.broadcast %cst_189 : f32 to vector<1x256xf32>
    %494 = arith.select %138, %492, %493 : vector<1x256xi1>, vector<1x256xf32>
    %495 = arith.addf %485, %494 : vector<1x256xf32>
    %c0_190 = arith.constant 0 : index
    %c70_191 = arith.constant 70 : index
    %496 = vector.load %arg4[%c0_190, %c70_191] : memref<1x358xf32, #tpu.memory_space<vmem>>, vector<1x256xf32>
    %c0_192 = arith.constant 0 : index
    %c70_193 = arith.constant 70 : index
    %497 = vector.load %arg5[%c0_192, %c70_193] : memref<1x358xf32, #tpu.memory_space<vmem>>, vector<1x256xf32>
    %498 = vector.broadcast %34 : f32 to vector<1x256xf32>
    %499 = arith.mulf %496, %498 : vector<1x256xf32>
    %500 = vector.broadcast %83 : f32 to vector<1x256xf32>
    %501 = arith.mulf %497, %500 : vector<1x256xf32>
    %502 = arith.addf %499, %501 : vector<1x256xf32>
    %cst_194 = arith.constant 0.000000e+00 : f32
    %503 = vector.broadcast %cst_194 : f32 to vector<1x256xf32>
    %504 = arith.select %143, %502, %503 : vector<1x256xi1>, vector<1x256xf32>
    %505 = arith.addf %495, %504 : vector<1x256xf32>
    %c0_195 = arith.constant 0 : index
    %c80_196 = arith.constant 80 : index
    %506 = vector.load %arg4[%c0_195, %c80_196] : memref<1x358xf32, #tpu.memory_space<vmem>>, vector<1x256xf32>
    %c0_197 = arith.constant 0 : index
    %c80_198 = arith.constant 80 : index
    %507 = vector.load %arg5[%c0_197, %c80_198] : memref<1x358xf32, #tpu.memory_space<vmem>>, vector<1x256xf32>
    %508 = vector.broadcast %35 : f32 to vector<1x256xf32>
    %509 = arith.mulf %506, %508 : vector<1x256xf32>
    %510 = vector.broadcast %84 : f32 to vector<1x256xf32>
    %511 = arith.mulf %507, %510 : vector<1x256xf32>
    %512 = arith.addf %509, %511 : vector<1x256xf32>
    %cst_199 = arith.constant 0.000000e+00 : f32
    %513 = vector.broadcast %cst_199 : f32 to vector<1x256xf32>
    %514 = arith.select %113, %512, %513 : vector<1x256xi1>, vector<1x256xf32>
    %c0_200 = arith.constant 0 : index
    %c81_201 = arith.constant 81 : index
    %515 = vector.load %arg4[%c0_200, %c81_201] : memref<1x358xf32, #tpu.memory_space<vmem>>, vector<1x256xf32>
    %c0_202 = arith.constant 0 : index
    %c81_203 = arith.constant 81 : index
    %516 = vector.load %arg5[%c0_202, %c81_203] : memref<1x358xf32, #tpu.memory_space<vmem>>, vector<1x256xf32>
    %517 = vector.broadcast %36 : f32 to vector<1x256xf32>
    %518 = arith.mulf %515, %517 : vector<1x256xf32>
    %519 = vector.broadcast %85 : f32 to vector<1x256xf32>
    %520 = arith.mulf %516, %519 : vector<1x256xf32>
    %521 = arith.addf %518, %520 : vector<1x256xf32>
    %cst_204 = arith.constant 0.000000e+00 : f32
    %522 = vector.broadcast %cst_204 : f32 to vector<1x256xf32>
    %523 = arith.select %118, %521, %522 : vector<1x256xi1>, vector<1x256xf32>
    %524 = arith.addf %514, %523 : vector<1x256xf32>
    %c0_205 = arith.constant 0 : index
    %c82_206 = arith.constant 82 : index
    %525 = vector.load %arg4[%c0_205, %c82_206] : memref<1x358xf32, #tpu.memory_space<vmem>>, vector<1x256xf32>
    %c0_207 = arith.constant 0 : index
    %c82_208 = arith.constant 82 : index
    %526 = vector.load %arg5[%c0_207, %c82_208] : memref<1x358xf32, #tpu.memory_space<vmem>>, vector<1x256xf32>
    %527 = vector.broadcast %37 : f32 to vector<1x256xf32>
    %528 = arith.mulf %525, %527 : vector<1x256xf32>
    %529 = vector.broadcast %86 : f32 to vector<1x256xf32>
    %530 = arith.mulf %526, %529 : vector<1x256xf32>
    %531 = arith.addf %528, %530 : vector<1x256xf32>
    %cst_209 = arith.constant 0.000000e+00 : f32
    %532 = vector.broadcast %cst_209 : f32 to vector<1x256xf32>
    %533 = arith.select %123, %531, %532 : vector<1x256xi1>, vector<1x256xf32>
    %534 = arith.addf %524, %533 : vector<1x256xf32>
    %c0_210 = arith.constant 0 : index
    %c83_211 = arith.constant 83 : index
    %535 = vector.load %arg4[%c0_210, %c83_211] : memref<1x358xf32, #tpu.memory_space<vmem>>, vector<1x256xf32>
    %c0_212 = arith.constant 0 : index
    %c83_213 = arith.constant 83 : index
    %536 = vector.load %arg5[%c0_212, %c83_213] : memref<1x358xf32, #tpu.memory_space<vmem>>, vector<1x256xf32>
    %537 = vector.broadcast %38 : f32 to vector<1x256xf32>
    %538 = arith.mulf %535, %537 : vector<1x256xf32>
    %539 = vector.broadcast %87 : f32 to vector<1x256xf32>
    %540 = arith.mulf %536, %539 : vector<1x256xf32>
    %541 = arith.addf %538, %540 : vector<1x256xf32>
    %cst_214 = arith.constant 0.000000e+00 : f32
    %542 = vector.broadcast %cst_214 : f32 to vector<1x256xf32>
    %543 = arith.select %128, %541, %542 : vector<1x256xi1>, vector<1x256xf32>
    %544 = arith.addf %534, %543 : vector<1x256xf32>
    %c0_215 = arith.constant 0 : index
    %c84_216 = arith.constant 84 : index
    %545 = vector.load %arg4[%c0_215, %c84_216] : memref<1x358xf32, #tpu.memory_space<vmem>>, vector<1x256xf32>
    %c0_217 = arith.constant 0 : index
    %c84_218 = arith.constant 84 : index
    %546 = vector.load %arg5[%c0_217, %c84_218] : memref<1x358xf32, #tpu.memory_space<vmem>>, vector<1x256xf32>
    %547 = vector.broadcast %39 : f32 to vector<1x256xf32>
    %548 = arith.mulf %545, %547 : vector<1x256xf32>
    %549 = vector.broadcast %88 : f32 to vector<1x256xf32>
    %550 = arith.mulf %546, %549 : vector<1x256xf32>
    %551 = arith.addf %548, %550 : vector<1x256xf32>
    %cst_219 = arith.constant 0.000000e+00 : f32
    %552 = vector.broadcast %cst_219 : f32 to vector<1x256xf32>
    %553 = arith.select %133, %551, %552 : vector<1x256xi1>, vector<1x256xf32>
    %554 = arith.addf %544, %553 : vector<1x256xf32>
    %c0_220 = arith.constant 0 : index
    %c85_221 = arith.constant 85 : index
    %555 = vector.load %arg4[%c0_220, %c85_221] : memref<1x358xf32, #tpu.memory_space<vmem>>, vector<1x256xf32>
    %c0_222 = arith.constant 0 : index
    %c85_223 = arith.constant 85 : index
    %556 = vector.load %arg5[%c0_222, %c85_223] : memref<1x358xf32, #tpu.memory_space<vmem>>, vector<1x256xf32>
    %557 = vector.broadcast %40 : f32 to vector<1x256xf32>
    %558 = arith.mulf %555, %557 : vector<1x256xf32>
    %559 = vector.broadcast %89 : f32 to vector<1x256xf32>
    %560 = arith.mulf %556, %559 : vector<1x256xf32>
    %561 = arith.addf %558, %560 : vector<1x256xf32>
    %cst_224 = arith.constant 0.000000e+00 : f32
    %562 = vector.broadcast %cst_224 : f32 to vector<1x256xf32>
    %563 = arith.select %138, %561, %562 : vector<1x256xi1>, vector<1x256xf32>
    %564 = arith.addf %554, %563 : vector<1x256xf32>
    %c0_225 = arith.constant 0 : index
    %c86_226 = arith.constant 86 : index
    %565 = vector.load %arg4[%c0_225, %c86_226] : memref<1x358xf32, #tpu.memory_space<vmem>>, vector<1x256xf32>
    %c0_227 = arith.constant 0 : index
    %c86_228 = arith.constant 86 : index
    %566 = vector.load %arg5[%c0_227, %c86_228] : memref<1x358xf32, #tpu.memory_space<vmem>>, vector<1x256xf32>
    %567 = vector.broadcast %41 : f32 to vector<1x256xf32>
    %568 = arith.mulf %565, %567 : vector<1x256xf32>
    %569 = vector.broadcast %90 : f32 to vector<1x256xf32>
    %570 = arith.mulf %566, %569 : vector<1x256xf32>
    %571 = arith.addf %568, %570 : vector<1x256xf32>
    %cst_229 = arith.constant 0.000000e+00 : f32
    %572 = vector.broadcast %cst_229 : f32 to vector<1x256xf32>
    %573 = arith.select %143, %571, %572 : vector<1x256xi1>, vector<1x256xf32>
    %574 = arith.addf %564, %573 : vector<1x256xf32>
    %c0_230 = arith.constant 0 : index
    %c96_231 = arith.constant 96 : index
    %575 = vector.load %arg4[%c0_230, %c96_231] : memref<1x358xf32, #tpu.memory_space<vmem>>, vector<1x256xf32>
    %c0_232 = arith.constant 0 : index
    %c96_233 = arith.constant 96 : index
    %576 = vector.load %arg5[%c0_232, %c96_233] : memref<1x358xf32, #tpu.memory_space<vmem>>, vector<1x256xf32>
    %577 = vector.broadcast %42 : f32 to vector<1x256xf32>
    %578 = arith.mulf %575, %577 : vector<1x256xf32>
    %579 = vector.broadcast %91 : f32 to vector<1x256xf32>
    %580 = arith.mulf %576, %579 : vector<1x256xf32>
    %581 = arith.addf %578, %580 : vector<1x256xf32>
    %cst_234 = arith.constant 0.000000e+00 : f32
    %582 = vector.broadcast %cst_234 : f32 to vector<1x256xf32>
    %583 = arith.select %113, %581, %582 : vector<1x256xi1>, vector<1x256xf32>
    %c0_235 = arith.constant 0 : index
    %c97_236 = arith.constant 97 : index
    %584 = vector.load %arg4[%c0_235, %c97_236] : memref<1x358xf32, #tpu.memory_space<vmem>>, vector<1x256xf32>
    %c0_237 = arith.constant 0 : index
    %c97_238 = arith.constant 97 : index
    %585 = vector.load %arg5[%c0_237, %c97_238] : memref<1x358xf32, #tpu.memory_space<vmem>>, vector<1x256xf32>
    %586 = vector.broadcast %43 : f32 to vector<1x256xf32>
    %587 = arith.mulf %584, %586 : vector<1x256xf32>
    %588 = vector.broadcast %92 : f32 to vector<1x256xf32>
    %589 = arith.mulf %585, %588 : vector<1x256xf32>
    %590 = arith.addf %587, %589 : vector<1x256xf32>
    %cst_239 = arith.constant 0.000000e+00 : f32
    %591 = vector.broadcast %cst_239 : f32 to vector<1x256xf32>
    %592 = arith.select %118, %590, %591 : vector<1x256xi1>, vector<1x256xf32>
    %593 = arith.addf %583, %592 : vector<1x256xf32>
    %c0_240 = arith.constant 0 : index
    %c98 = arith.constant 98 : index
    %594 = vector.load %arg4[%c0_240, %c98] : memref<1x358xf32, #tpu.memory_space<vmem>>, vector<1x256xf32>
    %c0_241 = arith.constant 0 : index
    %c98_242 = arith.constant 98 : index
    %595 = vector.load %arg5[%c0_241, %c98_242] : memref<1x358xf32, #tpu.memory_space<vmem>>, vector<1x256xf32>
    %596 = vector.broadcast %44 : f32 to vector<1x256xf32>
    %597 = arith.mulf %594, %596 : vector<1x256xf32>
    %598 = vector.broadcast %93 : f32 to vector<1x256xf32>
    %599 = arith.mulf %595, %598 : vector<1x256xf32>
    %600 = arith.addf %597, %599 : vector<1x256xf32>
    %cst_243 = arith.constant 0.000000e+00 : f32
    %601 = vector.broadcast %cst_243 : f32 to vector<1x256xf32>
    %602 = arith.select %123, %600, %601 : vector<1x256xi1>, vector<1x256xf32>
    %603 = arith.addf %593, %602 : vector<1x256xf32>
    %c0_244 = arith.constant 0 : index
    %c99 = arith.constant 99 : index
    %604 = vector.load %arg4[%c0_244, %c99] : memref<1x358xf32, #tpu.memory_space<vmem>>, vector<1x256xf32>
    %c0_245 = arith.constant 0 : index
    %c99_246 = arith.constant 99 : index
    %605 = vector.load %arg5[%c0_245, %c99_246] : memref<1x358xf32, #tpu.memory_space<vmem>>, vector<1x256xf32>
    %606 = vector.broadcast %45 : f32 to vector<1x256xf32>
    %607 = arith.mulf %604, %606 : vector<1x256xf32>
    %608 = vector.broadcast %94 : f32 to vector<1x256xf32>
    %609 = arith.mulf %605, %608 : vector<1x256xf32>
    %610 = arith.addf %607, %609 : vector<1x256xf32>
    %cst_247 = arith.constant 0.000000e+00 : f32
    %611 = vector.broadcast %cst_247 : f32 to vector<1x256xf32>
    %612 = arith.select %128, %610, %611 : vector<1x256xi1>, vector<1x256xf32>
    %613 = arith.addf %603, %612 : vector<1x256xf32>
    %c0_248 = arith.constant 0 : index
    %c100 = arith.constant 100 : index
    %614 = vector.load %arg4[%c0_248, %c100] : memref<1x358xf32, #tpu.memory_space<vmem>>, vector<1x256xf32>
    %c0_249 = arith.constant 0 : index
    %c100_250 = arith.constant 100 : index
    %615 = vector.load %arg5[%c0_249, %c100_250] : memref<1x358xf32, #tpu.memory_space<vmem>>, vector<1x256xf32>
    %616 = vector.broadcast %46 : f32 to vector<1x256xf32>
    %617 = arith.mulf %614, %616 : vector<1x256xf32>
    %618 = vector.broadcast %95 : f32 to vector<1x256xf32>
    %619 = arith.mulf %615, %618 : vector<1x256xf32>
    %620 = arith.addf %617, %619 : vector<1x256xf32>
    %cst_251 = arith.constant 0.000000e+00 : f32
    %621 = vector.broadcast %cst_251 : f32 to vector<1x256xf32>
    %622 = arith.select %133, %620, %621 : vector<1x256xi1>, vector<1x256xf32>
    %623 = arith.addf %613, %622 : vector<1x256xf32>
    %c0_252 = arith.constant 0 : index
    %c101 = arith.constant 101 : index
    %624 = vector.load %arg4[%c0_252, %c101] : memref<1x358xf32, #tpu.memory_space<vmem>>, vector<1x256xf32>
    %c0_253 = arith.constant 0 : index
    %c101_254 = arith.constant 101 : index
    %625 = vector.load %arg5[%c0_253, %c101_254] : memref<1x358xf32, #tpu.memory_space<vmem>>, vector<1x256xf32>
    %626 = vector.broadcast %47 : f32 to vector<1x256xf32>
    %627 = arith.mulf %624, %626 : vector<1x256xf32>
    %628 = vector.broadcast %96 : f32 to vector<1x256xf32>
    %629 = arith.mulf %625, %628 : vector<1x256xf32>
    %630 = arith.addf %627, %629 : vector<1x256xf32>
    %cst_255 = arith.constant 0.000000e+00 : f32
    %631 = vector.broadcast %cst_255 : f32 to vector<1x256xf32>
    %632 = arith.select %138, %630, %631 : vector<1x256xi1>, vector<1x256xf32>
    %633 = arith.addf %623, %632 : vector<1x256xf32>
    %c0_256 = arith.constant 0 : index
    %c102 = arith.constant 102 : index
    %634 = vector.load %arg4[%c0_256, %c102] : memref<1x358xf32, #tpu.memory_space<vmem>>, vector<1x256xf32>
    %c0_257 = arith.constant 0 : index
    %c102_258 = arith.constant 102 : index
    %635 = vector.load %arg5[%c0_257, %c102_258] : memref<1x358xf32, #tpu.memory_space<vmem>>, vector<1x256xf32>
    %636 = vector.broadcast %48 : f32 to vector<1x256xf32>
    %637 = arith.mulf %634, %636 : vector<1x256xf32>
    %638 = vector.broadcast %97 : f32 to vector<1x256xf32>
    %639 = arith.mulf %635, %638 : vector<1x256xf32>
    %640 = arith.addf %637, %639 : vector<1x256xf32>
    %cst_259 = arith.constant 0.000000e+00 : f32
    %641 = vector.broadcast %cst_259 : f32 to vector<1x256xf32>
    %642 = arith.select %143, %640, %641 : vector<1x256xi1>, vector<1x256xf32>
    %643 = arith.addf %633, %642 : vector<1x256xf32>
    %644 = arith.addf %229, %298 : vector<1x256xf32>
    %645 = arith.addf %367, %436 : vector<1x256xf32>
    %646 = arith.addf %505, %574 : vector<1x256xf32>
    %647 = arith.addf %644, %645 : vector<1x256xf32>
    %648 = arith.addf %646, %643 : vector<1x256xf32>
    %649 = arith.addf %647, %648 : vector<1x256xf32>
    %650 = arith.negf %649 : vector<1x256xf32>
    %651 = math.exp %650 : vector<1x256xf32>
    %cst_260 = arith.constant 1.000000e+00 : f32
    %652 = vector.broadcast %cst_260 : f32 to vector<1x256xf32>
    %653 = arith.addf %652, %651 : vector<1x256xf32>
    %654 = arith.divf %652, %653 : vector<1x256xf32>
    %655 = vector.broadcast %654 : vector<1x256xf32> to vector<4x256xf32>
    %656 = arith.mulf %152, %655 : vector<4x256xf32>
    %657 = arith.index_cast %149 : i32 to index
    %c0_261 = arith.constant 0 : index
    %c0_262 = arith.constant 0 : index
    %658 = vector.load %arg3[%657, %c0_261, %c0_262] : memref<1x4x256xf32, #tpu.memory_space<vmem>>, vector<1x4x256xf32>
    %659 = vector.shape_cast %658 : vector<1x4x256xf32> to vector<4x256xf32>
    %660 = vector.shape_cast %656 : vector<4x256xf32> to vector<1x4x256xf32>
    tpu.vector_store %arg3[%657, %c0_261, %c0_262], %660 {strides = array<i32>} : memref<1x4x256xf32, #tpu.memory_space<vmem>>, vector<1x4x256xf32>,
    %c1_i32_263 = arith.constant 1 : i32
    return
  }
  func.func @transform_0(%arg0: i32) -> (i32, i32, i32) {
    %c0_i32 = arith.constant 0 : i32
    %c0_i32_0 = arith.constant 0 : i32
    %c0_i32_1 = arith.constant 0 : i32
    return %arg0, %c0_i32, %c0_i32_0 : i32, i32, i32
  }
  func.func @transform_1(%arg0: i32) -> i32 {
    %c0_i32 = arith.constant 0 : i32
    %c0_i32_0 = arith.constant 0 : i32
    return %c0_i32 : i32
  }
  func.func @transform_2(%arg0: i32) -> (i32, i32, i32) {
    %c0_i32 = arith.constant 0 : i32
    %c0_i32_0 = arith.constant 0 : i32
    %c0_i32_1 = arith.constant 0 : i32
    return %arg0, %c0_i32, %c0_i32_0 : i32, i32, i32
  }
}

</mosaic_0001>

<bundles_post_ra>
// kernel: tpu_custom_call.1
= control target key start
LH: loop header
LB: loop body
LE: loop exit
PB: predicated region body
PF: predicated region fallthrough
CT: control target
= control target key end

     0   :  { %7 = vsyncpa [#allocation5], 0  ;;  %s3979_s0 = inlined_call_operand.hbm [shape: f32[2,4,256], index: 0, kind: input, shape index: {}]   ;;  %s3980_s1 = inlined_call_operand.vmem [shape: f32[98], index: 1, kind: input, shape index: {}]   ;;  %s3981_s2 = inlined_call_operand.hbm [shape: f32[2,4,256], index: 2, kind: output, shape index: {}]  }
   0x1   :  { %9 = vsyncpa [#allocation5 + $0x1], 0 }
   0x2   :  { %10 = vsyncpa [#allocation7], 0 }
   0x3   :  { %11 = vsyncpa [#allocation6], 0 }
   0x4   :  { %13 = vsyncpa [#allocation6 + $0x1], 0  ;;  %s2579_s9 = smov 0   ;;  %s2581_s10 = smov 0  }
   0x5   :  { %s2583_s11 = smov 0   ;;  %s2585_s12 = smov 0  }
   0x6 LB: > { %s2600_s13 = sadd.s32 4294967295, %s2508_s12   ;;  %s2152_s14 = sadd.s32 4294967294, %s2508_s12   ;;  %s2508_s12 = sphi %s2585_s12, %s4148_s12   ;;  %s2504_s11 = sphi %s2583_s11, %s4147_s11   ;;  %s2500_s10 = sphi %s2581_s10, %s4146_s10   ;;  %s2496_s9 = sphi %s2579_s9, %s4145_s9  }
   0x7   : > { %p39_p0 = scmp.ne.s32.totalorder %s2500_s10, %s2496_s9  ;;  %p3982_p1 = scmp.eq.s32.totalorder %s2600_s13, 0 }
   0x8   : > { %p90_p3 = scmp.eq.s32.totalorder %s2152_s14, 1  ;;  %p2153_p5 = scmp.ge.s32.totalorder %s2508_s12, 1 }
   0x9   : > { %p2609_p4 = por %p3982_p1, %p39_p0  ;;  %p97_p7 = scmp.lt.s32.totalorder %s2508_s12, 3 }
   0xa   : > { %p2614_p6 = por %p90_p3, %p39_p0  ;;  %s110_s19 = sshll.u32 %s3980_s1, 4  ;;  %s111_s19 = int_to_ptr.vmem [resolvable:$true] %s110_s19 }
   0xb   : > { %s4012_s15 = scalar_select %p2609_p4, 1, 0 }
   0xc   : > { %s4013_s16 = scalar_select %p2614_p6, 1, 0 }
   0xd   : > { %p2622_p8 = pnand %p2153_p5, %p97_p7  ;;  %s2630_s21 = sadd.s32 1, %s2508_s12  }
   0xe   : > { %s23_s23 = ssub.s32 %s2508_s12, %s2630_s21  ;;  %s26_s25 = sadd.s32 1, %s2504_s11 }
   0xf   : > { %p2281_p10 = pneg %p2622_p8  ;;  %p2640_p12 = scmp.eq.s32.totalorder %s23_s23, 0 }
  0x10   : > { %p33_p13 = scmp.ne.s32.totalorder %s2504_s11, %s2500_s10  ;;  %s2393_s26 = scalar_lea.vmem %s111_s19, 16 }
  0x11   : > { %p2634_p11 = pnand %p2281_p10, %p3982_p1  ;;  %p2394_p0 = scmp.ne.s32.totalorder %s111_s19, %s2393_s26 }
  0x12   : > { %p2401_p9 = scmp.lt.s32.totalorder %s111_s19, %s111_s19  ;;  %p2402_p2 = scmp.lt.s32.totalorder %s2393_s26, %s2393_s26 }
  0x13   : > { %p2395_p3 = pneg %p2634_p11 }
  0x14   : > { %p2403_p10 = por %p2402_p2, %p2401_p9 }
  0x15   : > { %p2396_p5 = pnand %p2395_p3, %p2394_p0 }
  0x17   : > { %p2397_p7 = pneg %p2396_p5 }
  0x19   : > { %p2404_p1 = pnand %p2403_p10, %p2397_p7 }
  0x1b   : > { %2407 = shalt.err (!%p2404_p1)
}
  0x1c   : > { %s2510_s27 = smov [#allocation8]   ;;  %p34_p2 = scmp.eq.s32.totalorder %s2508_s12, 0 }
  0x1d   : > { %2284 = dma.vmem_to_smem (!%p2634_p11), %s111_s19, 16, %s2510_s27, [#allocation7]  }
  0x1e   : > { %s2654_s28 = scalar_select %p2640_p12, %s2504_s11, %s26_s25  }
  0x1f   : > { %p4017_p1 = scmp.eq.s32.totalorder %s2600_s13, 1  ;;  %p2294_p0 = scmp.lt.s32.totalorder %s2508_s12, 2 }
  0x20   : > { %s121_s30 = sand.u32 1, %s2504_s11   ;;  %p35_p3 = por %p34_p2, %p33_p13 }
  0x21   : > { %p2662_p9 = por %p4017_p1, %p33_p13  ;;  %s2156_s3 = sshll.u32 %s121_s30, 3 }
  0x22   : > { %s2267_s4 = sshll.u32 %s2508_s12, 7  ;;  %s125_s8 = scalar_lea.vmem [#allocation4], %s2156_s3 }
  0x23   : > { %s4018_s29 = scalar_select %p2662_p9, 1, 0 }
  0x24   : > { %s2675_s7 = scalar_lea.hbm %s3979_s0, %s2267_s4  ;;  %s133_s14 = sshll.u32 %s125_s8, 4  ;;  %s2681_s14 = int_to_ptr.vmem [resolvable:$true] %s133_s14 }
  0x25   : > { %p2677_p11 = pnand %p2294_p0, %p35_p3  ;;  %s122_s18 = scalar_lea.sflag [#allocation5], %s121_s30 }
  0x26   : > { %s2408_s19 = scalar_lea.hbm %s2675_s7, 128  ;;  %s2413_s24 = scalar_lea.hbm %s3979_s0, 256 }
  0x27   : > { %p2409_p12 = scmp.ne.s32.totalorder %s2675_s7, %s2408_s19  ;;  %p2410_p13 = pneg %p2677_p11 }
  0x28   : > { %p2414_p10 = scmp.lt.u32.totalorder %s2675_s7, %s3979_s0  ;;  %p2415_p2 = scmp.lt.u32.totalorder %s2413_s24, %s2408_s19 }
  0x29   : > { %p2411_p5 = pnand %p2410_p13, %p2409_p12  ;;  %p2417_p0 = scmp.lt.u32.totalorder %s2408_s19, %s2675_s7 }
  0x2a   : > { %p2416_p1 = por %p2415_p2, %p2414_p10 }
  0x2b   : > { %p2412_p7 = pneg %p2411_p5 }
  0x2c   : > { %p2418_p3 = por %p2417_p0, %p2416_p1 }
  0x2e   : > { %p2419_p6 = pnand %p2418_p3, %p2412_p7 }
  0x30   : > { %2422 = shalt.err (!%p2419_p6)
}
  0x31   : > { %s2423_s27 = scalar_lea.vmem %s2681_s14, 128  ;;  %s2511_s30 = smov [#allocation4]  }
  0x32   : > { %p2424_p12 = scmp.ne.s32.totalorder %s2681_s14, %s2423_s27  ;;  %s2428_s3 = sshll.u32 %s2511_s30, 4  ;;  %s2429_s3 = int_to_ptr.vmem [resolvable:$false] %s2428_s3 }
  0x33   : > { %s2430_s4 = scalar_lea.vmem %s2429_s3, 256  ;;  %p2431_p4 = scmp.lt.s32.totalorder %s2681_s14, %s2429_s3 }
  0x34   : > { %p2426_p5 = pnand %p2424_p12, %p2410_p13  ;;  %p2432_p10 = scmp.lt.s32.totalorder %s2430_s4, %s2423_s27 }
  0x36   : > { %p2427_p9 = pneg %p2426_p5  ;;  %p2433_p2 = por %p2432_p10, %p2431_p4 }
  0x38   : > { %p2434_p1 = pnand %p2433_p2, %p2427_p9 }
  0x3a   : > { %2437 = shalt.err (!%p2434_p1)
}
  0x3b   : > { %2288 = dma.hbm_to_vmem [thread:$0]  (!%p2677_p11), %s2675_s7, 128, %s2681_s14, %s122_s18  }
  0x3c   : > { %142 = sbr.rel (%p2622_p8) target bundleno = 697 (0x2b9), region = 28 }
  0x43   : > { %s2711_s5 = sand.u32 1, %s2500_s10   ;;  %p4020_p4 = scmp.ne.s32.totalorder %s4012_s15, 0 }
  0x44   : > { %s2160_s6 = sshll.u32 %s2711_s5, 3  ;;  %s145_s8 = scalar_lea.sflag [#allocation5], %s2711_s5 }
  0x45   : > { %s2717_s19 = scalar_lea.vmem [#allocation4], %s2160_s6 }
  0x46   : > { %2483 = dma.done.wait (%p4020_p4), %s145_s8, 128  }
  0x47   : > { %2485 = vsyncadd (%p4020_p4), %s145_s8, 4294967168  ;;  %p4021_p6 = scmp.eq.s32.totalorder %s2600_s13, 0 }
  0x49   : > { %2487 = dma.done.wait (%p4021_p6), [#allocation7], 16   ;;  %p4022_p8 = pmov %p4021_p6 }
  0x4b   : > { %2489 = vsyncadd (%p4022_p8), [#allocation7], 4294967280 }
  0x4c   : > { %157 = sfence }
  0x4d   : > { %v337_v0 = vld [vmem:[%s2717_s19] sm:$0xff]  ;;  %vm341_vm0 = vcmask 1043456   ;;  %v272_v10 = vlaneseq  ;;  %v2512_v11 = vmov 1966171168   ;;  %v2513_v27 = vmov 0.0   ;;  %s2514_s15 = smov 51  }
  0x4e   : > { %v339_v1 = vcombine.high %v337_v0, %v337_v0  ;;  %v359_v2 = vsel %vm341_vm0, %v337_v0, -inf  ;;  %v342_v3 = vsel %vm341_vm0, %v337_v0, 0.0  ;;  %v377_v12 = vunpack.c.l.s4 %v2512_v11  ;;  %s2212_s20 = sld [smem:[#allocation8 + $0x32]]  ;;  %s2163_s7 = sld [smem:[#allocation8 + $0x1]] }
  0x4f   : > { %v360_v4 = vrot.slane %v359_v2, 4  ;;  %v343_v5 = vrot.slane %v342_v3, 4  ;;  %v380_v22 = vshrl.u32 %v272_v10, 7  ;;  %vm333_vm1 = vcmp.lt.s32.totalorder %v272_v10, 358  ;;  %s2164_s14 = sld [smem:[#allocation8 + $0x2]]  ;;  %s2213_s17 = sld [smem:[#allocation8 + $0x33]] }
  0x50   : > { %v366_v6 = vsel %vm341_vm0, %v339_v1, -inf  ;;  %v349_v7 = vsel %vm341_vm0, %v339_v1, 0.0  ;;  %v378_v21 = vunpack.c.0.s8 %v377_v12  ;;  %336 = vst.msk [vmem:[#allocation3] sm:$0x7] %vm333_vm1, %v2513_v27  ;;  %335 = vst.msk [vmem:[#allocation2] sm:$0x7] %vm333_vm1, %v2513_v27 }
  0x51   : > { %v361_v8 = vmax.f32 %v359_v2, %v360_v4  ;;  %v367_v9 = vrot.slane %v366_v6, 4  ;;  %v344_v15 = vadd.f32 %v343_v5, %v342_v3  ;;  %v350_v16 = vrot.slane %v349_v7, 4  ;;  %s2165_s18 = sld [smem:[#allocation8 + $0x3]]  ;;  %s2214_s22 = sld [smem:[#allocation8 + $0x34]] }
  0x52   : > { %v381_v33 = vsub.s32 %v378_v21, %v380_v22  ;;  %vm2731_vm2 = vcmp.ge.s32.totalorder %v272_v10, 51  ;;  %vm397_vm3 = vcmp.lt.s32.totalorder %v272_v10, 307  ;;  %vm393_vm4 = vcmask 416768   ;;  %s2166_s23 = sld [smem:[#allocation8 + $0x4]]  ;;  %s2215_s24 = sld [smem:[#allocation8 + $0x35]] }
  0x53   : > { %v362_v13 = vrot.slane %v361_v8, 2  ;;  %v368_v14 = vmax.f32 %v366_v6, %v367_v9  ;;  %v345_v19 = vrot.slane %v344_v15, 2  ;;  %v351_v20 = vadd.f32 %v350_v16, %v349_v7  ;;  %vm398_vm5 = vmand %vm2731_vm2, %vm397_vm3  ;;  %s2167_s25 = sld [smem:[#allocation8 + $0x5]]  ;;  %s2515_s26 = smov 127  }
  0x54   : > { %v445_v53 = vstv %s2163_s7  ;;  %v447_v54 = vstv %s2212_s20  ;;  %v2740_v56 = vsub.s32 0, %v380_v22  ;;  %v2744_v59 = vsub.s32 2, %v380_v22  ;;  %s2216_s27 = sld [smem:[#allocation8 + $0x36]]  ;;  %s2516_s30 = smov 126  }
  0x55   : > { %v363_v17 = vmax.f32 %v361_v8, %v362_v13  ;;  %v369_v18 = vrot.slane %v368_v14, 2  ;;  %v346_v25 = vadd.f32 %v345_v19, %v344_v15  ;;  %v352_v26 = vrot.slane %v351_v20, 2  ;;  %s2168_s3 = sld [smem:[#allocation8 + $0x6]]  ;;  %s2517_s4 = smov 125  }
  0x56   : > { %v478_v55 = vstv %s2164_s14  ;;  %v480_v58 = vstv %s2213_s17  ;;  %v2750_v2 = vsub.s32 1, %v380_v22  ;;  %s2217_s8 = sld [smem:[#allocation8 + $0x37]]  ;;  %s2218_s20 = sld [smem:[#allocation8 + $0x38]]  ;;  %vm896_vm9 = vcmask 785408  }
  0x57   : > { %v364_v23 = vrot.slane %v363_v17, 1  ;;  %v370_v24 = vmax.f32 %v368_v14, %v369_v18  ;;  %v347_v30 = vrot.slane %v346_v25, 1  ;;  %v353_v31 = vadd.f32 %v352_v26, %v351_v20  ;;  %s2518_s7 = smov 124   ;;  %s2170_s14 = sld [smem:[#allocation8 + $0x8]] }
  0x58   : > { %v511_v63 = vstv %s2165_s18  ;;  %v513_v3 = vstv %s2214_s22  ;;  %v544_v13 = vstv %s2166_s23  ;;  %v546_v14 = vstv %s2215_s24  ;;  %s2519_s17 = smov 123   ;;  %s2219_s18 = sld [smem:[#allocation8 + $0x39]] }
  0x59   : > { %v365_v28 = vmax.f32 %v363_v17, %v364_v23  ;;  %v371_v29 = vrot.slane %v370_v24, 1  ;;  %v348_v34 = vadd.f32 %v347_v30, %v346_v25  ;;  %v354_v35 = vrot.slane %v353_v31, 1  ;;  %s2171_s22 = sld [smem:[#allocation8 + $0x9]]  ;;  %s2220_s23 = sld [smem:[#allocation8 + $0x3a]] }
  0x5a   : > { %v577_v18 = vstv %s2167_s25  ;;  %v579_v20 = vstv %s2216_s27  ;;  %s2520_s24 = smov 122   ;;  %s2172_s25 = sld [smem:[#allocation8 + $0xa]]  ;;  %vm927_vm10 = vcmask 777216   ;;  %vm960_vm1 = vcmask 769024  }
  0x5b   : > { %v372_v32 = vmax.f32 %v370_v24, %v371_v29  ;;  %v355_v37 = vadd.f32 %v354_v35, %v353_v31  ;;  %v357_v38 = vmul.f32 0.25, %v348_v34  ;;  %v610_v29 = vstv %s2168_s3  ;;  %s2221_s27 = sld [smem:[#allocation8 + $0x3b]]  ;;  %s2222_s3 = sld [smem:[#allocation8 + $0x3c]] }
  0x5c   : > { %v612_v30 = vstv %s2217_s8  ;;  %s2174_s8 = sld [smem:[#allocation8 + $0xc]]  ;;  %p4142_p11 = scmp.ne.s32.totalorder %s4018_s29, 0 }
  0x5d   : > { %v402_v36 = vcombine.low %v365_v28, %v372_v32  ;;  %v358_v40 = vmul.f32 0.25, %v355_v37  ;;  %v674_v45 = vstv %s2170_s14  ;;  %s2224_s14 = sld [smem:[#allocation8 + $0x3e]] }
  0x5f   : > { %v409_v39 = vrot.slane %v402_v36, %v381_v33  ;;  %v375_v42 = vcombine.low %v357_v38, %v358_v40  ;;  %v645_v36 = vstv %s2218_s20  ;;  %s2223_s20 = sld [smem:[#allocation8 + $0x3d]] }
  0x61   : > { %v416_v41 = vrot.slane %v409_v39, %v381_v33  ;;  %v382_v43 = vrot.slane %v375_v42, %v381_v33 }
  0x63   : > { %417 = vrot.lane.b32.xlu0 %v416_v41, %s2514_s15  ;;  %v389_v44 = vrot.slane %v382_v43, %v381_v33 }
  0x67   : > { %390 = vrot.lane.b32.xlu0 %v389_v44, %s2514_s15  ;;  %s2169_s15 = sld [smem:[#allocation8 + $0x7]] }
  0x6d   : > { %v643_v34 = vstv %s2169_s15  ;;  %s2523_s15 = smov 110  }
  0xd5   : > { %v418_v46 = vpop.permute.xlu0 %417 }
  0xd6   : > { %v419_v47 = vrot.slane %v418_v46, 7 }
  0xd8   : > { %v420_v48 = vsel %vm393_vm4, %v419_v47, %v418_v46  ;;  %v676_v46 = vstv %s2219_s18  ;;  %s2176_s18 = sld [smem:[#allocation8 + $0xe]] }
  0xd9   : > { %422 = vst.msk [vmem:[#allocation3] sm:$0x7] %vm398_vm5, %v420_v48  ;;  %v391_v49 = vpop.permute.xlu0 %390 }
  0xda   : > { %v392_v50 = vrot.slane %v391_v49, 7 }
  0xdc   : > { %v394_v51 = vsel %vm393_vm4, %v392_v50, %v391_v49  ;;  %v707_v50 = vstv %s2171_s22  ;;  %s2525_s22 = smov 108  }
  0xdd   : > { %399 = vst.msk [vmem:[#allocation2] sm:$0x7] %vm398_vm5, %v394_v51 }
  0xe0   : > { %v2738_v52 = vld [vmem:[#allocation3] sm:$0x7] }
  0xe1   : > { %v448_v61 = vmul.f32 %v447_v54, %v2738_v52  ;;  %v481_v1 = vmul.f32 %v480_v58, %v2738_v52  ;;  %v514_v8 = vmul.f32 %v513_v3, %v2738_v52  ;;  %v547_v19 = vmul.f32 %v546_v14, %v2738_v52 }
  0xe2   : > { %v580_v25 = vmul.f32 %v579_v20, %v2738_v52  ;;  %v613_v35 = vmul.f32 %v612_v30, %v2738_v52  ;;  %v646_v41 = vmul.f32 %v645_v36, %v2738_v52  ;;  %v677_v51 = vmul.f32 %v676_v46, %v2738_v52 }
  0xe3   : > { %v742_v3 = vstv %s2221_s27  ;;  %v808_v20 = vstv %s2223_s20  ;;  %s2178_s27 = sld [smem:[#allocation8 + $0x10]]  ;;  %s2180_s20 = sld [smem:[#allocation8 + $0x12]] }
  0xe4   : > { %v2742_v57 = vld [vmem:[#allocation2] sm:$0x7] }
  0xe5   : > { %v446_v60 = vmul.f32 %v445_v53, %v2742_v57  ;;  %v479_v62 = vmul.f32 %v478_v55, %v2742_v57  ;;  %v512_v7 = vmul.f32 %v511_v63, %v2742_v57  ;;  %v545_v17 = vmul.f32 %v544_v13, %v2742_v57 }
  0xe6   : > { %v578_v24 = vmul.f32 %v577_v18, %v2742_v57  ;;  %v611_v33 = vmul.f32 %v610_v29, %v2742_v57  ;;  %v644_v40 = vmul.f32 %v643_v34, %v2742_v57  ;;  %v675_v49 = vmul.f32 %v674_v45, %v2742_v57 }
  0xe7   : > { %v449_v0 = vadd.f32 %v448_v61, %v446_v60  ;;  %v482_v6 = vadd.f32 %v481_v1, %v479_v62  ;;  %v515_v12 = vadd.f32 %v514_v8, %v512_v7  ;;  %v548_v23 = vadd.f32 %v547_v19, %v545_v17 }
  0xe8   : > { %v581_v28 = vadd.f32 %v580_v25, %v578_v24  ;;  %v614_v39 = vadd.f32 %v613_v35, %v611_v33  ;;  %v647_v44 = vadd.f32 %v646_v41, %v644_v40  ;;  %v709_v53 = vstv %s2220_s23  ;;  %s2225_s23 = sld [smem:[#allocation8 + $0x3f]] }
  0xe9   : > { %v462_v4 = vrot.slane %v449_v0, %v2744_v59  ;;  %v454_v5 = vrot.slane %v449_v0, %v2740_v56  ;;  %v491_v9 = vrot.slane %v482_v6, %v2750_v2  ;;  %v458_v11 = vrot.slane %v449_v0, %v2750_v2 }
  0xea   : > { %v520_v15 = vrot.slane %v515_v12, %v2740_v56  ;;  %v487_v16 = vrot.slane %v482_v6, %v2740_v56  ;;  %v528_v21 = vrot.slane %v515_v12, %v2744_v59  ;;  %v495_v22 = vrot.slane %v482_v6, %v2744_v59 }
  0xeb   : > { %467 = vrot.lane.b32.xlu0 %v462_v4, %s2515_s26  ;;  %463 = vrot.lane.b32.xlu1 %v454_v5, %s2515_s26  ;;  %v557_v26 = vrot.slane %v548_v23, %v2750_v2  ;;  %v524_v27 = vrot.slane %v515_v12, %v2750_v2  ;;  %v586_v31 = vrot.slane %v581_v28, %v2740_v56  ;;  %v740_v1 = vstv %s2172_s25  ;;  %s2226_s25 = sld [smem:[#allocation8 + $0x40]] }
  0xec   : > { %v553_v32 = vrot.slane %v548_v23, %v2740_v56  ;;  %v594_v37 = vrot.slane %v581_v28, %v2744_v59  ;;  %v561_v38 = vrot.slane %v548_v23, %v2744_v59  ;;  %v623_v42 = vrot.slane %v614_v39, %v2750_v2 }
  0xed   : > { %v590_v43 = vrot.slane %v581_v28, %v2750_v2  ;;  %v652_v47 = vrot.slane %v647_v44, %v2740_v56  ;;  %v619_v48 = vrot.slane %v614_v39, %v2740_v56  ;;  %v660_v54 = vrot.slane %v647_v44, %v2744_v59 }
  0xee   : > { %v627_v55 = vrot.slane %v614_v39, %v2744_v59  ;;  %v678_v58 = vadd.f32 %v677_v51, %v675_v49  ;;  %v708_v60 = vmul.f32 %v707_v50, %v2742_v57  ;;  %v710_v61 = vmul.f32 %v709_v53, %v2738_v52 }
  0xef   : > { %498 = vrot.lane.b32.xlu0 %v491_v9, %s2516_s30  ;;  %465 = vrot.lane.b32.xlu1 %v458_v11, %s2515_s26  ;;  %s2521_s26 = smov 112   ;;  %v656_v63 = vrot.slane %v647_v44, %v2750_v2  ;;  %v741_v6 = vmul.f32 %v740_v1, %v2742_v57  ;;  %v743_v8 = vmul.f32 %v742_v3, %v2738_v52  ;;  %v775_v9 = vstv %s2222_s3  ;;  %s2227_s3 = sld [smem:[#allocation8 + $0x41]] }
  0xf0   : > { %v687_v62 = vrot.slane %v678_v58, %v2750_v2  ;;  %v711_v0 = vadd.f32 %v710_v61, %v708_v60  ;;  %v683_v5 = vrot.slane %v678_v58, %v2740_v56  ;;  %v691_v12 = vrot.slane %v678_v58, %v2744_v59 }
  0xf1   : > { %v744_v13 = vadd.f32 %v743_v8, %v741_v6  ;;  %v806_v19 = vstv %s2174_s8  ;;  %v809_v25 = vmul.f32 %v808_v20, %v2738_v52  ;;  %v872_v35 = vstv %s2176_s18  ;;  %s2228_s8 = sld [smem:[#allocation8 + $0x42]]  ;;  %s2230_s18 = sld [smem:[#allocation8 + $0x44]] }
  0xf2   : > { %v716_v4 = vrot.slane %v711_v0, %v2740_v56  ;;  %v724_v11 = vrot.slane %v711_v0, %v2744_v59  ;;  %v720_v17 = vrot.slane %v711_v0, %v2750_v2  ;;  %v807_v23 = vmul.f32 %v806_v19, %v2742_v57 }
  0xf3   : > { %529 = vrot.lane.b32.xlu0 %v520_v15, %s2517_s4  ;;  %496 = vrot.lane.b32.xlu1 %v487_v16, %s2516_s30  ;;  %v776_v15 = vmul.f32 %v775_v9, %v2738_v52  ;;  %v753_v16 = vrot.slane %v744_v13, %v2750_v2  ;;  %v757_v28 = vrot.slane %v744_v13, %v2744_v59  ;;  %v874_v36 = vstv %s2225_s23  ;;  %s2182_s23 = sld [smem:[#allocation8 + $0x14]] }
  0xf4   : > { %v810_v29 = vadd.f32 %v809_v25, %v807_v23  ;;  %v873_v39 = vmul.f32 %v872_v35, %v2742_v57  ;;  %v875_v41 = vmul.f32 %v874_v36, %v2738_v52  ;;  %v936_v51 = vstv %s2178_s27  ;;  %s2232_s27 = sld [smem:[#allocation8 + $0x46]] }
  0xf5   : > { %v938_v53 = vstv %s2227_s3  ;;  %v937_v58 = vmul.f32 %v936_v51, %v2742_v57  ;;  %v1002_v8 = vstv %s2180_s20  ;;  %s2184_s3 = sld [smem:[#allocation8 + $0x16]]  ;;  %s2848_s20 = sld [smem:[#allocation8 + $0x48]] }
  0xf6   : > { %v823_v44 = vrot.slane %v810_v29, %v2744_v59  ;;  %v876_v45 = vadd.f32 %v875_v41, %v873_v39  ;;  %v939_v61 = vmul.f32 %v938_v53, %v2738_v52 }
  0xf7   : > { %533 = vrot.lane.b32.xlu0 %v528_v21, %s2517_s4  ;;  %500 = vrot.lane.b32.xlu1 %v495_v22, %s2516_s30  ;;  %s2173_s30 = sld [smem:[#allocation8 + $0xb]]  ;;  %v749_v22 = vrot.slane %v744_v13, %v2740_v56  ;;  %v1003_v13 = vmul.f32 %v1002_v8, %v2742_v57 }
  0xf8   : > { %v889_v0 = vrot.slane %v876_v45, %v2744_v59  ;;  %v940_v1 = vadd.f32 %v939_v61, %v937_v58 }
  0xf9   : > { %v1068_v25 = vstv %s2182_s23  ;;  %s2876_s23 = sld [smem:[#allocation8 + $0x4a]] }
  0xfb   : > { %564 = vrot.lane.b32.xlu0 %v557_v26, %s2518_s7  ;;  %531 = vrot.lane.b32.xlu1 %v524_v27, %s2517_s4  ;;  %s2522_s4 = smov 111   ;;  %v841_v26 = vstv %s2224_s14  ;;  %s2229_s14 = sld [smem:[#allocation8 + $0x43]]  ;;  %v1132_v41 = vstv %s2184_s3 }
  0xfc   : > { %s2910_s3 = sld [smem:[#allocation8 + $0x4c]] }
  0xfd   : > { %v773_v7 = vstv %s2173_s30  ;;  %s2527_s30 = smov 106  }
  0xfe   : > { %v774_v14 = vmul.f32 %v773_v7, %v2742_v57 }
  0xff   : > { %595 = vrot.lane.b32.xlu0 %v586_v31, %s2519_s17  ;;  %562 = vrot.lane.b32.xlu1 %v553_v32, %s2518_s7  ;;  %v842_v31 = vmul.f32 %v841_v26, %v2738_v52  ;;  %v819_v32 = vrot.slane %v810_v29, %v2750_v2 }
 0x100   : > { %v777_v18 = vadd.f32 %v776_v15, %v774_v14 }
 0x101   : > { %v1004_v9 = vstv %s2229_s14  ;;  %s2860_s14 = sld [smem:[#allocation8 + $0x18]] }
 0x102   : > { %v782_v21 = vrot.slane %v777_v18, %v2740_v56  ;;  %v790_v27 = vrot.slane %v777_v18, %v2744_v59  ;;  %v786_v33 = vrot.slane %v777_v18, %v2750_v2  ;;  %v1005_v15 = vmul.f32 %v1004_v9, %v2738_v52 }
 0x103   : > { %599 = vrot.lane.b32.xlu0 %v594_v37, %s2519_s17  ;;  %566 = vrot.lane.b32.xlu1 %v561_v38, %s2518_s7  ;;  %s2175_s7 = sld [smem:[#allocation8 + $0xd]]  ;;  %v815_v38 = vrot.slane %v810_v29, %v2740_v56  ;;  %v953_v18 = vrot.slane %v940_v1, %v2744_v59  ;;  %v1069_v29 = vmul.f32 %v1068_v25, %v2742_v57 }
 0x104   : > { %v1006_v19 = vadd.f32 %v1005_v15, %v1003_v13 }
 0x107   : > { %630 = vrot.lane.b32.xlu0 %v623_v42, %s2520_s24  ;;  %597 = vrot.lane.b32.xlu1 %v590_v43, %s2519_s17  ;;  %s2524_s17 = smov 109   ;;  %v905_v42 = vstv %s2226_s25  ;;  %s2231_s25 = sld [smem:[#allocation8 + $0x45]] }
 0x109   : > { %v839_v24 = vstv %s2175_s7  ;;  %s2529_s7 = smov 95  }
 0x10a   : > { %v840_v30 = vmul.f32 %v839_v24, %v2742_v57 }
 0x10b   : > { %661 = vrot.lane.b32.xlu0 %v652_v47, %s2521_s26  ;;  %628 = vrot.lane.b32.xlu1 %v619_v48, %s2520_s24  ;;  %v906_v47 = vmul.f32 %v905_v42, %v2738_v52  ;;  %v885_v48 = vrot.slane %v876_v45, %v2750_v2 }
 0x10c   : > { %v843_v34 = vadd.f32 %v842_v31, %v840_v30 }
 0x10d   : > { %v1070_v26 = vstv %s2231_s25  ;;  %s2894_s25 = sld [smem:[#allocation8 + $0x1a]] }
 0x10e   : > { %v848_v37 = vrot.slane %v843_v34, %v2740_v56  ;;  %v856_v43 = vrot.slane %v843_v34, %v2744_v59  ;;  %v852_v49 = vrot.slane %v843_v34, %v2750_v2  ;;  %v1071_v31 = vmul.f32 %v1070_v26, %v2738_v52 }
 0x10f   : > { %665 = vrot.lane.b32.xlu0 %v660_v54, %s2521_s26  ;;  %632 = vrot.lane.b32.xlu1 %v627_v55, %s2520_s24  ;;  %s2177_s24 = sld [smem:[#allocation8 + $0xf]]  ;;  %v881_v55 = vrot.slane %v876_v45, %v2740_v56  ;;  %v1019_v34 = vrot.slane %v1006_v19, %v2744_v59 }
 0x110   : > { %v1072_v35 = vadd.f32 %v1071_v31, %v1069_v29 }
 0x113   : > { %694 = vrot.lane.b32.xlu0 %v687_v62, %s2522_s4  ;;  %663 = vrot.lane.b32.xlu1 %v656_v63, %s2521_s26  ;;  %s2526_s26 = smov 107   ;;  %v971_v62 = vstv %s2228_s8  ;;  %s2233_s8 = sld [smem:[#allocation8 + $0x47]] }
 0x115   : > { %v903_v40 = vstv %s2177_s24  ;;  %s2531_s24 = smov 93  }
 0x116   : > { %v904_v46 = vmul.f32 %v903_v40, %v2742_v57 }
 0x117   : > { %725 = vrot.lane.b32.xlu0 %v716_v4, %s2523_s15  ;;  %692 = vrot.lane.b32.xlu1 %v683_v5, %s2522_s4  ;;  %v972_v4 = vmul.f32 %v971_v62, %v2738_v52  ;;  %v949_v5 = vrot.slane %v940_v1, %v2750_v2 }
 0x118   : > { %v907_v50 = vadd.f32 %v906_v47, %v904_v46  ;;  %v1077_v46 = vrot.slane %v1072_v35, %v2740_v56  ;;  %v1133_v47 = vmul.f32 %v1132_v41, %v2742_v57 }
 0x119   : > { %v1134_v42 = vstv %s2233_s8  ;;  %s2928_s8 = sld [smem:[#allocation8 + $0x1c]] }
 0x11a   : > { %v912_v54 = vrot.slane %v907_v50, %v2740_v56  ;;  %v920_v63 = vrot.slane %v907_v50, %v2744_v59  ;;  %v916_v6 = vrot.slane %v907_v50, %v2750_v2  ;;  %v1167_v50 = vstv %s2848_s20  ;;  %s2932_s20 = sld [smem:[#allocation8 + $0x4d]] }
 0x11b   : > { %729 = vrot.lane.b32.xlu0 %v724_v11, %s2523_s15  ;;  %696 = vrot.lane.b32.xlu1 %v691_v12, %s2522_s4  ;;  %s2179_s4 = sld [smem:[#allocation8 + $0x11]]  ;;  %v945_v12 = vrot.slane %v940_v1, %v2740_v56  ;;  %v1168_v61 = vmul.f32 %v1167_v50, %v2738_v52 }
 0x11f   : > { %760 = vrot.lane.b32.xlu0 %v753_v16, %s2524_s17  ;;  %727 = vrot.lane.b32.xlu1 %v720_v17, %s2523_s15  ;;  %s2528_s15 = smov 96   ;;  %v1037_v16 = vstv %s2230_s18  ;;  %s2864_s18 = sld [smem:[#allocation8 + $0x49]] }
 0x121   : > { %v969_v60 = vstv %s2179_s4  ;;  %s2533_s4 = smov 91  }
 0x122   : > { %v970_v3 = vmul.f32 %v969_v60, %v2742_v57 }
 0x123   : > { %791 = vrot.lane.b32.xlu0 %v782_v21, %s2525_s22  ;;  %758 = vrot.lane.b32.xlu1 %v749_v22, %s2524_s17  ;;  %v1038_v21 = vmul.f32 %v1037_v16, %v2738_v52  ;;  %v1015_v22 = vrot.slane %v1006_v19, %v2750_v2 }
 0x124   : > { %v973_v7 = vadd.f32 %v972_v4, %v970_v3  ;;  %v1198_v4 = vstv %s2860_s14  ;;  %s2944_s14 = sld [smem:[#allocation8 + $0x4e]] }
 0x126   : > { %v978_v11 = vrot.slane %v973_v7, %v2740_v56  ;;  %v986_v17 = vrot.slane %v973_v7, %v2744_v59  ;;  %v982_v23 = vrot.slane %v973_v7, %v2750_v2 }
 0x127   : > { %795 = vrot.lane.b32.xlu0 %v790_v27, %s2525_s22  ;;  %762 = vrot.lane.b32.xlu1 %v757_v28, %s2524_s17  ;;  %s2181_s17 = sld [smem:[#allocation8 + $0x13]]  ;;  %v1011_v28 = vrot.slane %v1006_v19, %v2740_v56 }
 0x12b   : > { %826 = vrot.lane.b32.xlu0 %v819_v32, %s2526_s26  ;;  %793 = vrot.lane.b32.xlu1 %v786_v33, %s2525_s22  ;;  %s2530_s22 = smov 94   ;;  %v1103_v32 = vstv %s2232_s27  ;;  %s2898_s27 = sld [smem:[#allocation8 + $0x4b]] }
 0x12d   : > { %v1035_v14 = vstv %s2181_s17  ;;  %s2535_s17 = smov 80  }
 0x12e   : > { %v1036_v20 = vmul.f32 %v1035_v14, %v2742_v57  ;;  %v1233_v14 = vstv %s2876_s23  ;;  %s2966_s23 = sld [smem:[#allocation8 + $0x4f]] }
 0x12f   : > { %857 = vrot.lane.b32.xlu0 %v848_v37, %s2527_s30  ;;  %824 = vrot.lane.b32.xlu1 %v815_v38, %s2526_s26  ;;  %v1104_v37 = vmul.f32 %v1103_v32, %v2738_v52  ;;  %v1081_v38 = vrot.slane %v1072_v35, %v2750_v2 }
 0x130   : > { %v1039_v24 = vadd.f32 %v1038_v21, %v1036_v20  ;;  %v1234_v21 = vmul.f32 %v1233_v14, %v2738_v52 }
 0x132   : > { %v1044_v27 = vrot.slane %v1039_v24, %v2740_v56  ;;  %v1052_v33 = vrot.slane %v1039_v24, %v2744_v59  ;;  %v1048_v39 = vrot.slane %v1039_v24, %v2750_v2 }
 0x133   : > { %861 = vrot.lane.b32.xlu0 %v856_v43, %s2527_s30  ;;  %828 = vrot.lane.b32.xlu1 %v823_v44, %s2526_s26  ;;  %s2183_s26 = sld [smem:[#allocation8 + $0x15]] }
 0x137   : > { %892 = vrot.lane.b32.xlu0 %v885_v48, %s2528_s15  ;;  %859 = vrot.lane.b32.xlu1 %v852_v49, %s2527_s30  ;;  %s2532_s30 = smov 92   ;;  %v1135_v49 = vmul.f32 %v1134_v42, %v2738_v52 }
 0x139   : > { %v1101_v30 = vstv %s2183_s26  ;;  %v1136_v58 = vadd.f32 %v1135_v49, %v1133_v47  ;;  %s2537_s26 = smov 78  }
 0x13a   : > { %v1102_v36 = vmul.f32 %v1101_v30, %v2742_v57 }
 0x13b   : > { %921 = vrot.lane.b32.xlu0 %v912_v54, %s2529_s7  ;;  %890 = vrot.lane.b32.xlu1 %v881_v55, %s2528_s15  ;;  %v1085_v55 = vrot.slane %v1072_v35, %v2744_v59  ;;  %v1141_v9 = vrot.slane %v1136_v58, %v2740_v56 }
 0x13c   : > { %v1105_v40 = vadd.f32 %v1104_v37, %v1102_v36  ;;  %v1299_v36 = vstv %s2910_s3  ;;  %s2543_s3 = smov 63  }
 0x13e   : > { %v1110_v45 = vrot.slane %v1105_v40, %v2740_v56  ;;  %v1118_v54 = vrot.slane %v1105_v40, %v2744_v59  ;;  %v1114_v1 = vrot.slane %v1105_v40, %v2750_v2 }
 0x13f   : > { %925 = vrot.lane.b32.xlu0 %v920_v63, %s2529_s7  ;;  %894 = vrot.lane.b32.xlu1 %v889_v0, %s2528_s15  ;;  %s2845_s15 = sld [smem:[#allocation8 + $0x17]]  ;;  %v1145_v0 = vrot.slane %v1136_v58, %v2750_v2 }
 0x143   : > { %956 = vrot.lane.b32.xlu0 %v949_v5, %s2530_s22  ;;  %923 = vrot.lane.b32.xlu1 %v916_v6, %s2529_s7  ;;  %s2534_s7 = smov 90   ;;  %v1200_v5 = vstv %s2864_s18  ;;  %s2962_s18 = sld [smem:[#allocation8 + $0x1e]] }
 0x144   : > { %v1201_v13 = vmul.f32 %v1200_v5, %v2738_v52  ;;  %v1363_v5 = vstv %s2944_s14  ;;  %s3051_s14 = sld [smem:[#allocation8 + $0x5b]] }
 0x145   : > { %v1165_v48 = vstv %s2845_s15  ;;  %s2539_s15 = smov 76  }
 0x146   : > { %v1166_v60 = vmul.f32 %v1165_v48, %v2742_v57 }
 0x147   : > { %987 = vrot.lane.b32.xlu0 %v978_v11, %s2531_s24  ;;  %954 = vrot.lane.b32.xlu1 %v945_v12, %s2530_s22  ;;  %v1199_v11 = vmul.f32 %v1198_v4, %v2742_v57 }
 0x148   : > { %v1169_v3 = vadd.f32 %v1168_v61, %v1166_v60 }
 0x149   : > { %v1202_v19 = vadd.f32 %v1201_v13, %v1199_v11 }
 0x14a   : > { %v1174_v8 = vrot.slane %v1169_v3, %v2740_v56  ;;  %v1178_v25 = vrot.slane %v1169_v3, %v2750_v2 }
 0x14b   : > { %991 = vrot.lane.b32.xlu0 %v986_v17, %s2531_s24  ;;  %958 = vrot.lane.b32.xlu1 %v953_v18, %s2530_s22  ;;  %s2873_s22 = sld [smem:[#allocation8 + $0x19]]  ;;  %v1182_v17 = vrot.slane %v1169_v3, %v2744_v59  ;;  %v1149_v18 = vrot.slane %v1136_v58, %v2744_v59  ;;  %v1211_v24 = vrot.slane %v1202_v19, %v2750_v2 }
 0x14c   : > { %v1207_v32 = vrot.slane %v1202_v19, %v2740_v56  ;;  %v1215_v40 = vrot.slane %v1202_v19, %v2744_v59 }
 0x14f   : > { %1022 = vrot.lane.b32.xlu0 %v1015_v22, %s2532_s30  ;;  %989 = vrot.lane.b32.xlu1 %v982_v23, %s2531_s24  ;;  %s2536_s24 = smov 79  }
 0x151   : > { %v1231_v12 = vstv %s2873_s22  ;;  %s2541_s22 = smov 74  }
 0x152   : > { %v1232_v20 = vmul.f32 %v1231_v12, %v2742_v57 }
 0x153   : > { %1053 = vrot.lane.b32.xlu0 %v1044_v27, %s2533_s4  ;;  %1020 = vrot.lane.b32.xlu1 %v1011_v28, %s2532_s30  ;;  %v1264_v27 = vstv %s2894_s25  ;;  %v1266_v28 = vstv %s2898_s27  ;;  %s2978_s25 = sld [smem:[#allocation8 + $0x54]]  ;;  %s2542_s27 = smov 64  }
 0x154   : > { %v1235_v26 = vadd.f32 %v1234_v21, %v1232_v20  ;;  %v1267_v35 = vmul.f32 %v1266_v28, %v2738_v52 }
 0x156   : > { %v1240_v31 = vrot.slane %v1235_v26, %v2740_v56  ;;  %v1244_v49 = vrot.slane %v1235_v26, %v2750_v2 }
 0x157   : > { %1057 = vrot.lane.b32.xlu0 %v1052_v33, %s2533_s4  ;;  %1024 = vrot.lane.b32.xlu1 %v1019_v34, %s2532_s30  ;;  %s2907_s30 = sld [smem:[#allocation8 + $0x1b]]  ;;  %v1265_v33 = vmul.f32 %v1264_v27, %v2742_v57 }
 0x159   : > { %v1268_v41 = vadd.f32 %v1267_v35, %v1265_v33 }
 0x15b   : > { %1088 = vrot.lane.b32.xlu0 %v1081_v38, %s2534_s7  ;;  %1055 = vrot.lane.b32.xlu1 %v1048_v39, %s2533_s4  ;;  %s2538_s4 = smov 77   ;;  %v1248_v39 = vrot.slane %v1235_v26, %v2744_v59  ;;  %v1277_v48 = vrot.slane %v1268_v41, %v2750_v2  ;;  %v1281_v12 = vrot.slane %v1268_v41, %v2744_v59  ;;  %v1396_v26 = vstv %s2966_s23  ;;  %s3081_s23 = sld [smem:[#allocation8 + $0x1f]] }
 0x15d   : > { %v2852_v43 = vpop.permute.xlu0 %467  ;;  %v2854_v44 = vpop.permute.xlu1 %463  ;;  %v1297_v34 = vstv %s2907_s30  ;;  %s2990_s30 = sld [smem:[#allocation8 + $0x55]] }
 0x15e   : > { %v1298_v42 = vmul.f32 %v1297_v34, %v2742_v57  ;;  %v3000_v34 = vand.u32 127, %v272_v10 }
 0x15f   : > { %1119 = vrot.lane.b32.xlu0 %v1110_v45, %s2535_s17  ;;  %1086 = vrot.lane.b32.xlu1 %v1077_v46, %s2534_s7  ;;  %v1300_v45 = vmul.f32 %v1299_v36, %v2738_v52  ;;  %v1397_v36 = vmul.f32 %v1396_v26, %v2738_v52 }
 0x161   : > { %v2866_v51 = vpop.permute.xlu0 %498  ;;  %v2868_v53 = vpop.permute.xlu1 %465  ;;  %v1301_v50 = vadd.f32 %v1300_v45, %v1298_v42 }
 0x163   : > { %1123 = vrot.lane.b32.xlu0 %v1118_v54, %s2535_s17  ;;  %1090 = vrot.lane.b32.xlu1 %v1085_v55, %s2534_s7  ;;  %s2941_s7 = sld [smem:[#allocation8 + $0x1d]]  ;;  %v1330_v54 = vstv %s2928_s8  ;;  %v1332_v55 = vstv %s2932_s20  ;;  %v1306_v61 = vrot.slane %v1301_v50, %v2740_v56  ;;  %v1314_v11 = vrot.slane %v1301_v50, %v2744_v59  ;;  %s3025_s8 = sld [smem:[#allocation8 + $0x56]] }
 0x164   : > { %v1333_v4 = vmul.f32 %v1332_v55, %v2738_v52  ;;  %v1310_v21 = vrot.slane %v1301_v50, %v2750_v2  ;;  %v275_v50 = vcvt.s32.f32 %v3000_v34  ;;  %s3047_s20 = sld [smem:[#allocation8 + $0x2a]] }
 0x165   : > { %v2878_v62 = vpop.permute.xlu0 %529  ;;  %v2880_v63 = vpop.permute.xlu1 %496 }
 0x167   : > { %1152 = vrot.lane.b32.xlu0 %v1145_v0, %s2536_s24  ;;  %1121 = vrot.lane.b32.xlu1 %v1114_v1, %s2535_s17  ;;  %s2540_s17 = smov 75   ;;  %v1273_v0 = vrot.slane %v1268_v41, %v2740_v56  ;;  %v1331_v1 = vmul.f32 %v1330_v54, %v2742_v57 }
 0x169   : > { %v2886_v6 = vpop.permute.xlu0 %533  ;;  %v2888_v7 = vpop.permute.xlu1 %500  ;;  %v1361_v3 = vstv %s2941_s7  ;;  %v1334_v13 = vadd.f32 %v1333_v4, %v1331_v1  ;;  %s2545_s7 = smov 48  }
 0x16a   : > { %v1362_v14 = vmul.f32 %v1361_v3, %v2742_v57 }
 0x16b   : > { %1183 = vrot.lane.b32.xlu0 %v1174_v8, %s2537_s26  ;;  %1150 = vrot.lane.b32.xlu1 %v1141_v9, %s2536_s24  ;;  %v1343_v20 = vrot.slane %v1334_v13, %v2750_v2  ;;  %v1347_v45 = vrot.slane %v1334_v13, %v2744_v59 }
 0x16d   : > { %v2900_v15 = vpop.permute.xlu0 %564  ;;  %v2902_v16 = vpop.permute.xlu1 %531 }
 0x16f   : > { %1187 = vrot.lane.b32.xlu0 %v1182_v17, %s2537_s26  ;;  %1154 = vrot.lane.b32.xlu1 %v1149_v18, %s2536_s24  ;;  %s2975_s24 = sld [smem:[#allocation8 + $0x23]]  ;;  %v1364_v17 = vmul.f32 %v1363_v5, %v2738_v52 }
 0x171   : > { %v2912_v22 = vpop.permute.xlu0 %595  ;;  %v2914_v23 = vpop.permute.xlu1 %562 }
 0x173   : > { %1218 = vrot.lane.b32.xlu0 %v1211_v24, %s2538_s4  ;;  %1185 = vrot.lane.b32.xlu1 %v1178_v25, %s2537_s26  ;;  %v1365_v24 = vadd.f32 %v1364_v17, %v1362_v14  ;;  %v1394_v25 = vstv %s2962_s18  ;;  %s2987_s26 = sld [smem:[#allocation8 + $0x24]]  ;;  %s2546_s18 = smov 47  }
 0x174   : > { %v1395_v33 = vmul.f32 %v1394_v25, %v2742_v57 }
 0x175   : > { %v2920_v29 = vpop.permute.xlu0 %599  ;;  %v2922_v30 = vpop.permute.xlu1 %566  ;;  %v1559_v35 = vstv %s2975_s24  ;;  %v1378_v42 = vrot.slane %v1365_v24, %v2744_v59  ;;  %v1374_v4 = vrot.slane %v1365_v24, %v2750_v2  ;;  %s2547_s24 = smov 46  }
 0x176   : > { %4025 = vst [vmem:[#allocation13_spill] sm:$0xff] %v2920_v29  ;;  %v1560_v10 = vmul.f32 %v1559_v35, %v2742_v57 }
 0x177   : > { %1249 = vrot.lane.b32.xlu0 %v1240_v31, %s2539_s15  ;;  %1216 = vrot.lane.b32.xlu1 %v1207_v32, %s2538_s4  ;;  %v1370_v31 = vrot.slane %v1365_v24, %v2740_v56  ;;  %v1339_v32 = vrot.slane %v1334_v13, %v2740_v56  ;;  %v277_v13 = vadd.f32 0.5, %v275_v50 }
 0x179   : > { %v2934_v37 = vpop.permute.xlu0 %630  ;;  %v2936_v38 = vpop.permute.xlu1 %597  ;;  %v1590_v54 = vstv %s2987_s26  ;;  %s3100_s26 = sld [smem:[#allocation8 + $0x26]] }
 0x17a   : > { %4026 = vst [vmem:[#allocation14_spill] sm:$0xff] %v2934_v37 }
 0x17b   : > { %1253 = vrot.lane.b32.xlu0 %v1248_v39, %s2539_s15  ;;  %1220 = vrot.lane.b32.xlu1 %v1215_v40, %s2538_s4  ;;  %v1561_v39 = vstv %s2978_s25  ;;  %s3020_s4 = sld [smem:[#allocation8 + $0x25]]  ;;  %s3088_s25 = sld [smem:[#allocation8 + $0x50]] }
 0x17c   : > { %v1562_v55 = vmul.f32 %v1561_v39, %v2738_v52 }
 0x17d   : > { %v2946_v46 = vpop.permute.xlu0 %661  ;;  %v2948_v47 = vpop.permute.xlu1 %628 }
 0x17e   : > { %4027 = vst [vmem:[#allocation15_spill] sm:$0xff] %v2948_v47  ;;  %v1563_v5 = vadd.f32 %v1562_v55, %v1560_v10 }
 0x17f   : > { %1284 = vrot.lane.b32.xlu0 %v1277_v48, %s2540_s17  ;;  %1251 = vrot.lane.b32.xlu1 %v1244_v49, %s2539_s15  ;;  %v3012_v48 = vadd.f32 %v1397_v36, %v1395_v33  ;;  %v3016_v49 = vadd.s32 128, %v3000_v34  ;;  %s2544_s15 = smov 62   ;;  %v1625_v33 = vstv %s3025_s8  ;;  %s3137_s8 = sld [smem:[#allocation8 + $0x5d]] }
 0x181   : > { %v2954_v58 = vpop.permute.xlu0 %665  ;;  %v2956_v60 = vpop.permute.xlu1 %632  ;;  %v1407_v3 = vrot.slane %v3012_v48, %v2750_v2  ;;  %v1403_v24 = vrot.slane %v3012_v48, %v2740_v56 }
 0x182   : > { %4028 = vst [vmem:[#allocation16_spill] sm:$0xff] %v2956_v60 }
 0x183   : > { %1315 = vrot.lane.b32.xlu0 %v1306_v61, %s2541_s22  ;;  %1282 = vrot.lane.b32.xlu1 %v1273_v0, %s2540_s17  ;;  %v1592_v61 = vstv %s2990_s30  ;;  %s2548_s30 = smov 32  }
 0x184   : > { %v1593_v14 = vmul.f32 %v1592_v61, %v2738_v52 }
 0x185   : > { %v2968_v8 = vpop.permute.xlu0 %694  ;;  %v2970_v9 = vpop.permute.xlu1 %663 }
 0x187   : > { %1319 = vrot.lane.b32.xlu0 %v1314_v11, %s2541_s22  ;;  %1286 = vrot.lane.b32.xlu1 %v1281_v12, %s2540_s17  ;;  %v1591_v11 = vmul.f32 %v1590_v54, %v2742_v57  ;;  %v276_v12 = vcvt.s32.f32 %v3016_v49  ;;  %s3060_s17 = sld [smem:[#allocation8 + $0x2b]]  ;;  %v1626_v54 = vmul.f32 %v1625_v33, %v2738_v52 }
 0x189   : > { %v2980_v18 = vpop.permute.xlu0 %725  ;;  %v2982_v19 = vpop.permute.xlu1 %692  ;;  %v1594_v25 = vadd.f32 %v1593_v14, %v1591_v11  ;;  %v278_v26 = vadd.f32 0.5, %v276_v12  ;;  %v1788_v14 = vstv %s3047_s20  ;;  %s3160_s20 = sld [smem:[#allocation8 + $0x31]] }
 0x18b   : > { %1350 = vrot.lane.b32.xlu0 %v1343_v20, %s2542_s27  ;;  %1317 = vrot.lane.b32.xlu1 %v1310_v21, %s2541_s22  ;;  %v1572_v21 = vrot.slane %v1563_v5, %v2750_v2  ;;  %v1599_v39 = vrot.slane %v1594_v25, %v2740_v56  ;;  %v280_v10 = vmul.f32 0.0625, %v278_v26  ;;  %s3063_s22 = sld [smem:[#allocation8 + $0x5c]] }
 0x18d   : > { %v2992_v27 = vpop.permute.xlu0 %729  ;;  %v2994_v28 = vpop.permute.xlu1 %696  ;;  %v282_v12 = vfloor.f32 %v280_v10 }
 0x18e   : > { %4029 = vst [vmem:[#allocation17_spill] sm:$0xff] %v2992_v27 }
 0x18f   : > { %1379 = vrot.lane.b32.xlu0 %v1370_v31, %s2543_s3  ;;  %1348 = vrot.lane.b32.xlu1 %v1339_v32, %s2542_s27  ;;  %v279_v31 = vmul.f32 0.0625, %v277_v13  ;;  %v1623_v32 = vstv %s3020_s4  ;;  %s2549_s4 = smov 31  }
 0x191   : > { %v3006_v40 = vpop.permute.xlu0 %760  ;;  %v3008_v41 = vpop.permute.xlu1 %727  ;;  %v281_v50 = vfloor.f32 %v279_v31  ;;  %v1603_v31 = vrot.slane %v1594_v25, %v2750_v2  ;;  %v1821_v10 = vstv %s3063_s22  ;;  %s3241_s22 = sld [smem:[#allocation8 + $0x27]] }
 0x192   : > { %4030 = vst [vmem:[#allocation18_spill] sm:$0xff] %v3006_v40 }
 0x193   : > { %1383 = vrot.lane.b32.xlu0 %v1378_v42, %s2543_s3  ;;  %1352 = vrot.lane.b32.xlu1 %v1347_v45, %s2542_s27  ;;  %v1568_v42 = vrot.slane %v1563_v5, %v2740_v56  ;;  %v1624_v45 = vmul.f32 %v1623_v32, %v2742_v57  ;;  %v2269_v13 = vtrunc.f32 %v281_v50  ;;  %v1789_v32 = vmul.f32 %v1788_v14, %v2742_v57  ;;  %s3105_s27 = sld [smem:[#allocation8 + $0x57]] }
 0x195   : > { %v3027_v0 = vpop.permute.xlu0 %791  ;;  %v3029_v1 = vpop.permute.xlu1 %758  ;;  %v1627_v11 = vadd.f32 %v1626_v54, %v1624_v45  ;;  %v2270_v33 = vcvt.f32.s32 %v2269_v13  ;;  %v1411_v54 = vrot.slane %v3012_v48, %v2744_v59 }
 0x196   : > { %4031 = vst [vmem:[#allocation19_spill] sm:$0xff] %v3027_v0  ;;  %4032 = vst [vmem:[#allocation20_spill] sm:$0xff] %v3029_v1 }
 0x197   : > { %1414 = vrot.lane.b32.xlu0 %v1407_v3, %s2544_s15  ;;  %1381 = vrot.lane.b32.xlu1 %v1374_v4, %s2543_s3  ;;  %v1607_v3 = vrot.slane %v1594_v25, %v2744_v59  ;;  %v1576_v4 = vrot.slane %v1563_v5, %v2744_v59  ;;  %v1632_v26 = vrot.slane %v1627_v11, %v2740_v56  ;;  %v2271_v5 = vtrunc.f32 %v282_v12  ;;  %s3128_s3 = sld [smem:[#allocation8 + $0x2c]] }
 0x198   : > { %v1640_v57 = vrot.slane %v1627_v11, %v2744_v59  ;;  %v285_v14 = vmul.u32 16, %v2270_v33 }
 0x199   : > { %v3039_v17 = vpop.permute.xlu0 %795  ;;  %v3041_v20 = vpop.permute.xlu1 %762  ;;  %v2272_v13 = vcvt.f32.s32 %v2271_v5 }
 0x19a   : > { %4033 = vst [vmem:[#allocation21_spill] sm:$0xff] %v3039_v17  ;;  %4034 = vst [vmem:[#allocation22_spill] sm:$0xff] %v3041_v20  ;;  %v3112_v5 = vsub.s32 %v3000_v34, %v285_v14 }
 0x19b   : > { %1579 = vrot.lane.b32.xlu0 %v1572_v21, %s2545_s7  ;;  %1412 = vrot.lane.b32.xlu1 %v1403_v24, %s2544_s15  ;;  %v1790_v21 = vstv %s3051_s14  ;;  %v286_v33 = vmul.u32 16, %v2272_v13  ;;  %v1656_v13 = vstv %s3100_s26  ;;  %s3211_s14 = sld [smem:[#allocation8]]  ;;  %s2551_s26 = smov 45  }
 0x19c   : > { %vm289_vm6 = vcmp.ge.s32.totalorder %v3112_v5, 3  ;;  %vm295_vm7 = vcmp.ge.s32.totalorder %v3112_v5, 2  ;;  %vm297_vm8 = vcmp.le.s32.totalorder %v3112_v5, 17  ;;  %vm291_vm11 = vcmp.le.s32.totalorder %v3112_v5, 18 }
 0x19d   : > { %v3053_v35 = vpop.permute.xlu0 %826  ;;  %v3055_v36 = vpop.permute.xlu1 %793  ;;  %v3123_v34 = vsub.s32 %v3016_v49, %v286_v33  ;;  %v1658_v49 = vstv %s3105_s27  ;;  %vm3152_vm14 = vmand %vm295_vm7, %vm297_vm8  ;;  %vm301_vm15 = vcmp.ge.s32.totalorder %v3112_v5, 1  ;;  %vm303_vm0 = vcmp.le.s32.totalorder %v3112_v5, 16  ;;  %s3266_s27 = sld [smem:[#allocation8 + $0x2d]] }
 0x19e   : > { %4035 = vst [vmem:[#allocation23_spill] sm:$0xff] %v3053_v35  ;;  %4036 = vst [vmem:[#allocation24_spill] sm:$0xff] %v3055_v36 }
 0x19f   : > { %1608 = vrot.lane.b32.xlu0 %v1599_v39, %s2546_s18  ;;  %1577 = vrot.lane.b32.xlu1 %v1568_v42, %s2545_s7  ;;  %v1819_v39 = vstv %s3060_s17  ;;  %v3084_v42 = vld [vmem:[#allocation3] sm:$0x7]  ;;  %vm296_vm12 = vcmp.ge.s32.totalorder %v3123_v34, 2  ;;  %vm298_vm13 = vcmp.le.s32.totalorder %v3123_v34, 17  ;;  %vm290_vm2 = vcmp.ge.s32.totalorder %v3123_v34, 3  ;;  %vm3174_vm4 = vmand %vm289_vm6, %vm291_vm11  ;;  %s2550_s17 = smov 61  }
 0x1a0   : > { %v1791_v45 = vmul.f32 %v3084_v42, %v1790_v21  ;;  %v1822_v21 = vmul.f32 %v3084_v42, %v1821_v10  ;;  %v1429_v10 = vstv %s3088_s25  ;;  %vm292_vm3 = vcmp.le.s32.totalorder %v3123_v34, 18  ;;  %vm3185_vm5 = vmand %vm296_vm12, %vm298_vm13  ;;  %s3258_s25 = sld [smem:[#allocation8 + $0x59]] }
 0x1a1   : > { %v3065_v55 = vpop.permute.xlu0 %857  ;;  %v3067_v61 = vpop.permute.xlu1 %824  ;;  %v1430_v14 = vmul.f32 %v3084_v42, %v1429_v10  ;;  %vm3203_vm6 = vmand %vm301_vm15, %vm303_vm0  ;;  %vm302_vm7 = vcmp.ge.s32.totalorder %v3123_v34, 1  ;;  %vm304_vm8 = vcmp.le.s32.totalorder %v3123_v34, 16  ;;  %vm308_vm12 = vcmp.ge.s32.totalorder %v3123_v34, 0 }
 0x1a2   : > { %4037 = vst [vmem:[#allocation25_spill] sm:$0xff] %v3065_v55  ;;  %4038 = vst [vmem:[#allocation26_spill] sm:$0xff] %v3067_v61  ;;  %v1852_v55 = vstv %s3128_s3  ;;  %vm309_vm13 = vcmp.le.s32.totalorder %v3112_v5, 15  ;;  %vm310_vm15 = vcmp.le.s32.totalorder %v3123_v34, 15  ;;  %vm993_vm0 = vcmask 760832   ;;  %s3272_s3 = sld [smem:[#allocation8 + $0x5f]] }
 0x1a3   : > { %1612 = vrot.lane.b32.xlu0 %v1607_v3, %s2546_s18  ;;  %1581 = vrot.lane.b32.xlu1 %v1576_v4, %s2545_s7  ;;  %v1792_v3 = vadd.f32 %v1791_v45, %v1789_v32  ;;  %v3097_v4 = vld [vmem:[#allocation2] sm:$0x7]  ;;  %v1636_v32 = vrot.slane %v1627_v11, %v2750_v2  ;;  %v1427_v45 = vstv %s3081_s23  ;;  %s3179_s7 = sld [smem:[#allocation8 + $0x51]]  ;;  %s3243_s23 = sld [smem:[#allocation8 + $0x5e]]  ;;  %vm3249_vm11 = vmand %vm302_vm7, %vm304_vm8  ;;  %vm315_vm7 = vcmp.le.s32.totalorder %v3112_v5, 14 }
 0x1a4   : > { %v1820_v12 = vmul.f32 %v3097_v4, %v1819_v39  ;;  %vm1026_vm8 = vcmask 752640  }
 0x1a5   : > { %v3073_v52 = vpop.permute.xlu0 %861  ;;  %v3075_v24 = vpop.permute.xlu1 %828  ;;  %v1797_v11 = vrot.slane %v1792_v3, %v2740_v56 }
 0x1a6   : > { %4039 = vst [vmem:[#allocation27_spill] sm:$0xff] %v3073_v52  ;;  %4040 = vst [vmem:[#allocation28_spill] sm:$0xff] %v3075_v24  ;;  %v3109_v39 = vadd.f32 %v1822_v21, %v1820_v12  ;;  %v1428_v12 = vmul.f32 %v3097_v4, %v1427_v45  ;;  %v1657_v45 = vmul.f32 %v3097_v4, %v1656_v13 }
 0x1a7   : > { %1641 = vrot.lane.b32.xlu0 %v1632_v26, %s2547_s24  ;;  %1610 = vrot.lane.b32.xlu1 %v1603_v31, %s2546_s18  ;;  %v1801_v31 = vrot.slane %v1792_v3, %v2750_v2  ;;  %v1659_v13 = vmul.f32 %v3084_v42, %v1658_v49  ;;  %s3232_s18 = sld [smem:[#allocation8 + $0x58]] }
 0x1a8   : > { %v1828_v60 = vrot.slane %v3109_v39, %v2740_v56  ;;  %v3144_v33 = vadd.f32 %v1430_v14, %v1428_v12 }
 0x1a9   : > { %v3090_v50 = vpop.permute.xlu0 %892  ;;  %v3092_v25 = vpop.permute.xlu1 %859 }
 0x1aa   : > { %4041 = vst [vmem:[#allocation29_spill] sm:$0xff] %v3092_v25 }
 0x1ab   : > { %1645 = vrot.lane.b32.xlu0 %v1640_v57, %s2547_s24  ;;  %1416 = vrot.lane.b32.xlu1 %v1411_v54, %s2544_s15  ;;  %s3139_s15 = sld [smem:[#allocation8 + $0x20]] }
 0x1ad   : > { %v922_v48 = vpop.permute.xlu0 %921  ;;  %v891_v26 = vpop.permute.xlu1 %890 }
 0x1af   : > { %1808 = vrot.lane.b32.xlu0 %v1801_v31, %s2548_s30  ;;  %1643 = vrot.lane.b32.xlu1 %v1636_v32, %s2547_s24  ;;  %v1836_v32 = vrot.slane %v3109_v39, %v2744_v59  ;;  %s3256_s24 = sld [smem:[#allocation8 + $0x52]] }
 0x1b1   : > { %v926_v57 = vpop.permute.xlu0 %925  ;;  %v895_v54 = vpop.permute.xlu1 %894 }
 0x1b3   : > { %1837 = vrot.lane.b32.xlu0 %v1828_v60, %s2549_s4  ;;  %1806 = vrot.lane.b32.xlu1 %v1797_v11, %s2548_s30  ;;  %v1805_v60 = vrot.slane %v1792_v3, %v2744_v59  ;;  %v897_v11 = vsel %vm896_vm9, %v891_v26, %v3090_v50 }
 0x1b4   : > { %v901_v49 = vsel %vm3174_vm4, %v897_v11, 0.0  ;;  %v898_v11 = vsel %vm896_vm9, %v3090_v50, %v895_v54  ;;  %vm3225_vm9 = vmand %vm290_vm2, %vm292_vm3  ;;  %v4050_v50 = vmov 0  ;;  %vm313_vm3 = vcmp.ge.s32.totalorder %v3112_v5, 4294967295 }
 0x1b5   : > { %v957_v21 = vpop.permute.xlu0 %956  ;;  %v924_v31 = vpop.permute.xlu1 %923  ;;  %v4051_v50 = vsel %vm3225_vm9, 4294967295, %v4050_v50  ;;  %vm3295_vm2 = vmand %vm308_vm12, %vm310_vm15  ;;  %vm314_vm12 = vcmp.ge.s32.totalorder %v3123_v34, 4294967295 }
 0x1b6   : > { %v928_v3 = vsel %vm927_vm10, %v922_v48, %v924_v31  ;;  %v929_v26 = vsel %vm927_vm10, %v924_v31, %v926_v57  ;;  %v1832_v57 = vrot.slane %v3109_v39, %v2750_v2  ;;  %v3197_v31 = vadd.f32 %v1659_v13, %v1657_v45  ;;  %4052 = vst [vmem:[#allocation30_spill] sm:$0xff] %v4051_v50 }
 0x1b7   : > { %v932_v12 = vsel %vm3152_vm14, %v928_v3, 0.0  ;;  %1841 = vrot.lane.b32.xlu0 %v1836_v32, %s2549_s4  ;;  %1810 = vrot.lane.b32.xlu1 %v1805_v60, %s2548_s30  ;;  %v1440_v3 = vrot.slane %v3144_v33, %v2750_v2  ;;  %v933_v39 = vsel %vm3185_vm5, %v929_v26, 0.0  ;;  %vm307_vm10 = vcmp.ge.s32.totalorder %v3112_v5, 0  ;;  %s3270_s30 = sld [smem:[#allocation8 + $0x21]] }
 0x1b8   : > { %v934_v37 = vadd.f32 %v932_v12, %v901_v49  ;;  %v1854_v12 = vstv %s3137_s8  ;;  %v1460_v13 = vstv %s3139_s15  ;;  %s3315_s8 = sld [smem:[#allocation8 + $0x28]]  ;;  %s3339_s15 = sld [smem:[#allocation8 + $0x2e]] }
 0x1b9   : > { %v3191_v32 = vpop.permute.xlu0 %987  ;;  %v955_v60 = vpop.permute.xlu1 %954  ;;  %v1855_v25 = vmul.f32 %v3084_v42, %v1854_v12 }
 0x1ba   : > { %v961_v52 = vsel %vm960_vm1, %v955_v60, %v957_v21  ;;  %v1665_v60 = vrot.slane %v3197_v31, %v2740_v56 }
 0x1bb   : > { %v965_v45 = vsel %vm3203_vm6, %v961_v52, 0.0  ;;  %1447 = vrot.lane.b32.xlu0 %v1440_v3, %s2550_s17  ;;  %1839 = vrot.lane.b32.xlu1 %v1832_v57, %s2549_s4  ;;  %v902_v52 = vsel %vm3225_vm9, %v898_v11, 0.0  ;;  %v1436_v3 = vrot.slane %v3144_v33, %v2740_v56  ;;  %v1853_v57 = vmul.f32 %v3097_v4, %v1852_v55  ;;  %s3311_s4 = sld [smem:[#allocation8 + $0x53]] }
 0x1bc   : > { %v967_v54 = vadd.f32 %v965_v45, %v934_v37  ;;  %v935_v11 = vadd.f32 %v933_v39, %v902_v52  ;;  %v1462_v52 = vstv %s3179_s7  ;;  %s3348_s7 = sld [smem:[#allocation8 + $0x5a]] }
 0x1bd   : > { %v992_v26 = vpop.permute.xlu0 %991  ;;  %v959_v49 = vpop.permute.xlu1 %958  ;;  %v1463_v61 = vmul.f32 %v3084_v42, %v1462_v52  ;;  %v1669_v52 = vrot.slane %v3197_v31, %v2750_v2 }
 0x1be   : > { %v962_v55 = vsel %vm960_vm1, %v957_v21, %v959_v49  ;;  %v427_v21 = vstv %s3160_s20  ;;  %vm3278_vm1 = vmand %vm307_vm10, %vm309_vm13  ;;  %vm316_vm13 = vcmp.le.s32.totalorder %v3123_v34, 14  ;;  %s2552_s20 = smov 30  }
 0x1bf   : > { %v966_v45 = vsel %vm3249_vm11, %v962_v55, 0.0  ;;  %1674 = vrot.lane.b32.xlu0 %v1665_v60, %s2551_s26  ;;  %1445 = vrot.lane.b32.xlu1 %v1436_v3, %s2550_s17  ;;  %v1673_v3 = vrot.slane %v3197_v31, %v2744_v59  ;;  %v3288_v55 = vadd.f32 %v1855_v25, %v1853_v57  ;;  %vm3330_vm10 = vmand %vm313_vm3, %vm315_vm7  ;;  %vm320_vm3 = vcmp.ge.s32.totalorder %v3123_v34, 4294967294 }
 0x1c0   : > { %v968_v39 = vadd.f32 %v966_v45, %v935_v11  ;;  %v1444_v11 = vrot.slane %v3144_v33, %v2744_v59  ;;  %v1461_v45 = vmul.f32 %v3097_v4, %v1460_v13  ;;  %vm3367_vm15 = vmand %vm314_vm12, %vm316_vm13  ;;  %vm321_vm7 = vcmp.le.s32.totalorder %v3112_v5, 13 }
 0x1c1   : > { %v3282_v60 = vpop.permute.xlu0 %1022  ;;  %v990_v12 = vpop.permute.xlu1 %989  ;;  %vm1059_vm12 = vcmask 744448  }
 0x1c2   : > { %v994_v33 = vsel %vm993_vm0, %v3191_v32, %v990_v12  ;;  %v995_v25 = vsel %vm993_vm0, %v990_v12, %v992_v26  ;;  %v425_v32 = vstv %s3211_s14  ;;  %v3323_v17 = vadd.f32 %v1463_v61, %v1461_v45  ;;  %s3352_s14 = sld [smem:[#allocation8 + $0x22]] }
 0x1c3   : > { %v998_v13 = vsel %vm3278_vm1, %v994_v33, 0.0  ;;  %v999_v57 = vsel %vm3295_vm2, %v995_v25, 0.0  ;;  %1678 = vrot.lane.b32.xlu0 %v1673_v3, %s2551_s26  ;;  %1449 = vrot.lane.b32.xlu1 %v1444_v11, %s2550_s17  ;;  %v1691_v33 = vstv %s3232_s18  ;;  %v423_v25 = vld [vmem:[#allocation2] sm:$0x3]  ;;  %v1865_v11 = vrot.slane %v3288_v55, %v2750_v2  ;;  %s3359_s17 = sld [smem:[#allocation8 + $0x60]]  ;;  %s3361_s18 = sld [smem:[#allocation8 + $0x61]] }
 0x1c4   : > { %v1000_v26 = vadd.f32 %v998_v13, %v967_v54  ;;  %v1001_v12 = vadd.f32 %v999_v57, %v968_v39  ;;  %v424_v54 = vld [vmem:[#allocation3] sm:$0x3]  ;;  %v4059_v39 = vmov 0  ;;  %v1689_v57 = vstv %s3241_s22  ;;  %s3376_s22 = sld [smem:[#allocation8 + $0x29]] }
 0x1c5   : > { %v3317_v35 = vpop.permute.xlu0 %1053  ;;  %v1021_v3 = vpop.permute.xlu1 %1020  ;;  %v4060_v39 = vsel %vm3330_vm10, 4294967295, %v4059_v39  ;;  %v1885_v45 = vstv %s3266_s27  ;;  %v428_v20 = vmul.f32 %v427_v21, %v424_v54  ;;  %vm319_vm0 = vcmp.ge.s32.totalorder %v3112_v5, 4294967294  ;;  %s3388_s27 = sld [smem:[#allocation8 + $0x2f]] }
 0x1c6   : > { %v1027_v13 = vsel %vm1026_vm8, %v1021_v3, %v3282_v60  ;;  %v426_v3 = vmul.f32 %v425_v32, %v423_v25  ;;  %v1692_v25 = vmul.f32 %v3084_v42, %v1691_v33 }
 0x1c7   : > { %v1031_v61 = vsel %vm3330_vm10, %v1027_v13, 0.0  ;;  %1872 = vrot.lane.b32.xlu0 %v1865_v11, %s2552_s20  ;;  %1676 = vrot.lane.b32.xlu1 %v1669_v52, %s2551_s26  ;;  %v1469_v13 = vrot.slane %v3323_v17, %v2740_v56  ;;  %v1861_v11 = vrot.slane %v3288_v55, %v2740_v56  ;;  %v1690_v52 = vmul.f32 %v3097_v4, %v1689_v57  ;;  %s2553_s26 = smov 60  }
 0x1c8   : > { %v1033_v31 = vadd.f32 %v1031_v61, %v1000_v26  ;;  %vm322_vm10 = vcmp.le.s32.totalorder %v3123_v34, 13  ;;  %v3384_v54 = vadd.f32 %v428_v20, %v426_v3  ;;  %v1722_v61 = vstv %s3315_s8  ;;  %s3405_s8 = sld [smem:[#allocation8 + $0x30]] }
 0x1c9   : > { %v1058_v1 = vpop.permute.xlu0 %1057  ;;  %v1025_v40 = vpop.permute.xlu1 %1024  ;;  %v1477_v20 = vrot.slane %v3323_v17, %v2744_v59  ;;  %v3402_v33 = vadd.f32 %v1692_v25, %v1690_v52  ;;  %v1886_v3 = vmul.f32 %v3097_v4, %v1885_v45  ;;  %vm3411_vm13 = vmand %vm320_vm3, %vm322_vm10  ;;  %vm1092_vm10 = vcmask 736256  }
 0x1ca   : > { %v1028_v32 = vsel %vm1026_vm8, %v3282_v60, %v1025_v40  ;;  %vm3394_vm8 = vmand %vm319_vm0, %vm321_vm7  ;;  %v4063_v60 = vmov 0  ;;  %vm325_vm0 = vcmp.ge.s32.totalorder %v3112_v5, 4294967293  ;;  %vm327_vm7 = vcmp.le.s32.totalorder %v3112_v5, 12 }
 0x1cb   : > { %v1032_v26 = vsel %vm3367_vm15, %v1028_v32, 0.0  ;;  %1478 = vrot.lane.b32.xlu0 %v1469_v13, %s2553_s26  ;;  %1870 = vrot.lane.b32.xlu1 %v1861_v11, %s2552_s20  ;;  %v4064_v60 = vsel %vm3394_vm8, 4294967295, %v4063_v60  ;;  %v4066_v32 = vmov 0  ;;  %v4069_v25 = vstv %s3243_s23  ;;  %vm3442_vm3 = vmand %vm325_vm0, %vm327_vm7  ;;  %s2554_s23 = smov 44  }
 0x1cc   : > { %v1034_v57 = vadd.f32 %v1032_v26, %v1001_v12  ;;  %4065 = vst [vmem:[#allocation31_spill] sm:$0xff] %v4064_v60  ;;  %v1869_v12 = vrot.slane %v3288_v55, %v2744_v59  ;;  %v4067_v32 = vsel %vm3411_vm13, 4294967295, %v4066_v32  ;;  %vm502_vm0 = vcmask 1031168  }
 0x1cd   : > { %v1089_v13 = vpop.permute.xlu0 %1088  ;;  %v1056_v11 = vpop.permute.xlu1 %1055  ;;  %4068 = vst [vmem:[#allocation32_spill] sm:$0xff] %v4067_v32  ;;  %v4086_v27 = vstv %s3359_s17  ;;  %s173_s17 = scalar_lea.vmem [#allocation9], %s2160_s6 }
 0x1ce   : > { %v1060_v55 = vsel %vm1059_vm12, %v3317_v35, %v1056_v11  ;;  %v1061_v45 = vsel %vm1059_vm12, %v1056_v11, %v1058_v1  ;;  %v1888_v35 = vmul.f32 %v3084_v42, %v4069_v25  ;;  %v1918_v11 = vstv %s3339_s15  ;;  %s2560_s15 = smov 42  }
 0x1cf   : > { %v1064_v52 = vsel %vm3394_vm8, %v1060_v55, 0.0  ;;  %v1065_v26 = vsel %vm3411_vm13, %v1061_v45, 0.0  ;;  %1482 = vrot.lane.b32.xlu0 %v1477_v20, %s2553_s26  ;;  %1874 = vrot.lane.b32.xlu1 %v1869_v12, %s2552_s20  ;;  %v1702_v45 = vrot.slane %v3402_v33, %v2750_v2  ;;  %v1473_v20 = vrot.slane %v3323_v17, %v2750_v2  ;;  %s2561_s20 = smov 27  }
 0x1d0   : > { %v1066_v40 = vadd.f32 %v1064_v52, %v1033_v31  ;;  %v1067_v1 = vadd.f32 %v1065_v26, %v1034_v57  ;;  %v3435_v32 = vadd.f32 %v1888_v35, %v1886_v3  ;;  %v1526_v12 = vstv %s3352_s14  ;;  %s2268_s14 = sshll.u32 %s2600_s13, 7  ;;  %s2563_s13 = smov [#allocation9]  }
 0x1d1   : > { %v1120_v36 = vpop.permute.xlu0 %1119  ;;  %v1087_v55 = vpop.permute.xlu1 %1086  ;;  %v4070_v31 = vmov 0  ;;  %v1755_v52 = vstv %s3376_s22  ;;  %v434_v17 = vrot.slane %v3384_v54, %v2740_v56  ;;  %vm326_vm12 = vcmp.ge.s32.totalorder %v3123_v34, 4294967293  ;;  %s2442_s6 = sshll.u32 %s2563_s13, 4  ;;  %s2443_s6 = int_to_ptr.vmem [resolvable:$false] %s2442_s6 }
 0x1d2   : > { %v4071_v31 = vsel %vm3442_vm3, 4294967295, %v4070_v31  ;;  %v1093_v57 = vsel %vm1092_vm10, %v1087_v55, %v1089_v13  ;;  %vm328_vm13 = vcmp.le.s32.totalorder %v3123_v34, 12  ;;  %v438_v3 = vrot.slane %v3384_v54, %v2750_v2 }
 0x1d3   : > { %4072 = vst [vmem:[#allocation33_spill] sm:$0xff] %v4071_v31  ;;  %v1097_v5 = vsel %vm3442_vm3, %v1093_v57, 0.0  ;;  %1709 = vrot.lane.b32.xlu0 %v1702_v45, %s2554_s23  ;;  %1480 = vrot.lane.b32.xlu1 %v1473_v20, %s2553_s26  ;;  %v4074_v55 = vstv %s3270_s30  ;;  %v1894_v57 = vrot.slane %v3435_v32, %v2740_v56  ;;  %v1698_v45 = vrot.slane %v3402_v33, %v2740_v56  ;;  %vm3476_vm7 = vmand %vm326_vm12, %vm328_vm13  ;;  %s2555_s30 = smov 29  }
 0x1d4   : > { %v3460_v35 = vadd.f32 %v1097_v5, %v1066_v40  ;;  %v1494_v25 = vmul.f32 %v3097_v4, %v4074_v55  ;;  %v1723_v20 = vmul.f32 %v3097_v4, %v1722_v61  ;;  %v4075_v54 = vmov 0 }
 0x1d5   : > { %v1124_v0 = vpop.permute.xlu0 %1123  ;;  %v1091_v60 = vpop.permute.xlu1 %1090  ;;  %v4076_v54 = vsel %vm3476_vm7, 4294967295, %v4075_v54  ;;  %v4078_v5 = vstv %s3256_s24  ;;  %v1919_v26 = vmul.f32 %v3097_v4, %v1918_v11  ;;  %v3487_v61 = vsel %vm3174_vm4, %v434_v17, 0.0  ;;  %s2556_s24 = smov 59  }
 0x1d6   : > { %4073 = vst [vmem:[#allocation34_spill] sm:$0xff] %v3460_v35  ;;  %4077 = vst [vmem:[#allocation35_spill] sm:$0xff] %v4076_v54  ;;  %v1094_v40 = vsel %vm1092_vm10, %v1089_v13, %v1091_v60  ;;  %v1496_v55 = vmul.f32 %v3084_v42, %v4078_v5  ;;  %vm1125_vm13 = vcmask 654336   ;;  %v4079_v60 = vstv %s3258_s25  ;;  %s2557_s25 = smov 43  }
 0x1d7   : > { %v1098_v34 = vsel %vm3476_vm7, %v1094_v40, 0.0  ;;  %1903 = vrot.lane.b32.xlu0 %v1894_v57, %s2555_s30  ;;  %1707 = vrot.lane.b32.xlu1 %v1698_v45, %s2554_s23  ;;  %v1725_v13 = vmul.f32 %v3084_v42, %v4079_v60  ;;  %v3498_v11 = vsel %vm3225_vm9, %v438_v3, 0.0  ;;  %v4081_v31 = vstv %s3272_s3  ;;  %s2558_s3 = smov 28  }
 0x1d8   : > { %v3500_v5 = vadd.f32 %v1098_v34, %v1067_v1  ;;  %v3502_v17 = vadd.f32 %v1496_v55, %v1494_v25  ;;  %v1921_v40 = vmul.f32 %v3084_v42, %v4081_v31  ;;  %v1902_v45 = vrot.slane %v3435_v32, %v2744_v59 }
 0x1d9   : > { %v1153_v35 = vpop.permute.xlu0 %1152  ;;  %v1122_v57 = vpop.permute.xlu1 %1121  ;;  %v1706_v60 = vrot.slane %v3402_v33, %v2744_v59  ;;  %v3511_v54 = vadd.f32 %v1725_v13, %v1723_v20  ;;  %v1527_v3 = vmul.f32 %v3097_v4, %v1526_v12  ;;  %vm1156_vm12 = vcmask 646144  }
 0x1da   : > { %4080 = vst [vmem:[#allocation36_spill] sm:$0xff] %v3500_v5  ;;  %v1126_v1 = vsel %vm1125_vm13, %v1120_v36, %v1122_v57  ;;  %v1127_v25 = vsel %vm1125_vm13, %v1122_v57, %v1124_v0  ;;  %v3514_v55 = vadd.f32 %v1921_v40, %v1919_v26  ;;  %v4082_v33 = vstv %s3311_s4  ;;  %s2559_s4 = smov 58  }
 0x1db   : > { %v1130_v31 = vsel %vm3174_vm4, %v1126_v1, 0.0  ;;  %v1131_v34 = vsel %vm3225_vm9, %v1127_v25, 0.0  ;;  %1907 = vrot.lane.b32.xlu0 %v1902_v45, %s2555_s30  ;;  %1711 = vrot.lane.b32.xlu1 %v1706_v60, %s2554_s23  ;;  %v1529_v12 = vmul.f32 %v3084_v42, %v4082_v33  ;;  %v1506_v0 = vrot.slane %v3502_v17, %v2750_v2 }
 0x1dc   : > { %v1898_v36 = vrot.slane %v3435_v32, %v2750_v2  ;;  %v1756_v26 = vmul.f32 %v3097_v4, %v1755_v52  ;;  %v1731_v40 = vrot.slane %v3511_v54, %v2740_v56  ;;  %v1502_v57 = vrot.slane %v3502_v17, %v2740_v56 }
 0x1dd   : > { %v1184_v20 = vpop.permute.xlu0 %1183  ;;  %v1151_v13 = vpop.permute.xlu1 %1150  ;;  %v1510_v45 = vrot.slane %v3502_v17, %v2744_v59  ;;  %v3536_v60 = vadd.f32 %v1529_v12, %v1527_v3  ;;  %v1739_v32 = vrot.slane %v3511_v54, %v2744_v59  ;;  %v4083_v25 = vstv %s3348_s7  ;;  %s2562_s7 = smov 26  }
 0x1de   : > { %v1157_v1 = vsel %vm1156_vm12, %v1151_v13, %v1153_v35  ;;  %v1758_v33 = vmul.f32 %v3084_v42, %v4083_v25  ;;  %vm4084_vm13 = vcmask 1039360   ;;  %v1954_v3 = vmul.f32 %v3084_v42, %v4086_v27 }
 0x1df   : > { %v470_v5 = vsel %vm4084_vm13, %v2854_v44, %v2868_v53  ;;  %v1161_v17 = vsel %vm3152_vm14, %v1157_v1, 0.0  ;;  %1513 = vrot.lane.b32.xlu0 %v1506_v0, %s2556_s24  ;;  %1905 = vrot.lane.b32.xlu1 %v1898_v36, %s2555_s30  ;;  %v1935_v44 = vrot.slane %v3514_v55, %v2744_v59  ;;  %v4085_v1 = vstv %s3388_s27  ;;  %s3935_s27 = scalar_lea.hbm %s3981_s2, %s2268_s14 }
 0x1e0   : > { %v1163_v13 = vadd.f32 %v1161_v17, %v1130_v31  ;;  %v3559_v25 = vadd.f32 %v1758_v33, %v1756_v26  ;;  %v1952_v52 = vmul.f32 %v3097_v4, %v4085_v1  ;;  %v1535_v36 = vrot.slane %v3536_v60, %v2740_v56 }
 0x1e1   : > { %v1188_v29 = vpop.permute.xlu0 %1187  ;;  %v1155_v0 = vpop.permute.xlu1 %1154  ;;  %v4087_v50 = vstv %s3405_s8  ;;  %v4088_v31 = vstv %s3361_s18  ;;  %v471_v26 = vsel %vm4084_vm13, %v2868_v53, %v2852_v43  ;;  %v474_v33 = vsel %vm3152_vm14, %v470_v5, 0.0  ;;  %s2070_s18 = sshll.u32 %s173_s17, 4  ;;  %s2056_s8 = scalar_lea.sflag [#allocation6], %s2711_s5  ;;  %s3937_s18 = int_to_ptr.vmem [resolvable:$true] %s2070_s18 }
 0x1e2   : > { %v1985_v12 = vmul.f32 %v3097_v4, %v4087_v50  ;;  %v1987_v17 = vmul.f32 %v3084_v42, %v4088_v31  ;;  %v503_v1 = vsel %vm502_vm0, %v2880_v63, %v2866_v51  ;;  %v1158_v27 = vsel %vm1156_vm12, %v1153_v35, %v1155_v0  ;;  %s2438_s23 = scalar_lea.vmem %s3937_s18, 128  ;;  %p2445_p0 = scmp.lt.s32.totalorder %s3937_s18, %s2443_s6 }
 0x1e3   : > { %v1162_v4 = vsel %vm3185_vm5, %v1158_v27, 0.0  ;;  %1740 = vrot.lane.b32.xlu0 %v1731_v40, %s2557_s25  ;;  %1511 = vrot.lane.b32.xlu1 %v1502_v57, %s2556_s24  ;;  %vm1189_vm7 = vcmask 637952   ;;  %v1543_v43 = vrot.slane %v3536_v60, %v2744_v59  ;;  %v1539_v53 = vrot.slane %v3536_v60, %v2750_v2  ;;  %p2439_p9 = scmp.ne.s32.totalorder %s3937_s18, %s2438_s23 }
 0x1e4   : > { %v504_v63 = vsel %vm502_vm0, %v2866_v51, %v2888_v7  ;;  %v1164_v42 = vadd.f32 %v1162_v4, %v1131_v34  ;;  %v1768_v50 = vrot.slane %v3559_v25, %v2750_v2  ;;  %v3597_v35 = vadd.f32 %v1954_v3, %v1952_v52 }
 0x1e5   : > { %v475_v5 = vsel %vm3185_vm5, %v471_v26, 0.0  ;;  %v476_v40 = vadd.f32 %v474_v33, %v3487_v61  ;;  %v507_v57 = vsel %vm3203_vm6, %v503_v1, 0.0  ;;  %vm4089_vm10 = vcmask 1022976   ;;  %v1219_v7 = vpop.permute.xlu0 %1218  ;;  %v1186_v0 = vpop.permute.xlu1 %1185  ;;  %p2440_p13 = pnand %p2439_p9, %p4142_p11 }
 0x1e6   : > { %v536_v51 = vsel %vm4089_vm10, %v2878_v62, %v2902_v16  ;;  %vm4090_vm0 = vmmov %vm4089_vm10  ;;  %v1190_v52 = vsel %vm1189_vm7, %v1184_v20, %v1186_v0  ;;  %v1191_v3 = vsel %vm1189_vm7, %v1186_v0, %v1188_v29  ;;  %vm4008_vm12 = vcmask 629760  }
 0x1e7   : > { %v537_v34 = vsel %vm4090_vm0, %v2902_v16, %v2886_v6  ;;  %v508_v61 = vsel %vm3249_vm11, %v504_v63, 0.0  ;;  %vm4091_vm3 = vcmask 1014784   ;;  %v1194_v62 = vsel %vm3203_vm6, %v1190_v52, 0.0  ;;  %1744 = vrot.lane.b32.xlu0 %v1739_v32, %s2557_s25  ;;  %1515 = vrot.lane.b32.xlu1 %v1510_v45, %s2556_s24  ;;  %p2441_p7 = pneg %p2440_p13 }
 0x1e8   : > { %v569_v31 = vsel %vm4091_vm3, %v2914_v23, %v2900_v15  ;;  %v1195_v26 = vsel %vm3249_vm11, %v1191_v3, 0.0  ;;  %v477_v6 = vadd.f32 %v475_v5, %v3498_v11  ;;  %v540_v16 = vsel %vm3278_vm1, %v536_v51, 0.0 }
 0x1e9   : > { %v1196_v29 = vadd.f32 %v1194_v62, %v1163_v13  ;;  %v1197_v20 = vadd.f32 %v1195_v26, %v1164_v42  ;;  %v509_v33 = vadd.f32 %v507_v57, %v476_v40  ;;  %v541_v23 = vsel %vm3295_vm2, %v537_v34, 0.0  ;;  %v1250_v1 = vpop.permute.xlu0 %1249  ;;  %v1217_v27 = vpop.permute.xlu1 %1216  ;;  %v4105_v26 = vld [vmem:[#allocation17_spill] sm:$0xff] }
 0x1ea   : > { %v1764_v4 = vrot.slane %v3559_v25, %v2740_v56  ;;  %v1772_v45 = vrot.slane %v3559_v25, %v2744_v59  ;;  %v510_v32 = vadd.f32 %v508_v61, %v477_v6  ;;  %vm4092_vm3 = vnez %v4060_v39 }
 0x1eb   : > { %v573_v11 = vsel %vm4092_vm3, %v569_v31, 0.0  ;;  %v1223_v13 = vsel %vm4008_vm12, %v1217_v27, %v1219_v7  ;;  %v3635_v63 = vadd.f32 %v1987_v17, %v1985_v12  ;;  %v542_v42 = vadd.f32 %v540_v16, %v509_v33  ;;  %v4108_v27 = vld [vmem:[#allocation18_spill] sm:$0xff] }
 0x1ec   : > { %vm4093_vm0 = vcmask 908288   ;;  %v1227_v57 = vsel %vm3278_vm1, %v1223_v13, 0.0  ;;  %v4095_v51 = vrot.slane %v3514_v55, %v2750_v2  ;;  %v4096_v12 = vrot.slane %v3511_v54, %v2750_v2 }
 0x1ed   : > { %v699_v5 = vsel %vm4093_vm0, %v2982_v19, %v2968_v8  ;;  %vm4094_vm7 = vmmov %vm4093_vm0  ;;  %v3653_v17 = vadd.f32 %v541_v23, %v510_v32  ;;  %vm4097_vm0 = vcmask 1014784   ;;  %v1229_v19 = vadd.f32 %v1227_v57, %v1196_v29  ;;  %v1254_v52 = vpop.permute.xlu0 %1253  ;;  %v1221_v3 = vpop.permute.xlu1 %1220  ;;  %v4107_v29 = vld [vmem:[#allocation13_spill] sm:$0xff]  ;;  %v4109_v32 = vld [vmem:[#allocation20_spill] sm:$0xff] }
 0x1ee   : > { %v700_v40 = vsel %vm4094_vm7, %v2968_v8, %v2994_v28  ;;  %1938 = vrot.lane.b32.xlu0 %v4095_v51, %s2558_s3  ;;  %1742 = vrot.lane.b32.xlu1 %v4096_v12, %s2557_s25  ;;  %v3658_v8 = vsel %vm4097_vm0, %v2900_v15, %v2922_v30  ;;  %v1960_v28 = vrot.slane %v3597_v35, %v2740_v56  ;;  %vm4098_vm10 = vcmask 916480   ;;  %v4113_v51 = vld [vmem:[#allocation24_spill] sm:$0xff]  ;;  %v4114_v12 = vld [vmem:[#allocation19_spill] sm:$0xff] }
 0x1ef   : > { %v3662_v0 = vadd.f32 %v573_v11, %v542_v42  ;;  %v668_v34 = vsel %vm4098_vm10, %v2946_v46, %v2970_v9  ;;  %vm4099_vm13 = vmmov %vm4098_vm10  ;;  %vm1255_vm12 = vcmask 621568   ;;  %vm634_vm0 = vcmask 998400  }
 0x1f0   : > { %v669_v54 = vsel %vm4099_vm13, %v2970_v9, %v2954_v58  ;;  %v703_v15 = vsel %vm3152_vm14, %v699_v5, 0.0  ;;  %v704_v30 = vsel %vm3185_vm5, %v700_v40, 0.0  ;;  %vm4100_vm7 = vcmask 629760   ;;  %v4111_v40 = vld [vmem:[#allocation22_spill] sm:$0xff] }
 0x1f1   : > { %v1224_v61 = vsel %vm4100_vm7, %v1219_v7, %v1221_v3  ;;  %vm1288_vm8 = vcmask 613376   ;;  %v574_v46 = vsel %vm3367_vm15, %v3658_v8, 0.0  ;;  %vm4101_vm13 = vcmask 1006592   ;;  %v1285_v13 = vpop.permute.xlu0 %1284  ;;  %v1252_v42 = vpop.permute.xlu1 %1251 }
 0x1f2   : > { %v3681_v58 = vsel %vm4101_vm13, %v2912_v22, %v2936_v38  ;;  %vm4102_vm10 = vcmask 900096   ;;  %v1228_v31 = vsel %vm3295_vm2, %v1224_v61, 0.0  ;;  %1544 = vrot.lane.b32.xlu0 %v1535_v36, %s2559_s4  ;;  %v4103_v7 = vrot.slane %v3514_v55, %v2740_v56  ;;  %v4121_v55 = vld [vmem:[#allocation26_spill] sm:$0xff] }
 0x1f3   : > { %v732_v9 = vsel %vm4102_vm10, %v2980_v18, %v3008_v41  ;;  %v672_v22 = vsel %vm3174_vm4, %v668_v34, 0.0  ;;  %v673_v18 = vsel %vm3225_vm9, %v669_v54, 0.0  ;;  %vm4106_vm7 = vmmov %vm4102_vm10  ;;  %v1230_v16 = vadd.f32 %v1228_v31, %v1197_v20 }
 0x1f4   : > { %1936 = vrot.lane.b32.xlu1 %v4103_v7, %s2558_s3  ;;  %v733_v6 = vsel %vm4106_vm7, %v3008_v41, %v4105_v26  ;;  %v3706_v36 = vsel %vm4101_vm13, %v2936_v38, %v4107_v29  ;;  %v705_v33 = vadd.f32 %v703_v15, %v672_v22  ;;  %v706_v23 = vadd.f32 %v704_v30, %v673_v18  ;;  %v4120_v22 = vld [vmem:[#allocation23_spill] sm:$0xff] }
 0x1f5   : > { %vm4110_vm10 = vcmask 891904   ;;  %v736_v5 = vsel %vm3203_vm6, %v732_v9, 0.0  ;;  %v1256_v20 = vsel %vm1255_vm12, %v1250_v1, %v1252_v42  ;;  %v1257_v38 = vsel %vm1255_vm12, %v1252_v42, %v1254_v52  ;;  %v4116_v52 = vld [vmem:[#allocation21_spill] sm:$0xff]  ;;  %v4118_v9 = vld [vmem:[#allocation31_spill] sm:$0xff]  ;;  %v1316_v18 = vpop.permute.xlu0 %1315  ;;  %v1283_v26 = vpop.permute.xlu1 %1282 }
 0x1f6   : > { %v765_v11 = vsel %vm4110_vm10, %v4109_v32, %v4108_v27  ;;  %vm4112_vm7 = vmmov %vm4110_vm10  ;;  %v737_v57 = vsel %vm3249_vm11, %v733_v6, 0.0  ;;  %vm4115_vm13 = vcmask 883712   ;;  %v1260_v54 = vsel %vm4092_vm3, %v1256_v20, 0.0  ;;  %1548 = vrot.lane.b32.xlu0 %v1543_v43, %s2559_s4  ;;  %v4125_v32 = vld [vmem:[#allocation29_spill] sm:$0xff] }
 0x1f7   : > { %v766_v41 = vsel %vm4112_vm7, %v4108_v27, %v4111_v40  ;;  %v798_v34 = vsel %vm4115_vm13, %v4114_v12, %v4113_v51  ;;  %v1261_v3 = vsel %vm3367_vm15, %v1257_v38, 0.0  ;;  %v769_v1 = vsel %vm3278_vm1, %v765_v11, 0.0  ;;  %vm4117_vm12 = vmmov %vm4115_vm13  ;;  %v4126_v11 = vld [vmem:[#allocation25_spill] sm:$0xff]  ;;  %v4132_v12 = vld [vmem:[#allocation14_spill] sm:$0xff] }
 0x1f8   : > { %1940 = vrot.lane.b32.xlu1 %v1935_v44, %s2558_s3  ;;  %v799_v15 = vsel %vm4117_vm12, %v4113_v51, %v4116_v52  ;;  %v1262_v30 = vadd.f32 %v1260_v54, %v1229_v19  ;;  %v1263_v61 = vadd.f32 %v1261_v3, %v1230_v16  ;;  %vm4119_vm10 = vnez %v4118_v9  ;;  %v4123_v19 = vld [vmem:[#allocation28_spill] sm:$0xff] }
 0x1f9   : > { %v606_v31 = vsel %vm4119_vm10, %v3681_v58, 0.0  ;;  %v738_v7 = vadd.f32 %v736_v5, %v705_v33  ;;  %v770_v43 = vsel %vm3295_vm2, %v766_v41, 0.0  ;;  %vm4122_vm7 = vcmask 875520   ;;  %v4128_v41 = vld [vmem:[#allocation27_spill] sm:$0xff]  ;;  %v1287_v3 = vpop.permute.xlu1 %1286 }
 0x1fa   : > { %v831_v44 = vsel %vm4122_vm7, %v4121_v55, %v4120_v22  ;;  %v739_v6 = vadd.f32 %v737_v57, %v706_v23  ;;  %v802_v29 = vsel %vm4092_vm3, %v798_v34, 0.0  ;;  %vm4124_vm13 = vmmov %vm4122_vm7  ;;  %v1289_v58 = vsel %vm1288_vm8, %v1283_v26, %v1285_v13  ;;  %1775 = vrot.lane.b32.xlu0 %v1768_v50, %s2560_s15  ;;  %v4130_v57 = vld [vmem:[#allocation32_spill] sm:$0xff]  ;;  %v4133_v50 = vld [vmem:[#allocation15_spill] sm:$0xff] }
 0x1fb   : > { %v832_v16 = vsel %vm4124_vm13, %v4120_v22, %v4123_v19  ;;  %v771_v33 = vadd.f32 %v769_v1, %v738_v7  ;;  %v803_v27 = vsel %vm3367_vm15, %v799_v15, 0.0  ;;  %vm4127_vm12 = vcmask 867328   ;;  %v4134_v1 = vld [vmem:[#allocation16_spill] sm:$0xff]  ;;  %v4137_v22 = vld [vmem:[#allocation35_spill] sm:$0xff] }
 0x1fc   : > { %v864_v42 = vsel %vm4127_vm12, %v4126_v11, %v4125_v32  ;;  %v1293_v23 = vsel %vm4119_vm10, %v1289_v58, 0.0  ;;  %1546 = vrot.lane.b32.xlu1 %v1539_v53, %s2559_s4  ;;  %v772_v5 = vadd.f32 %v770_v43, %v739_v6  ;;  %v835_v40 = vsel %vm4119_vm10, %v831_v44, 0.0  ;;  %vm4129_vm7 = vmmov %vm4127_vm12  ;;  %v1320_v53 = vpop.permute.xlu0 %1319 }
 0x1fd   : > { %v865_v20 = vsel %vm4129_vm7, %v4125_v32, %v4128_v41  ;;  %v1295_v38 = vadd.f32 %v1293_v23, %v1262_v30  ;;  %vm4131_vm13 = vnez %v4130_v57  ;;  %v635_v34 = vsel %vm634_vm0, %v4133_v50, %v4132_v12  ;;  %v4135_v30 = vld [vmem:[#allocation33_spill] sm:$0xff]  ;;  %v4140_v50 = vld [vmem:[#allocation36_spill] sm:$0xff] }
 0x1fe   : > { %v607_v51 = vsel %vm4131_vm13, %v3706_v36, 0.0  ;;  %v804_v54 = vadd.f32 %v802_v29, %v771_v33  ;;  %v836_v60 = vsel %vm4131_vm13, %v832_v16, 0.0  ;;  %v636_v52 = vsel %vm634_vm0, %v4132_v12, %v4134_v1  ;;  %1969 = vrot.lane.b32.xlu0 %v1960_v28, %s2561_s20 }
 0x1ff   : > { %v805_v15 = vadd.f32 %v803_v27, %v772_v5  ;;  %vm4136_vm12 = vnez %v4135_v30  ;;  %v1290_v36 = vsel %vm1288_vm8, %v1285_v13, %v1287_v3  ;;  %vm4138_vm7 = vnez %v4137_v22 }
 0x200   : > { %v868_v7 = vsel %vm4136_vm12, %v864_v42, 0.0  ;;  %v837_v43 = vadd.f32 %v835_v40, %v804_v54  ;;  %v869_v55 = vsel %vm4138_vm7, %v865_v20, 0.0  ;;  %v1294_v44 = vsel %vm4131_vm13, %v1290_v36, 0.0  ;;  %1773 = vrot.lane.b32.xlu1 %v1764_v4, %s2560_s15  ;;  %v1351_v58 = vpop.permute.xlu0 %1350  ;;  %v1318_v4 = vpop.permute.xlu1 %1317 }
 0x201   : > { %vm1321_vm0 = vcmask 605184   ;;  %v576_v13 = vadd.f32 %v574_v46, %v3653_v17  ;;  %v639_v26 = vsel %vm4136_vm12, %v635_v34, 0.0  ;;  %v838_v6 = vadd.f32 %v836_v60, %v805_v15 }
 0x202   : > { %v1296_v29 = vadd.f32 %v1294_v44, %v1263_v61  ;;  %v608_v19 = vadd.f32 %v606_v31, %v3662_v0  ;;  %v640_v28 = vsel %vm4138_vm7, %v636_v52, 0.0  ;;  %v870_v16 = vadd.f32 %v868_v7, %v837_v43 }
 0x203   : > { %v1968_v33 = vrot.slane %v3597_v35, %v2744_v59  ;;  %v609_v27 = vadd.f32 %v607_v51, %v576_v13  ;;  %v871_v32 = vadd.f32 %v869_v55, %v838_v6  ;;  %v1322_v8 = vsel %vm1321_vm0, %v1316_v18, %v1318_v4  ;;  %v4139_v51 = vld [vmem:[#allocation34_spill] sm:$0xff] }
 0x204   : > { %v1323_v17 = vsel %vm1321_vm0, %v1318_v4, %v1320_v53  ;;  %v641_v46 = vadd.f32 %v639_v26, %v608_v19  ;;  %v1326_v11 = vsel %vm4136_vm12, %v1322_v8, 0.0  ;;  %1777 = vrot.lane.b32.xlu1 %v1772_v45, %s2560_s15  ;;  %vm1354_vm8 = vcmask 523264   ;;  %v1380_v23 = vpop.permute.xlu0 %1379  ;;  %v1349_v5 = vpop.permute.xlu1 %1348 }
 0x205   : > { %v1327_v0 = vsel %vm4138_vm7, %v1323_v17, 0.0  ;;  %1973 = vrot.lane.b32.xlu0 %v1968_v33, %s2561_s20  ;;  %v642_v61 = vadd.f32 %v640_v28, %v609_v27  ;;  %v1328_v31 = vadd.f32 %v1326_v11, %v1295_v38  ;;  %v1997_v40 = vrot.slane %v3635_v63, %v2750_v2 }
 0x206   : > { %v1329_v42 = vadd.f32 %v1327_v0, %v1296_v29  ;;  %v2017_v18 = vadd.f32 %v870_v16, %v641_v46  ;;  %v1964_v41 = vrot.slane %v3597_v35, %v2750_v2  ;;  %v1355_v25 = vsel %vm1354_vm8, %v1349_v5, %v1351_v58 }
 0x207   : > { %v2018_v20 = vadd.f32 %v871_v32, %v642_v61  ;;  %v2019_v12 = vadd.f32 %v1328_v31, %v4139_v51  ;;  %v1359_v45 = vsel %vm3174_vm4, %v1355_v25, 0.0  ;;  %v1993_v35 = vrot.slane %v3635_v63, %v2740_v56 }
 0x208   : > { %v2020_v34 = vadd.f32 %v1329_v42, %v4140_v50  ;;  %1971 = vrot.lane.b32.xlu1 %v1964_v41, %s2561_s20  ;;  %v1384_v60 = vpop.permute.xlu0 %1383  ;;  %v1353_v2 = vpop.permute.xlu1 %1352  ;;  %vm1385_vm0 = vcmask 515072   ;;  %v2001_v15 = vrot.slane %v3635_v63, %v2744_v59  ;;  %vm1583_vm7 = vcmask 392192  }
 0x209   : > { %2004 = vrot.lane.b32.xlu0 %v1997_v40, %s2562_s7  ;;  %v3831_v38 = vadd.f32 %v2019_v12, %v2017_v18  ;;  %v1356_v53 = vsel %vm1354_vm8, %v1351_v58, %v1353_v2  ;;  %vm1418_vm8 = vcmask 506880  }
 0x20a   : > { %v3833_v54 = vadd.f32 %v2020_v34, %v2018_v20  ;;  %v1360_v3 = vsel %vm3225_vm9, %v1356_v53, 0.0 }
 0x20c   : > { %2002 = vrot.lane.b32.xlu1 %v1993_v35, %s2562_s7  ;;  %v1415_v1 = vpop.permute.xlu0 %1414  ;;  %v1382_v52 = vpop.permute.xlu1 %1381 }
 0x20d   : > { %v1386_v7 = vsel %vm1385_vm0, %v1380_v23, %v1382_v52  ;;  %v1387_v36 = vsel %vm1385_vm0, %v1382_v52, %v1384_v60  ;;  %vm1614_vm0 = vcmask 384000  }
 0x20e   : > { %v1390_v43 = vsel %vm3152_vm14, %v1386_v7, 0.0  ;;  %v1391_v55 = vsel %vm3185_vm5, %v1387_v36, 0.0 }
 0x20f   : > { %v1392_v44 = vadd.f32 %v1390_v43, %v1359_v45  ;;  %v1393_v13 = vadd.f32 %v1391_v55, %v1360_v3 }
 0x210   : > { %2006 = vrot.lane.b32.xlu1 %v2001_v15, %s2562_s7  ;;  %v1580_v26 = vpop.permute.xlu0 %1579  ;;  %v1413_v6 = vpop.permute.xlu1 %1412 }
 0x211   : > { %v1419_v29 = vsel %vm1418_vm8, %v1413_v6, %v1415_v1 }
 0x212   : > { %v1423_v19 = vsel %vm3203_vm6, %v1419_v29, 0.0 }
 0x213   : > { %v1425_v59 = vadd.f32 %v1423_v19, %v1392_v44 }
 0x214   : > { %v1609_v63 = vpop.permute.xlu0 %1608  ;;  %v1578_v28 = vpop.permute.xlu1 %1577 }
 0x215   : > { %v1584_v16 = vsel %vm1583_vm7, %v1578_v28, %v1580_v26 }
 0x216   : > { %v1588_v58 = vsel %vm3174_vm4, %v1584_v16, 0.0 }
 0x218   : > { %v1613_v4 = vpop.permute.xlu0 %1612  ;;  %v1582_v33 = vpop.permute.xlu1 %1581 }
 0x219   : > { %v1585_v27 = vsel %vm1583_vm7, %v1580_v26, %v1582_v33  ;;  %vm1647_vm7 = vcmask 375808  }
 0x21a   : > { %v1589_v32 = vsel %vm3225_vm9, %v1585_v27, 0.0 }
 0x21c   : > { %v1642_v8 = vpop.permute.xlu0 %1641  ;;  %v1611_v17 = vpop.permute.xlu1 %1610 }
 0x21d   : > { %v1615_v46 = vsel %vm1614_vm0, %v1609_v63, %v1611_v17  ;;  %v1616_v11 = vsel %vm1614_vm0, %v1611_v17, %v1613_v4  ;;  %vm1812_vm0 = vcmask 261120  }
 0x21e   : > { %v1619_v0 = vsel %vm3152_vm14, %v1615_v46, 0.0  ;;  %v1620_v61 = vsel %vm3185_vm5, %v1616_v11, 0.0 }
 0x21f   : > { %v1621_v31 = vadd.f32 %v1619_v0, %v1588_v58  ;;  %v1622_v42 = vadd.f32 %v1620_v61, %v1589_v32 }
 0x220   : > { %v1646_v18 = vpop.permute.xlu0 %1645  ;;  %v1417_v23 = vpop.permute.xlu1 %1416 }
 0x221   : > { %v1420_v5 = vsel %vm1418_vm8, %v1415_v1, %v1417_v23  ;;  %vm1843_vm8 = vcmask 252928  }
 0x222   : > { %v1424_v40 = vsel %vm3249_vm11, %v1420_v5, 0.0 }
 0x223   : > { %v1426_v41 = vadd.f32 %v1424_v40, %v1393_v13 }
 0x224   : > { %v1809_v20 = vpop.permute.xlu0 %1808  ;;  %v1644_v51 = vpop.permute.xlu1 %1643 }
 0x225   : > { %v1648_v12 = vsel %vm1647_vm7, %v1642_v8, %v1644_v51  ;;  %v1649_v50 = vsel %vm1647_vm7, %v1644_v51, %v1646_v18  ;;  %vm1451_vm7 = vcmask 498688  }
 0x226   : > { %v1652_v34 = vsel %vm3203_vm6, %v1648_v12, 0.0  ;;  %v1653_v25 = vsel %vm3249_vm11, %v1649_v50, 0.0 }
 0x227   : > { %v1654_v45 = vadd.f32 %v1652_v34, %v1621_v31  ;;  %v1655_v60 = vadd.f32 %v1653_v25, %v1622_v42 }
 0x228   : > { %v1838_v2 = vpop.permute.xlu0 %1837  ;;  %v1807_v35 = vpop.permute.xlu1 %1806 }
 0x229   : > { %v1813_v53 = vsel %vm1812_vm0, %v1807_v35, %v1809_v20 }
 0x22a   : > { %v1817_v3 = vsel %vm3174_vm4, %v1813_v53, 0.0  ;;  %vm1876_vm4 = vcmask 244736  }
 0x22c   : > { %v1842_v1 = vpop.permute.xlu0 %1841  ;;  %v1811_v52 = vpop.permute.xlu1 %1810 }
 0x22d   : > { %v1814_v15 = vsel %vm1812_vm0, %v1809_v20, %v1811_v52  ;;  %vm1550_vm0 = vcmask 474112  }
 0x22e   : > { %v1818_v7 = vsel %vm3225_vm9, %v1814_v15, 0.0  ;;  %vm1909_vm9 = vcmask 236544  }
 0x230   : > { %v1448_v36 = vpop.permute.xlu0 %1447  ;;  %v1840_v43 = vpop.permute.xlu1 %1839 }
 0x231   : > { %v1844_v55 = vsel %vm1843_vm8, %v1838_v2, %v1840_v43  ;;  %v1845_v44 = vsel %vm1843_vm8, %v1840_v43, %v1842_v1  ;;  %vm4141_vm8 = vnez %v4137_v22 }
 0x232   : > { %v1848_v13 = vsel %vm3152_vm14, %v1844_v55, 0.0  ;;  %v1849_v26 = vsel %vm3185_vm5, %v1845_v44, 0.0  ;;  %vm1680_vm14 = vcmask 367616   ;;  %vm1484_vm5 = vcmask 490496  }
 0x233   : > { %v1850_v48 = vadd.f32 %v1848_v13, %v1817_v3  ;;  %v1851_v6 = vadd.f32 %v1849_v26, %v1818_v7 }
 0x234   : > { %v1675_v29 = vpop.permute.xlu0 %1674  ;;  %v1446_v19 = vpop.permute.xlu1 %1445 }
 0x235   : > { %v1452_v63 = vsel %vm1451_vm7, %v1446_v19, %v1448_v36 }
 0x236   : > { %v1456_v62 = vsel %vm3278_vm1, %v1452_v63, 0.0 }
 0x237   : > { %v1458_v28 = vadd.f32 %v1456_v62, %v1425_v59 }
 0x238   : > { %v1679_v16 = vpop.permute.xlu0 %1678  ;;  %v1450_v58 = vpop.permute.xlu1 %1449 }
 0x239   : > { %v1453_v4 = vsel %vm1451_vm7, %v1448_v36, %v1450_v58  ;;  %vm2008_vm7 = vcmask 211968  }
 0x23a   : > { %v1457_v10 = vsel %vm3295_vm2, %v1453_v4, 0.0 }
 0x23b   : > { %v1459_v33 = vadd.f32 %v1457_v10, %v1426_v41 }
 0x23c   : > { %v1873_v14 = vpop.permute.xlu0 %1872  ;;  %v1677_v27 = vpop.permute.xlu1 %1676 }
 0x23d   : > { %v1681_v32 = vsel %vm1680_vm14, %v1675_v29, %v1677_v27  ;;  %v1682_v8 = vsel %vm1680_vm14, %v1677_v27, %v1679_v16 }
 0x23e   : > { %v1685_v17 = vsel %vm3278_vm1, %v1681_v32, 0.0  ;;  %v1686_v46 = vsel %vm3295_vm2, %v1682_v8, 0.0 }
 0x23f   : > { %v1687_v59 = vadd.f32 %v1685_v17, %v1654_v45  ;;  %v1688_v11 = vadd.f32 %v1686_v46, %v1655_v60 }
 0x240   : > { %v1479_v0 = vpop.permute.xlu0 %1478  ;;  %v1871_v61 = vpop.permute.xlu1 %1870 }
 0x241   : > { %v1877_v31 = vsel %vm1876_vm4, %v1871_v61, %v1873_v14 }
 0x242   : > { %v1881_v42 = vsel %vm3203_vm6, %v1877_v31, 0.0  ;;  %vm1713_vm6 = vcmask 359424  }
 0x243   : > { %v1883_v18 = vadd.f32 %v1881_v42, %v1850_v48 }
 0x244   : > { %v1483_v23 = vpop.permute.xlu0 %1482  ;;  %v1875_v5 = vpop.permute.xlu1 %1874 }
 0x245   : > { %v1878_v40 = vsel %vm1876_vm4, %v1873_v14, %v1875_v5 }
 0x246   : > { %v1882_v41 = vsel %vm3249_vm11, %v1878_v40, 0.0  ;;  %vm1517_vm11 = vcmask 482304  }
 0x247   : > { %v1884_v20 = vadd.f32 %v1882_v41, %v1851_v6 }
 0x248   : > { %v1710_v51 = vpop.permute.xlu0 %1709  ;;  %v1481_v12 = vpop.permute.xlu1 %1480 }
 0x249   : > { %v1485_v50 = vsel %vm1484_vm5, %v1479_v0, %v1481_v12  ;;  %v1486_v34 = vsel %vm1484_vm5, %v1481_v12, %v1483_v23 }
 0x24a   : > { %v1489_v25 = vsel %vm4092_vm3, %v1485_v50, 0.0  ;;  %v1490_v47 = vsel %vm3367_vm15, %v1486_v34, 0.0 }
 0x24b   : > { %v1491_v45 = vadd.f32 %v1489_v25, %v1458_v28  ;;  %v1492_v60 = vadd.f32 %v1490_v47, %v1459_v33 }
 0x24c   : > { %v1904_v2 = vpop.permute.xlu0 %1903  ;;  %v1708_v35 = vpop.permute.xlu1 %1707 }
 0x24d   : > { %v1714_v53 = vsel %vm1713_vm6, %v1708_v35, %v1710_v51 }
 0x24e   : > { %v1718_v37 = vsel %vm4092_vm3, %v1714_v53, 0.0 }
 0x24f   : > { %v1720_v3 = vadd.f32 %v1718_v37, %v1687_v59 }
 0x250   : > { %v1908_v1 = vpop.permute.xlu0 %1907  ;;  %v1712_v52 = vpop.permute.xlu1 %1711 }
 0x251   : > { %v1715_v15 = vsel %vm1713_vm6, %v1710_v51, %v1712_v52 }
 0x252   : > { %v1719_v7 = vsel %vm3367_vm15, %v1715_v15, 0.0 }
 0x253   : > { %v1721_v36 = vadd.f32 %v1719_v7, %v1688_v11 }
 0x254   : > { %v1514_v43 = vpop.permute.xlu0 %1513  ;;  %v1906_v55 = vpop.permute.xlu1 %1905 }
 0x255   : > { %v1910_v44 = vsel %vm1909_vm9, %v1904_v2, %v1906_v55  ;;  %v1911_v13 = vsel %vm1909_vm9, %v1906_v55, %v1908_v1 }
 0x256   : > { %v1914_v26 = vsel %vm3278_vm1, %v1910_v44, 0.0  ;;  %v1915_v48 = vsel %vm3295_vm2, %v1911_v13, 0.0  ;;  %vm1746_vm1 = vcmask 351232   ;;  %vm1942_vm2 = vcmask 228352  }
 0x257   : > { %v1916_v6 = vadd.f32 %v1914_v26, %v1883_v18  ;;  %v1917_v29 = vadd.f32 %v1915_v48, %v1884_v20 }
 0x258   : > { %v1741_v19 = vpop.permute.xlu0 %1740  ;;  %v1512_v63 = vpop.permute.xlu1 %1511 }
 0x259   : > { %v1518_v62 = vsel %vm1517_vm11, %v1512_v63, %v1514_v43 }
 0x25a   : > { %v1522_v28 = vsel %vm4119_vm10, %v1518_v62, 0.0 }
 0x25b   : > { %v1524_v16 = vadd.f32 %v1522_v28, %v1491_v45 }
 0x25c   : > { %v1745_v58 = vpop.permute.xlu0 %1744  ;;  %v1516_v4 = vpop.permute.xlu1 %1515 }
 0x25d   : > { %v1519_v10 = vsel %vm1517_vm11, %v1514_v43, %v1516_v4 }
 0x25e   : > { %v1523_v49 = vsel %vm4131_vm13, %v1519_v10, 0.0 }
 0x25f   : > { %v1525_v33 = vadd.f32 %v1523_v49, %v1492_v60 }
 0x260   : > { %v1939_v24 = vpop.permute.xlu0 %1938  ;;  %v1743_v14 = vpop.permute.xlu1 %1742 }
 0x261   : > { %v1747_v27 = vsel %vm1746_vm1, %v1741_v19, %v1743_v14  ;;  %v1748_v32 = vsel %vm1746_vm1, %v1743_v14, %v1745_v58 }
 0x262   : > { %v1751_v8 = vsel %vm4119_vm10, %v1747_v27, 0.0  ;;  %v1752_v17 = vsel %vm4131_vm13, %v1748_v32, 0.0 }
 0x263   : > { %v1753_v46 = vadd.f32 %v1751_v8, %v1720_v3  ;;  %v1754_v59 = vadd.f32 %v1752_v17, %v1721_v36 }
 0x264   : > { %v1545_v11 = vpop.permute.xlu0 %1544 }
 0x266   : > { %v1937_v0 = vpop.permute.xlu1 %1936 }
 0x267   : > { %v1943_v61 = vsel %vm1942_vm2, %v1937_v0, %v1939_v24 }
 0x268   : > { %v1947_v31 = vsel %vm4092_vm3, %v1943_v61, 0.0  ;;  %v1549_v18 = vpop.permute.xlu0 %1548  ;;  %vm1779_vm3 = vcmask 343040  }
 0x269   : > { %v1949_v42 = vadd.f32 %v1947_v31, %v1916_v6 }
 0x26a   : > { %v1941_v23 = vpop.permute.xlu1 %1940 }
 0x26b   : > { %v1944_v5 = vsel %vm1942_vm2, %v1939_v24, %v1941_v23 }
 0x26c   : > { %v1948_v40 = vsel %vm3367_vm15, %v1944_v5, 0.0  ;;  %v1776_v20 = vpop.permute.xlu0 %1775  ;;  %vm1975_vm15 = vcmask 220160  }
 0x26d   : > { %v1950_v41 = vadd.f32 %v1948_v40, %v1917_v29 }
 0x26e   : > { %v1547_v51 = vpop.permute.xlu1 %1546 }
 0x26f   : > { %v1551_v12 = vsel %vm1550_vm0, %v1545_v11, %v1547_v51  ;;  %v1552_v50 = vsel %vm1550_vm0, %v1547_v51, %v1549_v18 }
 0x270   : > { %v1555_v34 = vsel %vm4136_vm12, %v1551_v12, 0.0  ;;  %v1556_v39 = vsel %vm4141_vm8, %v1552_v50, 0.0  ;;  %v1970_v45 = vpop.permute.xlu0 %1969 }
 0x271   : > { %v1557_v25 = vadd.f32 %v1555_v34, %v1524_v16  ;;  %v1558_v47 = vadd.f32 %v1556_v39, %v1525_v33 }
 0x272   : > { %v1774_v60 = vpop.permute.xlu1 %1773 }
 0x273   : > { %v1780_v2 = vsel %vm1779_vm3, %v1774_v60, %v1776_v20 }
 0x274   : > { %v1784_v21 = vsel %vm4136_vm12, %v1780_v2, 0.0 }
 0x275   : > { %v1786_v35 = vadd.f32 %v1784_v21, %v1753_v46  ;;  %v2392_v46 = vld [vmem:[%s2717_s19] sm:$0xff]  ;;  %s2444_s19 = scalar_lea.vmem %s2443_s6, 256 }
 0x276   : > { %v1778_v53 = vpop.permute.xlu1 %1777  ;;  %p2446_p3 = scmp.lt.s32.totalorder %s2444_s19, %s2438_s23 }
 0x277   : > { %v2021_v37 = vadd.f32 %v1786_v35, %v1557_v25  ;;  %v1781_v3 = vsel %vm1779_vm3, %v1776_v20, %v1778_v53  ;;  %v1974_v1 = vpop.permute.xlu0 %1973 }
 0x278   : > { %v1785_v52 = vsel %vm4141_vm8, %v1781_v3, 0.0  ;;  %p2447_p12 = por %p2446_p3, %p2445_p0 }
 0x279   : > { %v1787_v15 = vadd.f32 %v1785_v52, %v1754_v59 }
 0x27a   : > { %v1972_v7 = vpop.permute.xlu1 %1971  ;;  %p2448_p5 = pnand %p2447_p12, %p2441_p7 }
 0x27b   : > { %v2022_v36 = vadd.f32 %v1787_v15, %v1558_v47  ;;  %v1976_v43 = vsel %vm1975_vm15, %v1970_v45, %v1972_v7  ;;  %v1977_v55 = vsel %vm1975_vm15, %v1972_v7, %v1974_v1  ;;  %v2005_v6 = vpop.permute.xlu0 %2004 }
 0x27c   : > { %v1980_v44 = vsel %vm4119_vm10, %v1976_v43, 0.0  ;;  %v1981_v13 = vsel %vm4131_vm13, %v1977_v55, 0.0 }
 0x27d   : > { %v1982_v26 = vadd.f32 %v1980_v44, %v1949_v42  ;;  %v1983_v48 = vadd.f32 %v1981_v13, %v1950_v41 }
 0x27e   : > { %v2003_v29 = vpop.permute.xlu1 %2002 }
 0x27f   : > { %v2009_v19 = vsel %vm2008_vm7, %v2003_v29, %v2005_v6 }
 0x280   : > { %v2013_v63 = vsel %vm4136_vm12, %v2009_v19, 0.0 }
 0x281   : > { %v2015_v62 = vadd.f32 %v2013_v63, %v1982_v26 }
 0x282   : > { %v2007_v28 = vpop.permute.xlu1 %2006 }
 0x283   : > { %v2025_v16 = vadd.f32 %v2021_v37, %v2015_v62  ;;  %v2010_v58 = vsel %vm2008_vm7, %v2005_v6, %v2007_v28 }
 0x284   : > { %v2014_v9 = vsel %vm4141_vm8, %v2010_v58, 0.0 }
 0x285   : > { %v2027_v4 = vadd.f32 %v2025_v16, %v3831_v38  ;;  %v2016_v57 = vadd.f32 %v2014_v9, %v1983_v48 }
 0x287   : > { %v2260_v10 = vmul.f32 -1.442695, %v2027_v4  ;;  %v2026_v49 = vadd.f32 %v2022_v36, %v2016_v57 }
 0x289   : > { %2382 = vpow2.f32 %v2260_v10  ;;  %v2028_v33 = vadd.f32 %v2026_v49, %v3833_v54 }
 0x28b   : > { %v2261_v24 = vmul.f32 -1.442695, %v2028_v33 }
 0x28d   : > { %2384 = vpow2.f32 %v2261_v24 }
 0x293   : > { %v2383_v30 = vpop.eup %2382 }
 0x294   : > { %v2035_v14 = vadd.f32 1.0, %v2383_v30 }
 0x296   : > { %2386 = vrcp.f32 %v2035_v14 }
 0x297   : > { %v2385_v27 = vpop.eup %2384 }
 0x298   : > { %v2036_v22 = vadd.f32 1.0, %v2385_v27 }
 0x29a   : > { %2388 = vrcp.f32 %v2036_v22 }
 0x2a0   : > { %v2387_v32 = vpop.eup %2386 }
 0x2a1   : > { %v2044_v8 = vrot.slane %v2387_v32, %v2740_v56 }
 0x2a4   : > { %v2389_v38 = vpop.eup %2388 }
 0x2a5   : > { %v2048_v17 = vrot.slane %v2389_v38, %v2740_v56 }
 0x2a7   : > { %v2051_v54 = vcombine.low %v2044_v8, %v2048_v17 }
 0x2a9   : > { %v2053_v59 = vmul.f32 %v2392_v46, %v2051_v54 }
 0x2ab   : > { %2054 = vst [vmem:[%s173_s17] sm:$0xff] %v2053_v59 }
 0x2ac   : > { %2451 = shalt.err (!%p2448_p5)
}
 0x2ad   : > { %s2452_s5 = scalar_lea.hbm %s3935_s27, 128  ;;  %s2456_s25 = scalar_lea.hbm %s3981_s2, 256 }
 0x2ae   : > { %p2453_p10 = scmp.ne.s32.totalorder %s3935_s27, %s2452_s5  ;;  %p2457_p4 = scmp.lt.u32.totalorder %s3935_s27, %s3981_s2 }
 0x2af   : > { %p2458_p6 = scmp.lt.u32.totalorder %s2456_s25, %s2452_s5  ;;  %p2460_p9 = scmp.lt.u32.totalorder %s2452_s5, %s3935_s27 }
 0x2b0   : > { %p2454_p2 = pnand %p2453_p10, %p4142_p11 }
 0x2b1   : > { %p2459_p8 = por %p2458_p6, %p2457_p4 }
 0x2b2   : > { %p2455_p1 = pneg %p2454_p2 }
 0x2b3   : > { %p2461_p13 = por %p2460_p9, %p2459_p8 }
 0x2b5   : > { %p2462_p7 = pnand %p2461_p13, %p2455_p1 }
 0x2b7   : > { %2465 = shalt.err (!%p2462_p7)
}
 0x2b8   : > { %2279 = dma.vmem_to_hbm [thread:$0]  (%p4142_p11), %s3937_s18, 128, %s3935_s27, %s2056_s8  }
 0x2b9 PF: > { %s2082_s15 = sand.u32 1, %s2496_s9   ;;  %p4143_p0 = scmp.ne.s32.totalorder %s4013_s16, 0 }
 0x2ba   : > { %p4144_p3 = scmp.ge.s32.totalorder %s2508_s12, 2  ;;  %s2083_s20 = scalar_lea.sflag [#allocation6], %s2082_s15 }
 0x2bc   : > { %p2290_p12 = pnand %p4144_p3, %p4143_p0 }
 0x2be   : > { %2491 = dma.done.wait (!%p2290_p12), %s2083_s20, 128  }
 0x2bf   : > { %2493 = vsyncadd (!%p2290_p12), %s2083_s20, 4294967168  ;;  %p16_p5 = scmp.ge.s32.totalorder %s2630_s21, 4   ;;  %s4145_s9 = smov %s2500_s10 }
 0x2c0   : > { %s4146_s10 = smov %s2504_s11  ;;  %s4147_s11 = smov %s2654_s28 }
 0x2c1   : > { %s4148_s12 = smov %s2630_s21  ;;  %18 = sbr.rel (!%p16_p5) target bundleno = 6 (0x6), region = 78 }
 0x2c8   :  { %2088 = vsyncpa [#allocation5], 1 }
 0x2c9   :  { %2090 = vsyncpa [#allocation5 + $0x1], 1 }
 0x2ca   :  { %2091 = vsyncpa [#allocation6], 1 }
 0x2cb   :  { %2093 = vsyncpa [#allocation6 + $0x1], 1 }
 0x2cc   :  { %2094 = vsyncpa [#allocation7], 1 }
 0x2cd   :  { %2096 = vsyncpa [#allocation7 + $0x1], 1 }

</bundles_post_ra>
